<compile_context>
chip_gen: v7x
topology: tpu7x:2x2x1
jax: 0.10.0
libtpu: 0.0.40
codegen_flags: <defaults>
</compile_context>

<pallas_src>
import functools
import math

import jax
import jax.numpy as jnp
from jax.experimental import pallas as pl
from jax.experimental.pallas import tpu as pltpu


NEG_INF = -1e9
ACT_DTYPE = jnp.bfloat16       # inter-kernel activation carry dtype

# Toy config (lane-dense feature dims; real mBART: D=1024, 16 heads, V~250k).
CFG = dict(vocab=256, d_model=256, heads=2, ffn=512,
           enc_layers=1, dec_layers=1, max_pos=64, pad_id=1)


def _bf16(x):
    return x.astype(jnp.bfloat16)


def _row_tile(m, pref=256):
    """Largest row tile <= pref that divides m (prefer big MXU-filling tiles)."""
    if m <= pref:
        return m
    for t in (pref, 512, 256, 128, 64, 32, 16, 8):
        if t <= pref and m % t == 0:
            return t
    return m


def _ln(x, g, b, eps):
    mu = jnp.mean(x, axis=-1, keepdims=True)
    xc = x - mu
    var = jnp.mean(xc * xc, axis=-1, keepdims=True)
    return xc * jax.lax.rsqrt(var + eps) * g + b


# ----------------------------------------------------------------------------
# Pallas kernels
# ----------------------------------------------------------------------------

def _self_attn_kernel(*refs, heads, causal, emb_ln, eps):
    """Fused pre-norm self-attention block for one batch element.

    (optional fused embedding LayerNorm) -> LN -> Q proj (+scale) -> fused K/V
    proj -> per-head softmax attention with in-kernel additive mask -> heads
    concatenated -> ONE out-projection -> + residual.
    """
    if emb_ln:
        (x_ref, mask_ref, eg_ref, eb_ref, lng_ref, lnb_ref,
         wq_ref, bq_ref, wkv_ref, bkv_ref, wo_ref, bo_ref, o_ref) = refs
    else:
        (x_ref, mask_ref, lng_ref, lnb_ref,
         wq_ref, bq_ref, wkv_ref, bkv_ref, wo_ref, bo_ref, o_ref) = refs

    x = x_ref[...].astype(jnp.float32)                 # (T, D)
    if emb_ln:                                          # fused layernorm_embedding
        x = _ln(x, eg_ref[...], eb_ref[...], eps)       # (residual base)
    T, D = x.shape
    Dh = D // heads
    scale = 1.0 / math.sqrt(Dh)

    hn = _ln(x, lng_ref[...], lnb_ref[...], eps)        # pre-norm LN

    # Projections on the MXU: bf16 inputs/weights, f32 accumulation.
    q = jnp.dot(_bf16(hn), wq_ref[...],
                preferred_element_type=jnp.float32) + bq_ref[...]
    q = q * scale                                       # fold 1/sqrt(Dh) into Q
    kv = jnp.dot(_bf16(hn), wkv_ref[...],
                 preferred_element_type=jnp.float32) + bkv_ref[...]
    k = kv[:, :D]
    v = kv[:, D:]

    # Additive mask built in-kernel from a thin pad-bias row (+ causal iota).
    bias = mask_ref[...]                                # (1, T)
    if causal:
        rows = jax.lax.broadcasted_iota(jnp.int32, (T, T), 0)
        cols = jax.lax.broadcasted_iota(jnp.int32, (T, T), 1)
        bias = bias + jnp.where(cols <= rows, 0.0, NEG_INF)

    heads_out = []
    for h in range(heads):                              # Dh=128 -> aligned slices
        sl = slice(h * Dh, (h + 1) * Dh)
        s = jnp.einsum("qd,kd->qk", _bf16(q[:, sl]), _bf16(k[:, sl]),
                       preferred_element_type=jnp.float32)      # (T, T)
        s = s + bias
        m = jnp.max(s, axis=-1, keepdims=True)
        p = jnp.exp(s - m)
        p = p * pl.reciprocal(jnp.sum(p, axis=-1, keepdims=True), approx=True)
        heads_out.append(jnp.dot(_bf16(p), _bf16(v[:, sl]),
                                 preferred_element_type=jnp.float32))

    ctx = jnp.concatenate(heads_out, axis=-1)           # (T, D)
    out = jnp.dot(_bf16(ctx), wo_ref[...],              # single K=D out-proj
                  preferred_element_type=jnp.float32) + bo_ref[...] + x
    o_ref[...] = out.astype(o_ref.dtype)


def _cross_attn_kernel(xq_ref, xkv_ref, mask_ref, lng_ref, lnb_ref,
                       wq_ref, bq_ref, wkv_ref, bkv_ref, wo_ref, bo_ref,
                       o_ref, *, heads, eps):
    """Fused pre-norm cross-attention block (K/V from encoder output)."""
    xq = xq_ref[...].astype(jnp.float32)                # (TQ, D)
    TQ, D = xq.shape
    Dh = D // heads
    scale = 1.0 / math.sqrt(Dh)

    hn = _ln(xq, lng_ref[...], lnb_ref[...], eps)
    src = xkv_ref[...]                                  # (Tk, D) encoder output

    q = jnp.dot(_bf16(hn), wq_ref[...],
                preferred_element_type=jnp.float32) + bq_ref[...]
    q = q * scale
    kv = jnp.dot(_bf16(src), wkv_ref[...],
                 preferred_element_type=jnp.float32) + bkv_ref[...]
    k = kv[:, :D]
    v = kv[:, D:]

    bias = mask_ref[...]                                # (1, Tk) pad bias

    heads_out = []
    for h in range(heads):
        sl = slice(h * Dh, (h + 1) * Dh)
        s = jnp.einsum("qd,kd->qk", _bf16(q[:, sl]), _bf16(k[:, sl]),
                       preferred_element_type=jnp.float32)      # (TQ, Tk)
        s = s + bias
        m = jnp.max(s, axis=-1, keepdims=True)
        p = jnp.exp(s - m)
        p = p * pl.reciprocal(jnp.sum(p, axis=-1, keepdims=True), approx=True)
        heads_out.append(jnp.dot(_bf16(p), _bf16(v[:, sl]),
                                 preferred_element_type=jnp.float32))

    ctx = jnp.concatenate(heads_out, axis=-1)           # (TQ, D)
    out = jnp.dot(_bf16(ctx), wo_ref[...],
                  preferred_element_type=jnp.float32) + bo_ref[...] + xq
    o_ref[...] = out.astype(o_ref.dtype)


def _ffn_layer_kernel(*refs, eps, out_ln):
    """Fused pre-norm FFN: LN -> fc1+GELU -> fc2 -> +residual (-> final LN)."""
    if out_ln:
        (x_ref, lng_ref, lnb_ref, w1_ref, b1_ref, w2_ref, b2_ref,
         og_ref, ob_ref, o_ref) = refs
    else:
        (x_ref, lng_ref, lnb_ref, w1_ref, b1_ref, w2_ref, b2_ref, o_ref) = refs

    x = x_ref[...].astype(jnp.float32)
    hn = _ln(x, lng_ref[...], lnb_ref[...], eps)

    h1 = jnp.dot(_bf16(hn), w1_ref[...],
                 preferred_element_type=jnp.float32) + b1_ref[...]
    # TODO(synk): HF mBART uses exact (erf) GELU; tanh approximation used here.
    h1 = jax.nn.gelu(h1, approximate=True)
    y = jnp.dot(_bf16(h1), w2_ref[...],
                preferred_element_type=jnp.float32) + b2_ref[...]
    y = y + x
    if out_ln:                                          # fused final layer_norm
        y = _ln(y, og_ref[...], ob_ref[...], eps)
    o_ref[...] = y.astype(o_ref.dtype)
    # TODO(synk): at production scale (D=1024, F=4096) tile the F axis as an
    # extra "arbitrary" grid axis with a VMEM f32 accumulator (v7x 64 MiB VMEM).


def _lmhead_ce_kernel(x_ref, lab_ref, emb_ref, lbias_ref,
                      logits_ref, loss_ref):
    """Fused tied LM head + per-row cross entropy, tiled over rows.

    Tied bf16 embedding is contracted on its feature axis (no HBM transpose).
    Labels arrive as an (TM,1) int32 VMEM block; the one-hot is one broadcast
    compare.  Rows with label < 0 (HF ignore_index=-100) contribute zero loss.
    Each grid step writes only its own blocks -> safe under "parallel".
    # TODO(synk): at real vocab (~250k) also tile the vocab axis with an
    # online logsumexp; the toy vocab (256) fits in one lane-dense block.
    """
    x = x_ref[...]                                          # (TM, D)
    logits = jax.lax.dot_general(
        _bf16(x), emb_ref[...],
        (((1,), (1,)), ((), ())),                           # contract D vs D
        preferred_element_type=jnp.float32) + lbias_ref[...]
    logits_ref[...] = logits.astype(logits_ref.dtype)       # bf16 writeback

    m = jnp.max(logits, axis=-1, keepdims=True)
    lse = m + jnp.log(jnp.sum(jnp.exp(logits - m), axis=-1, keepdims=True))

    lab = lab_ref[...]                                      # (TM, 1) int32
    TM, V = logits.shape
    col = jax.lax.broadcasted_iota(jnp.int32, (TM, V), 1)
    onehot = (col == lab).astype(jnp.float32)               # (TM, V)
    valid = (lab >= 0).astype(jnp.float32)                  # (TM, 1)

    tgt = jnp.sum(logits * onehot, axis=-1, keepdims=True)  # (TM, 1)
    loss_ref[...] = (lse - tgt) * valid                     # per-row loss


# ----------------------------------------------------------------------------
# pallas_call wrappers
# ----------------------------------------------------------------------------

def self_attn_layer(x, mask_bias, ln_p, attn_p, *, heads, causal, emb_ln_p=None):
    B, T, D = x.shape
    emb_ln = emb_ln_p is not None

    def const(shape):
        # constant across the grid -> single-buffer (halves VMEM residency)
        return pl.BlockSpec(shape, lambda b: (0,) * len(shape),
                            pipeline_mode=pl.Buffered(1))

    in_specs = [pl.BlockSpec((None, T, D), lambda b: (b, 0, 0)),
                pl.BlockSpec((None, 1, T), lambda b: (b, 0, 0))]
    args = [x, mask_bias]
    if emb_ln:
        in_specs += [const((1, D)), const((1, D))]
        args += [emb_ln_p["g"].reshape(1, D), emb_ln_p["b"].reshape(1, D)]
    in_specs += [const((1, D)), const((1, D)),
                 const((D, D)), const((1, D)),
                 const((D, 2 * D)), const((1, 2 * D)),
                 const((D, D)), const((1, D))]
    args += [ln_p["g"].reshape(1, D), ln_p["b"].reshape(1, D),
             attn_p["wq"], attn_p["bq"].reshape(1, D),
             attn_p["wkv"], attn_p["bkv"].reshape(1, 2 * D),
             attn_p["wo"], attn_p["bo"].reshape(1, D)]

    return pl.pallas_call(
        functools.partial(_self_attn_kernel, heads=heads, causal=causal,
                          emb_ln=emb_ln, eps=1e-5),
        out_shape=jax.ShapeDtypeStruct((B, T, D), ACT_DTYPE),
        grid=(B,),
        in_specs=in_specs,
        out_specs=pl.BlockSpec((None, T, D), lambda b: (b, 0, 0)),
        compiler_params=pltpu.CompilerParams(
            dimension_semantics=("parallel",)),
    )(*args)
    # TODO(synk): Tq-tiling self-attention additionally needs a full-sequence
    # K/V input; only cross-attention is Tq-tiled below.


def cross_attn_layer(x_q, x_kv, mask_bias, ln_p, attn_p, *, heads):
    B, Tq, D = x_q.shape
    Tk = x_kv.shape[1]
    TQ = _row_tile(Tq, 256)
    n_tq = Tq // TQ

    def const(shape):
        return pl.BlockSpec(shape, lambda b, qi: (0,) * len(shape),
                            pipeline_mode=pl.Buffered(1))

    return pl.pallas_call(
        functools.partial(_cross_attn_kernel, heads=heads, eps=1e-5),
        out_shape=jax.ShapeDtypeStruct((B, Tq, D), ACT_DTYPE),
        grid=(B, n_tq),
        in_specs=[
            pl.BlockSpec((None, TQ, D), lambda b, qi: (b, qi, 0)),
            pl.BlockSpec((None, Tk, D), lambda b, qi: (b, 0, 0)),
            pl.BlockSpec((None, 1, Tk), lambda b, qi: (b, 0, 0)),
            const((1, D)), const((1, D)),
            const((D, D)), const((1, D)),
            const((D, 2 * D)), const((1, 2 * D)),
            const((D, D)), const((1, D)),
        ],
        out_specs=pl.BlockSpec((None, TQ, D), lambda b, qi: (b, qi, 0)),
        compiler_params=pltpu.CompilerParams(
            dimension_semantics=("parallel", "parallel")),
    )(x_q, x_kv, mask_bias,
      ln_p["g"].reshape(1, D), ln_p["b"].reshape(1, D),
      attn_p["wq"], attn_p["bq"].reshape(1, D),
      attn_p["wkv"], attn_p["bkv"].reshape(1, 2 * D),
      attn_p["wo"], attn_p["bo"].reshape(1, D))


def ffn_layer(x, ln_p, ffn_p, *, out_ln_p=None):
    B, T, D = x.shape
    M = B * T
    F = ffn_p["w1"].shape[1]
    TM = _row_tile(M, 256)
    out_ln = out_ln_p is not None

    def const(shape):
        return pl.BlockSpec(shape, lambda i: (0,) * len(shape),
                            pipeline_mode=pl.Buffered(1))

    in_specs = [pl.BlockSpec((TM, D), lambda i: (i, 0)),
                const((1, D)), const((1, D)),
                const((D, F)), const((1, F)),
                const((F, D)), const((1, D))]
    args = [x.reshape(M, D),
            ln_p["g"].reshape(1, D), ln_p["b"].reshape(1, D),
            ffn_p["w1"], ffn_p["b1"].reshape(1, F),
            ffn_p["w2"], ffn_p["b2"].reshape(1, D)]
    if out_ln:
        in_specs += [const((1, D)), const((1, D))]
        args += [out_ln_p["g"].reshape(1, D), out_ln_p["b"].reshape(1, D)]

    out = pl.pallas_call(
        functools.partial(_ffn_layer_kernel, eps=1e-5, out_ln=out_ln),
        out_shape=jax.ShapeDtypeStruct((M, D), ACT_DTYPE),
        grid=(M // TM,),
        in_specs=in_specs,
        out_specs=pl.BlockSpec((TM, D), lambda i: (i, 0)),
        compiler_params=pltpu.CompilerParams(
            dimension_semantics=("parallel",)),
    )(*args)
    return out.reshape(B, T, D)


def lm_head_ce(dec_out2d, embed, final_bias, labels1d):
    M, D = dec_out2d.shape
    V = embed.shape[0]
    TM = _row_tile(M, 256)
    labels = labels1d.astype(jnp.int32).reshape(M, 1)

    def const(shape):
        return pl.BlockSpec(shape, lambda i: (0,) * len(shape),
                            pipeline_mode=pl.Buffered(1))

    logits, rowloss = pl.pallas_call(
        _lmhead_ce_kernel,
        out_shape=(jax.ShapeDtypeStruct((M, V), jnp.bfloat16),
                   jax.ShapeDtypeStruct((M, 1), jnp.float32)),
        grid=(M // TM,),
        in_specs=[pl.BlockSpec((TM, D), lambda i: (i, 0)),
                  pl.BlockSpec((TM, 1), lambda i: (i, 0)),
                  const((V, D)),
                  const((1, V))],
        out_specs=[pl.BlockSpec((TM, V), lambda i: (i, 0)),
                   pl.BlockSpec((TM, 1), lambda i: (i, 0))],
        compiler_params=pltpu.CompilerParams(
            dimension_semantics=("parallel",)),          # megacore-safe on v7x
    )(dec_out2d, labels, embed, final_bias.reshape(1, V))

    n_valid = jnp.sum((labels1d >= 0).astype(jnp.float32))
    loss = jnp.sum(rowloss) / jnp.maximum(n_valid, 1.0)  # HF token-mean CE
    return loss, logits


# ----------------------------------------------------------------------------
# mBART-like model (glue in plain JAX, compute in the fused kernels above)
# ----------------------------------------------------------------------------

def init_params(key, cfg):
    D, V, F = cfg["d_model"], cfg["vocab"], cfg["ffn"]

    def dense(k, din, dout):                       # weights stored bf16 in HBM
        return (0.02 * jax.random.normal(k, (din, dout), jnp.float32)
                ).astype(jnp.bfloat16)

    def ln():
        return {"g": jnp.ones((D,), jnp.float32),
                "b": jnp.zeros((D,), jnp.float32)}

    def attn(k):
        ks = jax.random.split(k, 3)
        return {"wq": dense(ks[0], D, D), "bq": jnp.zeros((D,), jnp.float32),
                "wkv": dense(ks[1], D, 2 * D),     # fused K|V projection
                "bkv": jnp.zeros((2 * D,), jnp.float32),
                "wo": dense(ks[2], D, D), "bo": jnp.zeros((D,), jnp.float32)}

    def ffn(k):
        ks = jax.random.split(k, 2)
        return {"w1": dense(ks[0], D, F), "b1": jnp.zeros((F,), jnp.float32),
                "w2": dense(ks[1], F, D), "b2": jnp.zeros((D,), jnp.float32)}

    def enc_layer(k):
        ks = jax.random.split(k, 2)
        return {"sa": attn(ks[0]), "sa_ln": ln(),
                "ffn": ffn(ks[1]), "final_ln": ln()}

    def dec_layer(k):
        ks = jax.random.split(k, 3)
        return {"sa": attn(ks[0]), "sa_ln": ln(),
                "ca": attn(ks[1]), "ca_ln": ln(),
                "ffn": ffn(ks[2]), "final_ln": ln()}

    keys = jax.random.split(key, 6)
    return {
        "embed": (0.02 * jax.random.normal(keys[0], (V, D), jnp.float32)
                  ).astype(jnp.bfloat16),           # tied embedding, bf16
        "pos_enc": 0.02 * jax.random.normal(keys[1], (cfg["max_pos"] + 2, D),
                                            jnp.float32),
        "pos_dec": 0.02 * jax.random.normal(keys[2], (cfg["max_pos"] + 2, D),
                                            jnp.float32),
        "ln_emb_enc": ln(), "ln_emb_dec": ln(),
        "ln_final_enc": ln(), "ln_final_dec": ln(),
        "enc": [enc_layer(k) for k in
                jax.random.split(keys[3], cfg["enc_layers"])],
        "dec": [dec_layer(k) for k in
                jax.random.split(keys[4], cfg["dec_layers"])],
        "final_logits_bias": jnp.zeros((V,), jnp.float32),
    }


def shift_tokens_right(labels, pad_id):
    # mBART: last non-pad token of each row is wrapped to position 0.
    labels = jnp.where(labels < 0, pad_id, labels)     # HF: -100 -> pad first
    n_nonpad = jnp.sum(labels != pad_id, axis=1)
    idx_eos = jnp.maximum(n_nonpad - 1, 0)[:, None]    # clamp fully-padded rows
    dec_start = jnp.take_along_axis(labels, idx_eos, axis=1)
    return jnp.concatenate([dec_start, labels[:, :-1]], axis=1)


def mbart_forward(params, input_ids, attention_mask, labels, cfg):
    D, H = cfg["d_model"], cfg["heads"]
    emb_scale = math.sqrt(D)
    B, Ts = input_ids.shape
    Tt = labels.shape[1]

    # Thin additive pad-bias rows (full masks are built in-kernel).
    enc_pad_bias = ((1.0 - attention_mask.astype(jnp.float32)) * NEG_INF
                    ).reshape(B, 1, Ts)
    dec_zero_bias = jnp.zeros((B, 1, Tt), jnp.float32)

    # ---------------- encoder ----------------
    x = jnp.take(params["embed"], input_ids, axis=0).astype(jnp.float32)
    x = x * emb_scale
    x = x + jnp.take(params["pos_enc"], jnp.arange(Ts) + 2, axis=0)[None]
    x = x.astype(ACT_DTYPE)
    n_enc = len(params["enc"])
    for li, lyr in enumerate(params["enc"]):
        x = self_attn_layer(
            x, enc_pad_bias, lyr["sa_ln"], lyr["sa"], heads=H, causal=False,
            emb_ln_p=params["ln_emb_enc"] if li == 0 else None)
        x = ffn_layer(
            x, lyr["final_ln"], lyr["ffn"],
            out_ln_p=params["ln_final_enc"] if li == n_enc - 1 else None)
    enc_out = x                                        # final LN fused above

    # ---------------- decoder ----------------
    dec_input_ids = shift_tokens_right(labels, cfg["pad_id"])
    y = jnp.take(params["embed"], dec_input_ids, axis=0).astype(jnp.float32)
    y = y * emb_scale
    y = y + jnp.take(params["pos_dec"], jnp.arange(Tt) + 2, axis=0)[None]
    y = y.astype(ACT_DTYPE)
    n_dec = len(params["dec"])
    for li, lyr in enumerate(params["dec"]):
        y = self_attn_layer(
            y, dec_zero_bias, lyr["sa_ln"], lyr["sa"], heads=H, causal=True,
            emb_ln_p=params["ln_emb_dec"] if li == 0 else None)
        y = cross_attn_layer(y, enc_out, enc_pad_bias,
                             lyr["ca_ln"], lyr["ca"], heads=H)
        y = ffn_layer(
            y, lyr["final_ln"], lyr["ffn"],
            out_ln_p=params["ln_final_dec"] if li == n_dec - 1 else None)
    dec_out = y                                        # final LN fused above

    # -------- fused tied LM head + cross-entropy --------
    loss, logits2d = lm_head_ce(dec_out.reshape(B * Tt, D),
                                params["embed"],
                                params["final_logits_bias"],
                                labels.reshape(-1))
    return loss, logits2d.reshape(B, Tt, cfg["vocab"])


# ----------------------------------------------------------------------------
# main
# ----------------------------------------------------------------------------

if __name__ == "__main__":
    cfg = CFG
    key = jax.random.PRNGKey(0)
    kp, ki, ko = jax.random.split(key, 3)

    params = init_params(kp, cfg)

    B, Ts, Tt = 2, 8, 8
    input_ids = jax.random.randint(ki, (B, Ts), 2, cfg["vocab"], jnp.int32)
    # pad the tail of the second sequence
    attention_mask = jnp.ones((B, Ts), jnp.int32).at[1, 6:].set(0)
    input_ids = jnp.where(attention_mask == 1, input_ids, cfg["pad_id"])
    out_ids = jax.random.randint(ko, (B, Tt), 2, cfg["vocab"], jnp.int32)

    fwd = jax.jit(functools.partial(mbart_forward, cfg=cfg))
    loss, logits = fwd(params, input_ids, attention_mask, out_ids)
    jax.block_until_ready((loss, logits))

    assert logits.shape == (B, Tt, cfg["vocab"])
    assert jnp.isfinite(loss)
    print("KERNEL_OK")
</pallas_src>

<mosaic_0001>
module attributes {stable_mosaic.version = 11 : i64} {
  func.func @_self_attn_kernel(%arg0: i32, %arg1: memref<1x8x256xbf16, #tpu.memory_space<vmem>>, %arg2: memref<1x1x8xf32, #tpu.memory_space<vmem>>, %arg3: memref<1x256xf32, #tpu.memory_space<vmem>>, %arg4: memref<1x256xf32, #tpu.memory_space<vmem>>, %arg5: memref<1x256xf32, #tpu.memory_space<vmem>>, %arg6: memref<1x256xf32, #tpu.memory_space<vmem>>, %arg7: memref<256x256xbf16, #tpu.memory_space<vmem>>, %arg8: memref<1x256xf32, #tpu.memory_space<vmem>>, %arg9: memref<256x512xbf16, #tpu.memory_space<vmem>>, %arg10: memref<1x512xf32, #tpu.memory_space<vmem>>, %arg11: memref<256x256xbf16, #tpu.memory_space<vmem>>, %arg12: memref<1x256xf32, #tpu.memory_space<vmem>>, %arg13: memref<1x8x256xbf16, #tpu.memory_space<vmem>>) attributes {dimension_semantics = [#tpu.dimension_semantics<parallel>], iteration_bounds = array<i64: 2>, scalar_prefetch = 0 : i64, scratch_operands = 0 : i64, tpu.core_type = #tpu.core_type<tc>, window_params = [{transform_indices = @transform_0, window_bounds = array<i64: 1, 8, 256>}, {transform_indices = @transform_1, window_bounds = array<i64: 1, 1, 8>}, {pipeline_mode = #tpu.pipeline_mode<synchronous>, transform_indices = @transform_2, window_bounds = array<i64: 1, 256>}, {pipeline_mode = #tpu.pipeline_mode<synchronous>, transform_indices = @transform_3, window_bounds = array<i64: 1, 256>}, {pipeline_mode = #tpu.pipeline_mode<synchronous>, transform_indices = @transform_4, window_bounds = array<i64: 1, 256>}, {pipeline_mode = #tpu.pipeline_mode<synchronous>, transform_indices = @transform_5, window_bounds = array<i64: 1, 256>}, {pipeline_mode = #tpu.pipeline_mode<synchronous>, transform_indices = @transform_6, window_bounds = array<i64: 256, 256>}, {pipeline_mode = #tpu.pipeline_mode<synchronous>, transform_indices = @transform_7, window_bounds = array<i64: 1, 256>}, {pipeline_mode = #tpu.pipeline_mode<synchronous>, transform_indices = @transform_8, window_bounds = array<i64: 256, 512>}, {pipeline_mode = #tpu.pipeline_mode<synchronous>, transform_indices = @transform_9, window_bounds = array<i64: 1, 512>}, {pipeline_mode = #tpu.pipeline_mode<synchronous>, transform_indices = @transform_10, window_bounds = array<i64: 256, 256>}, {pipeline_mode = #tpu.pipeline_mode<synchronous>, transform_indices = @transform_11, window_bounds = array<i64: 1, 256>}, {transform_indices = @transform_12, window_bounds = array<i64: 1, 8, 256>}]} {
    %c0 = arith.constant 0 : index
    %c0_0 = arith.constant 0 : index
    %c0_1 = arith.constant 0 : index
    %0 = vector.load %arg1[%c0, %c0_0, %c0_1] : memref<1x8x256xbf16, #tpu.memory_space<vmem>>, vector<1x8x256xbf16>
    %1 = vector.shape_cast %0 : vector<1x8x256xbf16> to vector<8x256xbf16>
    %2 = arith.extf %1 : vector<8x256xbf16> to vector<8x256xf32>
    %c0_2 = arith.constant 0 : index
    %c0_3 = arith.constant 0 : index
    %3 = vector.load %arg3[%c0_2, %c0_3] : memref<1x256xf32, #tpu.memory_space<vmem>>, vector<1x256xf32>
    %c0_4 = arith.constant 0 : index
    %c0_5 = arith.constant 0 : index
    %4 = vector.load %arg4[%c0_4, %c0_5] : memref<1x256xf32, #tpu.memory_space<vmem>>, vector<1x256xf32>
    %cst = arith.constant dense<0.000000e+00> : vector<8xf32>
    %5 = vector.multi_reduction <add>, %2, %cst [1] : vector<8x256xf32> to vector<8xf32>
    %6 = vector.shape_cast %5 : vector<8xf32> to vector<8x1xf32>
    %cst_6 = arith.constant 2.560000e+02 : f32
    %7 = vector.broadcast %cst_6 : f32 to vector<8x1xf32>
    %8 = arith.divf %6, %7 : vector<8x1xf32>
    %9 = vector.broadcast %8 : vector<8x1xf32> to vector<8x256xf32>
    %10 = arith.subf %2, %9 : vector<8x256xf32>
    %11 = arith.mulf %10, %10 : vector<8x256xf32>
    %cst_7 = arith.constant dense<0.000000e+00> : vector<8xf32>
    %12 = vector.multi_reduction <add>, %11, %cst_7 [1] : vector<8x256xf32> to vector<8xf32>
    %13 = vector.shape_cast %12 : vector<8xf32> to vector<8x1xf32>
    %cst_8 = arith.constant 2.560000e+02 : f32
    %14 = vector.broadcast %cst_8 : f32 to vector<8x1xf32>
    %15 = arith.divf %13, %14 : vector<8x1xf32>
    %cst_9 = arith.constant 9.99999974E-6 : f32
    %16 = vector.broadcast %cst_9 : f32 to vector<8x1xf32>
    %17 = arith.addf %15, %16 : vector<8x1xf32>
    %18 = math.rsqrt %17 : vector<8x1xf32>
    %19 = vector.broadcast %18 : vector<8x1xf32> to vector<8x256xf32>
    %20 = arith.mulf %10, %19 : vector<8x256xf32>
    %21 = vector.broadcast %3 : vector<1x256xf32> to vector<8x256xf32>
    %22 = arith.mulf %20, %21 : vector<8x256xf32>
    %23 = vector.broadcast %4 : vector<1x256xf32> to vector<8x256xf32>
    %24 = arith.addf %22, %23 : vector<8x256xf32>
    %c0_10 = arith.constant 0 : index
    %c0_11 = arith.constant 0 : index
    %25 = vector.load %arg5[%c0_10, %c0_11] : memref<1x256xf32, #tpu.memory_space<vmem>>, vector<1x256xf32>
    %c0_12 = arith.constant 0 : index
    %c0_13 = arith.constant 0 : index
    %26 = vector.load %arg6[%c0_12, %c0_13] : memref<1x256xf32, #tpu.memory_space<vmem>>, vector<1x256xf32>
    %cst_14 = arith.constant dense<0.000000e+00> : vector<8xf32>
    %27 = vector.multi_reduction <add>, %24, %cst_14 [1] : vector<8x256xf32> to vector<8xf32>
    %28 = vector.shape_cast %27 : vector<8xf32> to vector<8x1xf32>
    %cst_15 = arith.constant 2.560000e+02 : f32
    %29 = vector.broadcast %cst_15 : f32 to vector<8x1xf32>
    %30 = arith.divf %28, %29 : vector<8x1xf32>
    %31 = vector.broadcast %30 : vector<8x1xf32> to vector<8x256xf32>
    %32 = arith.subf %24, %31 : vector<8x256xf32>
    %33 = arith.mulf %32, %32 : vector<8x256xf32>
    %cst_16 = arith.constant dense<0.000000e+00> : vector<8xf32>
    %34 = vector.multi_reduction <add>, %33, %cst_16 [1] : vector<8x256xf32> to vector<8xf32>
    %35 = vector.shape_cast %34 : vector<8xf32> to vector<8x1xf32>
    %cst_17 = arith.constant 2.560000e+02 : f32
    %36 = vector.broadcast %cst_17 : f32 to vector<8x1xf32>
    %37 = arith.divf %35, %36 : vector<8x1xf32>
    %cst_18 = arith.constant 9.99999974E-6 : f32
    %38 = vector.broadcast %cst_18 : f32 to vector<8x1xf32>
    %39 = arith.addf %37, %38 : vector<8x1xf32>
    %40 = math.rsqrt %39 : vector<8x1xf32>
    %41 = vector.broadcast %40 : vector<8x1xf32> to vector<8x256xf32>
    %42 = arith.mulf %32, %41 : vector<8x256xf32>
    %43 = vector.broadcast %25 : vector<1x256xf32> to vector<8x256xf32>
    %44 = arith.mulf %42, %43 : vector<8x256xf32>
    %45 = vector.broadcast %26 : vector<1x256xf32> to vector<8x256xf32>
    %46 = arith.addf %44, %45 : vector<8x256xf32>
    %47 = arith.truncf %46 : vector<8x256xf32> to vector<8x256xbf16>
    %c0_19 = arith.constant 0 : index
    %c0_20 = arith.constant 0 : index
    %48 = vector.load %arg7[%c0_19, %c0_20] : memref<256x256xbf16, #tpu.memory_space<vmem>>, vector<256x256xbf16>
    %cst_21 = arith.constant dense<0.000000e+00> : vector<8x256xf32>
    %49 = tpu.matmul %47, %48, %cst_21 {dimension_numbers = #tpu.dot_dimension_numbers<[1], [0], [0], [1], [0, 0, 1, 1], [], []>} : vector<8x256xbf16>, vector<256x256xbf16>, vector<8x256xf32> -> vector<8x256xf32>
    %c0_22 = arith.constant 0 : index
    %c0_23 = arith.constant 0 : index
    %50 = vector.load %arg8[%c0_22, %c0_23] : memref<1x256xf32, #tpu.memory_space<vmem>>, vector<1x256xf32>
    %51 = vector.broadcast %50 : vector<1x256xf32> to vector<8x256xf32>
    %52 = arith.addf %49, %51 : vector<8x256xf32>
    %cst_24 = arith.constant 0.0883883461 : f32
    %53 = vector.broadcast %cst_24 : f32 to vector<8x256xf32>
    %54 = arith.mulf %52, %53 : vector<8x256xf32>
    %55 = arith.truncf %46 : vector<8x256xf32> to vector<8x256xbf16>
    %c0_25 = arith.constant 0 : index
    %c0_26 = arith.constant 0 : index
    %56 = vector.load %arg9[%c0_25, %c0_26] : memref<256x512xbf16, #tpu.memory_space<vmem>>, vector<256x512xbf16>
    %cst_27 = arith.constant dense<0.000000e+00> : vector<8x512xf32>
    %57 = tpu.matmul %55, %56, %cst_27 {dimension_numbers = #tpu.dot_dimension_numbers<[1], [0], [0], [1], [0, 0, 1, 1], [], []>} : vector<8x256xbf16>, vector<256x512xbf16>, vector<8x512xf32> -> vector<8x512xf32>
    %c0_28 = arith.constant 0 : index
    %c0_29 = arith.constant 0 : index
    %58 = vector.load %arg10[%c0_28, %c0_29] : memref<1x512xf32, #tpu.memory_space<vmem>>, vector<1x512xf32>
    %59 = vector.broadcast %58 : vector<1x512xf32> to vector<8x512xf32>
    %60 = arith.addf %57, %59 : vector<8x512xf32>
    %61 = vector.extract_strided_slice %60 {offsets = [0, 0], sizes = [8, 256], strides = [1, 1]} : vector<8x512xf32> to vector<8x256xf32>
    %62 = vector.extract_strided_slice %60 {offsets = [0, 256], sizes = [8, 256], strides = [1, 1]} : vector<8x512xf32> to vector<8x256xf32>
    %c0_30 = arith.constant 0 : index
    %c0_31 = arith.constant 0 : index
    %c0_32 = arith.constant 0 : index
    %63 = vector.load %arg2[%c0_30, %c0_31, %c0_32] : memref<1x1x8xf32, #tpu.memory_space<vmem>>, vector<1x1x8xf32>
    %64 = vector.shape_cast %63 : vector<1x1x8xf32> to vector<1x8xf32>
    %65 = vector.extract_strided_slice %54 {offsets = [0, 0], sizes = [8, 128], strides = [1, 1]} : vector<8x256xf32> to vector<8x128xf32>
    %66 = arith.truncf %65 : vector<8x128xf32> to vector<8x128xbf16>
    %67 = vector.extract_strided_slice %61 {offsets = [0, 0], sizes = [8, 128], strides = [1, 1]} : vector<8x256xf32> to vector<8x128xf32>
    %68 = arith.truncf %67 : vector<8x128xf32> to vector<8x128xbf16>
    "tpu.trace_start"() <{level = 10 : i32, message = "qd,kd->qk"}> : () -> ()
    %cst_33 = arith.constant dense<0.000000e+00> : vector<8x8xf32>
    %69 = tpu.matmul %66, %68, %cst_33 {dimension_numbers = #tpu.dot_dimension_numbers<[1], [1], [0], [0], [0, 0, 1, 0], [], []>} : vector<8x128xbf16>, vector<8x128xbf16>, vector<8x8xf32> -> vector<8x8xf32>
    "tpu.trace_stop"() : () -> ()
    %70 = vector.broadcast %64 : vector<1x8xf32> to vector<8x8xf32>
    %71 = arith.addf %69, %70 : vector<8x8xf32>
    %cst_34 = arith.constant dense<0xFF800000> : vector<8xf32>
    %72 = vector.multi_reduction <maximumf>, %71, %cst_34 [1] : vector<8x8xf32> to vector<8xf32>
    %73 = vector.shape_cast %72 : vector<8xf32> to vector<8x1xf32>
    %74 = vector.broadcast %73 : vector<8x1xf32> to vector<8x8xf32>
    %75 = arith.subf %71, %74 : vector<8x8xf32>
    %76 = math.exp %75 : vector<8x8xf32>
    %cst_35 = arith.constant dense<0.000000e+00> : vector<8xf32>
    %77 = vector.multi_reduction <add>, %76, %cst_35 [1] : vector<8x8xf32> to vector<8xf32>
    %78 = vector.shape_cast %77 : vector<8xf32> to vector<8x1xf32>
    %79 = tpu.reciprocal %78 {approx = true} : vector<8x1xf32> -> vector<8x1xf32>
    %80 = vector.broadcast %79 : vector<8x1xf32> to vector<8x8xf32>
    %81 = arith.mulf %76, %80 : vector<8x8xf32>
    %82 = arith.truncf %81 : vector<8x8xf32> to vector<8x8xbf16>
    %83 = vector.extract_strided_slice %62 {offsets = [0, 0], sizes = [8, 128], strides = [1, 1]} : vector<8x256xf32> to vector<8x128xf32>
    %84 = arith.truncf %83 : vector<8x128xf32> to vector<8x128xbf16>
    %cst_36 = arith.constant dense<0.000000e+00> : vector<8x128xf32>
    %85 = tpu.matmul %82, %84, %cst_36 {dimension_numbers = #tpu.dot_dimension_numbers<[1], [0], [0], [1], [0, 0, 1, 1], [], []>} : vector<8x8xbf16>, vector<8x128xbf16>, vector<8x128xf32> -> vector<8x128xf32>
    %86 = vector.extract_strided_slice %54 {offsets = [0, 128], sizes = [8, 128], strides = [1, 1]} : vector<8x256xf32> to vector<8x128xf32>
    %87 = arith.truncf %86 : vector<8x128xf32> to vector<8x128xbf16>
    %88 = vector.extract_strided_slice %61 {offsets = [0, 128], sizes = [8, 128], strides = [1, 1]} : vector<8x256xf32> to vector<8x128xf32>
    %89 = arith.truncf %88 : vector<8x128xf32> to vector<8x128xbf16>
    "tpu.trace_start"() <{level = 10 : i32, message = "qd,kd->qk"}> : () -> ()
    %cst_37 = arith.constant dense<0.000000e+00> : vector<8x8xf32>
    %90 = tpu.matmul %87, %89, %cst_37 {dimension_numbers = #tpu.dot_dimension_numbers<[1], [1], [0], [0], [0, 0, 1, 0], [], []>} : vector<8x128xbf16>, vector<8x128xbf16>, vector<8x8xf32> -> vector<8x8xf32>
    "tpu.trace_stop"() : () -> ()
    %91 = vector.broadcast %64 : vector<1x8xf32> to vector<8x8xf32>
    %92 = arith.addf %90, %91 : vector<8x8xf32>
    %cst_38 = arith.constant dense<0xFF800000> : vector<8xf32>
    %93 = vector.multi_reduction <maximumf>, %92, %cst_38 [1] : vector<8x8xf32> to vector<8xf32>
    %94 = vector.shape_cast %93 : vector<8xf32> to vector<8x1xf32>
    %95 = vector.broadcast %94 : vector<8x1xf32> to vector<8x8xf32>
    %96 = arith.subf %92, %95 : vector<8x8xf32>
    %97 = math.exp %96 : vector<8x8xf32>
    %cst_39 = arith.constant dense<0.000000e+00> : vector<8xf32>
    %98 = vector.multi_reduction <add>, %97, %cst_39 [1] : vector<8x8xf32> to vector<8xf32>
    %99 = vector.shape_cast %98 : vector<8xf32> to vector<8x1xf32>
    %100 = tpu.reciprocal %99 {approx = true} : vector<8x1xf32> -> vector<8x1xf32>
    %101 = vector.broadcast %100 : vector<8x1xf32> to vector<8x8xf32>
    %102 = arith.mulf %97, %101 : vector<8x8xf32>
    %103 = arith.truncf %102 : vector<8x8xf32> to vector<8x8xbf16>
    %104 = vector.extract_strided_slice %62 {offsets = [0, 128], sizes = [8, 128], strides = [1, 1]} : vector<8x256xf32> to vector<8x128xf32>
    %105 = arith.truncf %104 : vector<8x128xf32> to vector<8x128xbf16>
    %cst_40 = arith.constant dense<0.000000e+00> : vector<8x128xf32>
    %106 = tpu.matmul %103, %105, %cst_40 {dimension_numbers = #tpu.dot_dimension_numbers<[1], [0], [0], [1], [0, 0, 1, 1], [], []>} : vector<8x8xbf16>, vector<8x128xbf16>, vector<8x128xf32> -> vector<8x128xf32>
    %107 = tpu.concatenate %85, %106 in 1 : vector<8x128xf32>, vector<8x128xf32> -> vector<8x256xf32>
    %108 = arith.truncf %107 : vector<8x256xf32> to vector<8x256xbf16>
    %c0_41 = arith.constant 0 : index
    %c0_42 = arith.constant 0 : index
    %109 = vector.load %arg11[%c0_41, %c0_42] : memref<256x256xbf16, #tpu.memory_space<vmem>>, vector<256x256xbf16>
    %cst_43 = arith.constant dense<0.000000e+00> : vector<8x256xf32>
    %110 = tpu.matmul %108, %109, %cst_43 {dimension_numbers = #tpu.dot_dimension_numbers<[1], [0], [0], [1], [0, 0, 1, 1], [], []>} : vector<8x256xbf16>, vector<256x256xbf16>, vector<8x256xf32> -> vector<8x256xf32>
    %c0_44 = arith.constant 0 : index
    %c0_45 = arith.constant 0 : index
    %111 = vector.load %arg12[%c0_44, %c0_45] : memref<1x256xf32, #tpu.memory_space<vmem>>, vector<1x256xf32>
    %112 = vector.broadcast %111 : vector<1x256xf32> to vector<8x256xf32>
    %113 = arith.addf %110, %112 : vector<8x256xf32>
    %114 = arith.addf %113, %24 : vector<8x256xf32>
    %115 = arith.truncf %114 : vector<8x256xf32> to vector<8x256xbf16>
    %c0_46 = arith.constant 0 : index
    %c0_47 = arith.constant 0 : index
    %c0_48 = arith.constant 0 : index
    %116 = vector.load %arg13[%c0_46, %c0_47, %c0_48] : memref<1x8x256xbf16, #tpu.memory_space<vmem>>, vector<1x8x256xbf16>
    %117 = vector.shape_cast %116 : vector<1x8x256xbf16> to vector<8x256xbf16>
    %118 = vector.shape_cast %115 : vector<8x256xbf16> to vector<1x8x256xbf16>
    tpu.vector_store %arg13[%c0_46, %c0_47, %c0_48], %118 {strides = array<i32>} : memref<1x8x256xbf16, #tpu.memory_space<vmem>>, vector<1x8x256xbf16>,
    return
  }
  func.func @transform_0(%arg0: i32) -> (i32, i32, i32) {
    %c0_i32 = arith.constant 0 : i32
    %c0_i32_0 = arith.constant 0 : i32
    %c0_i32_1 = arith.constant 0 : i32
    return %arg0, %c0_i32, %c0_i32_0 : i32, i32, i32
  }
  func.func @transform_1(%arg0: i32) -> (i32, i32, i32) {
    %c0_i32 = arith.constant 0 : i32
    %c0_i32_0 = arith.constant 0 : i32
    %c0_i32_1 = arith.constant 0 : i32
    return %arg0, %c0_i32, %c0_i32_0 : i32, i32, i32
  }
  func.func @transform_2(%arg0: i32) -> (i32, i32) {
    %c0_i32 = arith.constant 0 : i32
    %c0_i32_0 = arith.constant 0 : i32
    %c0_i32_1 = arith.constant 0 : i32
    return %c0_i32, %c0_i32_0 : i32, i32
  }
  func.func @transform_3(%arg0: i32) -> (i32, i32) {
    %c0_i32 = arith.constant 0 : i32
    %c0_i32_0 = arith.constant 0 : i32
    %c0_i32_1 = arith.constant 0 : i32
    return %c0_i32, %c0_i32_0 : i32, i32
  }
  func.func @transform_4(%arg0: i32) -> (i32, i32) {
    %c0_i32 = arith.constant 0 : i32
    %c0_i32_0 = arith.constant 0 : i32
    %c0_i32_1 = arith.constant 0 : i32
    return %c0_i32, %c0_i32_0 : i32, i32
  }
  func.func @transform_5(%arg0: i32) -> (i32, i32) {
    %c0_i32 = arith.constant 0 : i32
    %c0_i32_0 = arith.constant 0 : i32
    %c0_i32_1 = arith.constant 0 : i32
    return %c0_i32, %c0_i32_0 : i32, i32
  }
  func.func @transform_6(%arg0: i32) -> (i32, i32) {
    %c0_i32 = arith.constant 0 : i32
    %c0_i32_0 = arith.constant 0 : i32
    %c0_i32_1 = arith.constant 0 : i32
    return %c0_i32, %c0_i32_0 : i32, i32
  }
  func.func @transform_7(%arg0: i32) -> (i32, i32) {
    %c0_i32 = arith.constant 0 : i32
    %c0_i32_0 = arith.constant 0 : i32
    %c0_i32_1 = arith.constant 0 : i32
    return %c0_i32, %c0_i32_0 : i32, i32
  }
  func.func @transform_8(%arg0: i32) -> (i32, i32) {
    %c0_i32 = arith.constant 0 : i32
    %c0_i32_0 = arith.constant 0 : i32
    %c0_i32_1 = arith.constant 0 : i32
    return %c0_i32, %c0_i32_0 : i32, i32
  }
  func.func @transform_9(%arg0: i32) -> (i32, i32) {
    %c0_i32 = arith.constant 0 : i32
    %c0_i32_0 = arith.constant 0 : i32
    %c0_i32_1 = arith.constant 0 : i32
    return %c0_i32, %c0_i32_0 : i32, i32
  }
  func.func @transform_10(%arg0: i32) -> (i32, i32) {
    %c0_i32 = arith.constant 0 : i32
    %c0_i32_0 = arith.constant 0 : i32
    %c0_i32_1 = arith.constant 0 : i32
    return %c0_i32, %c0_i32_0 : i32, i32
  }
  func.func @transform_11(%arg0: i32) -> (i32, i32) {
    %c0_i32 = arith.constant 0 : i32
    %c0_i32_0 = arith.constant 0 : i32
    %c0_i32_1 = arith.constant 0 : i32
    return %c0_i32, %c0_i32_0 : i32, i32
  }
  func.func @transform_12(%arg0: i32) -> (i32, i32, i32) {
    %c0_i32 = arith.constant 0 : i32
    %c0_i32_0 = arith.constant 0 : i32
    %c0_i32_1 = arith.constant 0 : i32
    return %arg0, %c0_i32, %c0_i32_0 : i32, i32, i32
  }
}

module attributes {stable_mosaic.version = 11 : i64} {
  func.func @_ffn_layer_kernel(%arg0: i32, %arg1: memref<16x256xbf16, #tpu.memory_space<vmem>>, %arg2: memref<1x256xf32, #tpu.memory_space<vmem>>, %arg3: memref<1x256xf32, #tpu.memory_space<vmem>>, %arg4: memref<256x512xbf16, #tpu.memory_space<vmem>>, %arg5: memref<1x512xf32, #tpu.memory_space<vmem>>, %arg6: memref<512x256xbf16, #tpu.memory_space<vmem>>, %arg7: memref<1x256xf32, #tpu.memory_space<vmem>>, %arg8: memref<1x256xf32, #tpu.memory_space<vmem>>, %arg9: memref<1x256xf32, #tpu.memory_space<vmem>>, %arg10: memref<16x256xbf16, #tpu.memory_space<vmem>>) attributes {dimension_semantics = [#tpu.dimension_semantics<parallel>], iteration_bounds = array<i64: 1>, scalar_prefetch = 0 : i64, scratch_operands = 0 : i64, tpu.core_type = #tpu.core_type<tc>, window_params = [{transform_indices = @transform_0, window_bounds = array<i64: 16, 256>}, {pipeline_mode = #tpu.pipeline_mode<synchronous>, transform_indices = @transform_1, window_bounds = array<i64: 1, 256>}, {pipeline_mode = #tpu.pipeline_mode<synchronous>, transform_indices = @transform_2, window_bounds = array<i64: 1, 256>}, {pipeline_mode = #tpu.pipeline_mode<synchronous>, transform_indices = @transform_3, window_bounds = array<i64: 256, 512>}, {pipeline_mode = #tpu.pipeline_mode<synchronous>, transform_indices = @transform_4, window_bounds = array<i64: 1, 512>}, {pipeline_mode = #tpu.pipeline_mode<synchronous>, transform_indices = @transform_5, window_bounds = array<i64: 512, 256>}, {pipeline_mode = #tpu.pipeline_mode<synchronous>, transform_indices = @transform_6, window_bounds = array<i64: 1, 256>}, {pipeline_mode = #tpu.pipeline_mode<synchronous>, transform_indices = @transform_7, window_bounds = array<i64: 1, 256>}, {pipeline_mode = #tpu.pipeline_mode<synchronous>, transform_indices = @transform_8, window_bounds = array<i64: 1, 256>}, {transform_indices = @transform_9, window_bounds = array<i64: 16, 256>}]} {
    %c0 = arith.constant 0 : index
    %c0_0 = arith.constant 0 : index
    %0 = vector.load %arg1[%c0, %c0_0] : memref<16x256xbf16, #tpu.memory_space<vmem>>, vector<16x256xbf16>
    %1 = arith.extf %0 : vector<16x256xbf16> to vector<16x256xf32>
    %c0_1 = arith.constant 0 : index
    %c0_2 = arith.constant 0 : index
    %2 = vector.load %arg2[%c0_1, %c0_2] : memref<1x256xf32, #tpu.memory_space<vmem>>, vector<1x256xf32>
    %c0_3 = arith.constant 0 : index
    %c0_4 = arith.constant 0 : index
    %3 = vector.load %arg3[%c0_3, %c0_4] : memref<1x256xf32, #tpu.memory_space<vmem>>, vector<1x256xf32>
    %cst = arith.constant dense<0.000000e+00> : vector<16xf32>
    %4 = vector.multi_reduction <add>, %1, %cst [1] : vector<16x256xf32> to vector<16xf32>
    %5 = vector.shape_cast %4 : vector<16xf32> to vector<16x1xf32>
    %cst_5 = arith.constant 2.560000e+02 : f32
    %6 = vector.broadcast %cst_5 : f32 to vector<16x1xf32>
    %7 = arith.divf %5, %6 : vector<16x1xf32>
    %8 = vector.broadcast %7 : vector<16x1xf32> to vector<16x256xf32>
    %9 = arith.subf %1, %8 : vector<16x256xf32>
    %10 = arith.mulf %9, %9 : vector<16x256xf32>
    %cst_6 = arith.constant dense<0.000000e+00> : vector<16xf32>
    %11 = vector.multi_reduction <add>, %10, %cst_6 [1] : vector<16x256xf32> to vector<16xf32>
    %12 = vector.shape_cast %11 : vector<16xf32> to vector<16x1xf32>
    %cst_7 = arith.constant 2.560000e+02 : f32
    %13 = vector.broadcast %cst_7 : f32 to vector<16x1xf32>
    %14 = arith.divf %12, %13 : vector<16x1xf32>
    %cst_8 = arith.constant 9.99999974E-6 : f32
    %15 = vector.broadcast %cst_8 : f32 to vector<16x1xf32>
    %16 = arith.addf %14, %15 : vector<16x1xf32>
    %17 = math.rsqrt %16 : vector<16x1xf32>
    %18 = vector.broadcast %17 : vector<16x1xf32> to vector<16x256xf32>
    %19 = arith.mulf %9, %18 : vector<16x256xf32>
    %20 = vector.broadcast %2 : vector<1x256xf32> to vector<16x256xf32>
    %21 = arith.mulf %19, %20 : vector<16x256xf32>
    %22 = vector.broadcast %3 : vector<1x256xf32> to vector<16x256xf32>
    %23 = arith.addf %21, %22 : vector<16x256xf32>
    %24 = arith.truncf %23 : vector<16x256xf32> to vector<16x256xbf16>
    %c0_9 = arith.constant 0 : index
    %c0_10 = arith.constant 0 : index
    %25 = vector.load %arg4[%c0_9, %c0_10] : memref<256x512xbf16, #tpu.memory_space<vmem>>, vector<256x512xbf16>
    %cst_11 = arith.constant dense<0.000000e+00> : vector<16x512xf32>
    %26 = tpu.matmul %24, %25, %cst_11 {dimension_numbers = #tpu.dot_dimension_numbers<[1], [0], [0], [1], [0, 0, 1, 1], [], []>} : vector<16x256xbf16>, vector<256x512xbf16>, vector<16x512xf32> -> vector<16x512xf32>
    %c0_12 = arith.constant 0 : index
    %c0_13 = arith.constant 0 : index
    %27 = vector.load %arg5[%c0_12, %c0_13] : memref<1x512xf32, #tpu.memory_space<vmem>>, vector<1x512xf32>
    %28 = vector.broadcast %27 : vector<1x512xf32> to vector<16x512xf32>
    %29 = arith.addf %26, %28 : vector<16x512xf32>
    %30 = arith.mulf %29, %29 : vector<16x512xf32>
    %31 = arith.mulf %29, %30 : vector<16x512xf32>
    %cst_14 = arith.constant 4.471500e-02 : f32
    %32 = vector.broadcast %cst_14 : f32 to vector<16x512xf32>
    %33 = arith.mulf %32, %31 : vector<16x512xf32>
    %34 = arith.addf %29, %33 : vector<16x512xf32>
    %cst_15 = arith.constant 0.797884583 : f32
    %35 = vector.broadcast %cst_15 : f32 to vector<16x512xf32>
    %36 = arith.mulf %35, %34 : vector<16x512xf32>
    %37 = math.tanh %36 : vector<16x512xf32>
    %cst_16 = arith.constant 1.000000e+00 : f32
    %38 = vector.broadcast %cst_16 : f32 to vector<16x512xf32>
    %39 = arith.addf %38, %37 : vector<16x512xf32>
    %cst_17 = arith.constant 5.000000e-01 : f32
    %40 = vector.broadcast %cst_17 : f32 to vector<16x512xf32>
    %41 = arith.mulf %40, %39 : vector<16x512xf32>
    %42 = arith.mulf %29, %41 : vector<16x512xf32>
    %43 = arith.truncf %42 : vector<16x512xf32> to vector<16x512xbf16>
    %c0_18 = arith.constant 0 : index
    %c0_19 = arith.constant 0 : index
    %44 = vector.load %arg6[%c0_18, %c0_19] : memref<512x256xbf16, #tpu.memory_space<vmem>>, vector<512x256xbf16>
    %cst_20 = arith.constant dense<0.000000e+00> : vector<16x256xf32>
    %45 = tpu.matmul %43, %44, %cst_20 {dimension_numbers = #tpu.dot_dimension_numbers<[1], [0], [0], [1], [0, 0, 1, 1], [], []>} : vector<16x512xbf16>, vector<512x256xbf16>, vector<16x256xf32> -> vector<16x256xf32>
    %c0_21 = arith.constant 0 : index
    %c0_22 = arith.constant 0 : index
    %46 = vector.load %arg7[%c0_21, %c0_22] : memref<1x256xf32, #tpu.memory_space<vmem>>, vector<1x256xf32>
    %47 = vector.broadcast %46 : vector<1x256xf32> to vector<16x256xf32>
    %48 = arith.addf %45, %47 : vector<16x256xf32>
    %49 = arith.addf %48, %1 : vector<16x256xf32>
    %c0_23 = arith.constant 0 : index
    %c0_24 = arith.constant 0 : index
    %50 = vector.load %arg8[%c0_23, %c0_24] : memref<1x256xf32, #tpu.memory_space<vmem>>, vector<1x256xf32>
    %c0_25 = arith.constant 0 : index
    %c0_26 = arith.constant 0 : index
    %51 = vector.load %arg9[%c0_25, %c0_26] : memref<1x256xf32, #tpu.memory_space<vmem>>, vector<1x256xf32>
    %cst_27 = arith.constant dense<0.000000e+00> : vector<16xf32>
    %52 = vector.multi_reduction <add>, %49, %cst_27 [1] : vector<16x256xf32> to vector<16xf32>
    %53 = vector.shape_cast %52 : vector<16xf32> to vector<16x1xf32>
    %cst_28 = arith.constant 2.560000e+02 : f32
    %54 = vector.broadcast %cst_28 : f32 to vector<16x1xf32>
    %55 = arith.divf %53, %54 : vector<16x1xf32>
    %56 = vector.broadcast %55 : vector<16x1xf32> to vector<16x256xf32>
    %57 = arith.subf %49, %56 : vector<16x256xf32>
    %58 = arith.mulf %57, %57 : vector<16x256xf32>
    %cst_29 = arith.constant dense<0.000000e+00> : vector<16xf32>
    %59 = vector.multi_reduction <add>, %58, %cst_29 [1] : vector<16x256xf32> to vector<16xf32>
    %60 = vector.shape_cast %59 : vector<16xf32> to vector<16x1xf32>
    %cst_30 = arith.constant 2.560000e+02 : f32
    %61 = vector.broadcast %cst_30 : f32 to vector<16x1xf32>
    %62 = arith.divf %60, %61 : vector<16x1xf32>
    %cst_31 = arith.constant 9.99999974E-6 : f32
    %63 = vector.broadcast %cst_31 : f32 to vector<16x1xf32>
    %64 = arith.addf %62, %63 : vector<16x1xf32>
    %65 = math.rsqrt %64 : vector<16x1xf32>
    %66 = vector.broadcast %65 : vector<16x1xf32> to vector<16x256xf32>
    %67 = arith.mulf %57, %66 : vector<16x256xf32>
    %68 = vector.broadcast %50 : vector<1x256xf32> to vector<16x256xf32>
    %69 = arith.mulf %67, %68 : vector<16x256xf32>
    %70 = vector.broadcast %51 : vector<1x256xf32> to vector<16x256xf32>
    %71 = arith.addf %69, %70 : vector<16x256xf32>
    %72 = arith.truncf %71 : vector<16x256xf32> to vector<16x256xbf16>
    %c0_32 = arith.constant 0 : index
    %c0_33 = arith.constant 0 : index
    %73 = vector.load %arg10[%c0_32, %c0_33] : memref<16x256xbf16, #tpu.memory_space<vmem>>, vector<16x256xbf16>
    tpu.vector_store %arg10[%c0_32, %c0_33], %72 {strides = array<i32>} : memref<16x256xbf16, #tpu.memory_space<vmem>>, vector<16x256xbf16>,
    return
  }
  func.func @transform_0(%arg0: i32) -> (i32, i32) {
    %c0_i32 = arith.constant 0 : i32
    %c0_i32_0 = arith.constant 0 : i32
    return %arg0, %c0_i32 : i32, i32
  }
  func.func @transform_1(%arg0: i32) -> (i32, i32) {
    %c0_i32 = arith.constant 0 : i32
    %c0_i32_0 = arith.constant 0 : i32
    %c0_i32_1 = arith.constant 0 : i32
    return %c0_i32, %c0_i32_0 : i32, i32
  }
  func.func @transform_2(%arg0: i32) -> (i32, i32) {
    %c0_i32 = arith.constant 0 : i32
    %c0_i32_0 = arith.constant 0 : i32
    %c0_i32_1 = arith.constant 0 : i32
    return %c0_i32, %c0_i32_0 : i32, i32
  }
  func.func @transform_3(%arg0: i32) -> (i32, i32) {
    %c0_i32 = arith.constant 0 : i32
    %c0_i32_0 = arith.constant 0 : i32
    %c0_i32_1 = arith.constant 0 : i32
    return %c0_i32, %c0_i32_0 : i32, i32
  }
  func.func @transform_4(%arg0: i32) -> (i32, i32) {
    %c0_i32 = arith.constant 0 : i32
    %c0_i32_0 = arith.constant 0 : i32
    %c0_i32_1 = arith.constant 0 : i32
    return %c0_i32, %c0_i32_0 : i32, i32
  }
  func.func @transform_5(%arg0: i32) -> (i32, i32) {
    %c0_i32 = arith.constant 0 : i32
    %c0_i32_0 = arith.constant 0 : i32
    %c0_i32_1 = arith.constant 0 : i32
    return %c0_i32, %c0_i32_0 : i32, i32
  }
  func.func @transform_6(%arg0: i32) -> (i32, i32) {
    %c0_i32 = arith.constant 0 : i32
    %c0_i32_0 = arith.constant 0 : i32
    %c0_i32_1 = arith.constant 0 : i32
    return %c0_i32, %c0_i32_0 : i32, i32
  }
  func.func @transform_7(%arg0: i32) -> (i32, i32) {
    %c0_i32 = arith.constant 0 : i32
    %c0_i32_0 = arith.constant 0 : i32
    %c0_i32_1 = arith.constant 0 : i32
    return %c0_i32, %c0_i32_0 : i32, i32
  }
  func.func @transform_8(%arg0: i32) -> (i32, i32) {
    %c0_i32 = arith.constant 0 : i32
    %c0_i32_0 = arith.constant 0 : i32
    %c0_i32_1 = arith.constant 0 : i32
    return %c0_i32, %c0_i32_0 : i32, i32
  }
  func.func @transform_9(%arg0: i32) -> (i32, i32) {
    %c0_i32 = arith.constant 0 : i32
    %c0_i32_0 = arith.constant 0 : i32
    return %arg0, %c0_i32 : i32, i32
  }
}

module attributes {stable_mosaic.version = 11 : i64} {
  func.func @_self_attn_kernel(%arg0: i32, %arg1: memref<1x8x256xbf16, #tpu.memory_space<vmem>>, %arg2: memref<1x1x8xf32, #tpu.memory_space<vmem>>, %arg3: memref<1x256xf32, #tpu.memory_space<vmem>>, %arg4: memref<1x256xf32, #tpu.memory_space<vmem>>, %arg5: memref<1x256xf32, #tpu.memory_space<vmem>>, %arg6: memref<1x256xf32, #tpu.memory_space<vmem>>, %arg7: memref<256x256xbf16, #tpu.memory_space<vmem>>, %arg8: memref<1x256xf32, #tpu.memory_space<vmem>>, %arg9: memref<256x512xbf16, #tpu.memory_space<vmem>>, %arg10: memref<1x512xf32, #tpu.memory_space<vmem>>, %arg11: memref<256x256xbf16, #tpu.memory_space<vmem>>, %arg12: memref<1x256xf32, #tpu.memory_space<vmem>>, %arg13: memref<1x8x256xbf16, #tpu.memory_space<vmem>>) attributes {dimension_semantics = [#tpu.dimension_semantics<parallel>], iteration_bounds = array<i64: 2>, scalar_prefetch = 0 : i64, scratch_operands = 0 : i64, tpu.core_type = #tpu.core_type<tc>, window_params = [{transform_indices = @transform_0, window_bounds = array<i64: 1, 8, 256>}, {transform_indices = @transform_1, window_bounds = array<i64: 1, 1, 8>}, {pipeline_mode = #tpu.pipeline_mode<synchronous>, transform_indices = @transform_2, window_bounds = array<i64: 1, 256>}, {pipeline_mode = #tpu.pipeline_mode<synchronous>, transform_indices = @transform_3, window_bounds = array<i64: 1, 256>}, {pipeline_mode = #tpu.pipeline_mode<synchronous>, transform_indices = @transform_4, window_bounds = array<i64: 1, 256>}, {pipeline_mode = #tpu.pipeline_mode<synchronous>, transform_indices = @transform_5, window_bounds = array<i64: 1, 256>}, {pipeline_mode = #tpu.pipeline_mode<synchronous>, transform_indices = @transform_6, window_bounds = array<i64: 256, 256>}, {pipeline_mode = #tpu.pipeline_mode<synchronous>, transform_indices = @transform_7, window_bounds = array<i64: 1, 256>}, {pipeline_mode = #tpu.pipeline_mode<synchronous>, transform_indices = @transform_8, window_bounds = array<i64: 256, 512>}, {pipeline_mode = #tpu.pipeline_mode<synchronous>, transform_indices = @transform_9, window_bounds = array<i64: 1, 512>}, {pipeline_mode = #tpu.pipeline_mode<synchronous>, transform_indices = @transform_10, window_bounds = array<i64: 256, 256>}, {pipeline_mode = #tpu.pipeline_mode<synchronous>, transform_indices = @transform_11, window_bounds = array<i64: 1, 256>}, {transform_indices = @transform_12, window_bounds = array<i64: 1, 8, 256>}]} {
    %c0 = arith.constant 0 : index
    %c0_0 = arith.constant 0 : index
    %c0_1 = arith.constant 0 : index
    %0 = vector.load %arg1[%c0, %c0_0, %c0_1] : memref<1x8x256xbf16, #tpu.memory_space<vmem>>, vector<1x8x256xbf16>
    %1 = vector.shape_cast %0 : vector<1x8x256xbf16> to vector<8x256xbf16>
    %2 = arith.extf %1 : vector<8x256xbf16> to vector<8x256xf32>
    %c0_2 = arith.constant 0 : index
    %c0_3 = arith.constant 0 : index
    %3 = vector.load %arg3[%c0_2, %c0_3] : memref<1x256xf32, #tpu.memory_space<vmem>>, vector<1x256xf32>
    %c0_4 = arith.constant 0 : index
    %c0_5 = arith.constant 0 : index
    %4 = vector.load %arg4[%c0_4, %c0_5] : memref<1x256xf32, #tpu.memory_space<vmem>>, vector<1x256xf32>
    %cst = arith.constant dense<0.000000e+00> : vector<8xf32>
    %5 = vector.multi_reduction <add>, %2, %cst [1] : vector<8x256xf32> to vector<8xf32>
    %6 = vector.shape_cast %5 : vector<8xf32> to vector<8x1xf32>
    %cst_6 = arith.constant 2.560000e+02 : f32
    %7 = vector.broadcast %cst_6 : f32 to vector<8x1xf32>
    %8 = arith.divf %6, %7 : vector<8x1xf32>
    %9 = vector.broadcast %8 : vector<8x1xf32> to vector<8x256xf32>
    %10 = arith.subf %2, %9 : vector<8x256xf32>
    %11 = arith.mulf %10, %10 : vector<8x256xf32>
    %cst_7 = arith.constant dense<0.000000e+00> : vector<8xf32>
    %12 = vector.multi_reduction <add>, %11, %cst_7 [1] : vector<8x256xf32> to vector<8xf32>
    %13 = vector.shape_cast %12 : vector<8xf32> to vector<8x1xf32>
    %cst_8 = arith.constant 2.560000e+02 : f32
    %14 = vector.broadcast %cst_8 : f32 to vector<8x1xf32>
    %15 = arith.divf %13, %14 : vector<8x1xf32>
    %cst_9 = arith.constant 9.99999974E-6 : f32
    %16 = vector.broadcast %cst_9 : f32 to vector<8x1xf32>
    %17 = arith.addf %15, %16 : vector<8x1xf32>
    %18 = math.rsqrt %17 : vector<8x1xf32>
    %19 = vector.broadcast %18 : vector<8x1xf32> to vector<8x256xf32>
    %20 = arith.mulf %10, %19 : vector<8x256xf32>
    %21 = vector.broadcast %3 : vector<1x256xf32> to vector<8x256xf32>
    %22 = arith.mulf %20, %21 : vector<8x256xf32>
    %23 = vector.broadcast %4 : vector<1x256xf32> to vector<8x256xf32>
    %24 = arith.addf %22, %23 : vector<8x256xf32>
    %c0_10 = arith.constant 0 : index
    %c0_11 = arith.constant 0 : index
    %25 = vector.load %arg5[%c0_10, %c0_11] : memref<1x256xf32, #tpu.memory_space<vmem>>, vector<1x256xf32>
    %c0_12 = arith.constant 0 : index
    %c0_13 = arith.constant 0 : index
    %26 = vector.load %arg6[%c0_12, %c0_13] : memref<1x256xf32, #tpu.memory_space<vmem>>, vector<1x256xf32>
    %cst_14 = arith.constant dense<0.000000e+00> : vector<8xf32>
    %27 = vector.multi_reduction <add>, %24, %cst_14 [1] : vector<8x256xf32> to vector<8xf32>
    %28 = vector.shape_cast %27 : vector<8xf32> to vector<8x1xf32>
    %cst_15 = arith.constant 2.560000e+02 : f32
    %29 = vector.broadcast %cst_15 : f32 to vector<8x1xf32>
    %30 = arith.divf %28, %29 : vector<8x1xf32>
    %31 = vector.broadcast %30 : vector<8x1xf32> to vector<8x256xf32>
    %32 = arith.subf %24, %31 : vector<8x256xf32>
    %33 = arith.mulf %32, %32 : vector<8x256xf32>
    %cst_16 = arith.constant dense<0.000000e+00> : vector<8xf32>
    %34 = vector.multi_reduction <add>, %33, %cst_16 [1] : vector<8x256xf32> to vector<8xf32>
    %35 = vector.shape_cast %34 : vector<8xf32> to vector<8x1xf32>
    %cst_17 = arith.constant 2.560000e+02 : f32
    %36 = vector.broadcast %cst_17 : f32 to vector<8x1xf32>
    %37 = arith.divf %35, %36 : vector<8x1xf32>
    %cst_18 = arith.constant 9.99999974E-6 : f32
    %38 = vector.broadcast %cst_18 : f32 to vector<8x1xf32>
    %39 = arith.addf %37, %38 : vector<8x1xf32>
    %40 = math.rsqrt %39 : vector<8x1xf32>
    %41 = vector.broadcast %40 : vector<8x1xf32> to vector<8x256xf32>
    %42 = arith.mulf %32, %41 : vector<8x256xf32>
    %43 = vector.broadcast %25 : vector<1x256xf32> to vector<8x256xf32>
    %44 = arith.mulf %42, %43 : vector<8x256xf32>
    %45 = vector.broadcast %26 : vector<1x256xf32> to vector<8x256xf32>
    %46 = arith.addf %44, %45 : vector<8x256xf32>
    %47 = arith.truncf %46 : vector<8x256xf32> to vector<8x256xbf16>
    %c0_19 = arith.constant 0 : index
    %c0_20 = arith.constant 0 : index
    %48 = vector.load %arg7[%c0_19, %c0_20] : memref<256x256xbf16, #tpu.memory_space<vmem>>, vector<256x256xbf16>
    %cst_21 = arith.constant dense<0.000000e+00> : vector<8x256xf32>
    %49 = tpu.matmul %47, %48, %cst_21 {dimension_numbers = #tpu.dot_dimension_numbers<[1], [0], [0], [1], [0, 0, 1, 1], [], []>} : vector<8x256xbf16>, vector<256x256xbf16>, vector<8x256xf32> -> vector<8x256xf32>
    %c0_22 = arith.constant 0 : index
    %c0_23 = arith.constant 0 : index
    %50 = vector.load %arg8[%c0_22, %c0_23] : memref<1x256xf32, #tpu.memory_space<vmem>>, vector<1x256xf32>
    %51 = vector.broadcast %50 : vector<1x256xf32> to vector<8x256xf32>
    %52 = arith.addf %49, %51 : vector<8x256xf32>
    %cst_24 = arith.constant 0.0883883461 : f32
    %53 = vector.broadcast %cst_24 : f32 to vector<8x256xf32>
    %54 = arith.mulf %52, %53 : vector<8x256xf32>
    %55 = arith.truncf %46 : vector<8x256xf32> to vector<8x256xbf16>
    %c0_25 = arith.constant 0 : index
    %c0_26 = arith.constant 0 : index
    %56 = vector.load %arg9[%c0_25, %c0_26] : memref<256x512xbf16, #tpu.memory_space<vmem>>, vector<256x512xbf16>
    %cst_27 = arith.constant dense<0.000000e+00> : vector<8x512xf32>
    %57 = tpu.matmul %55, %56, %cst_27 {dimension_numbers = #tpu.dot_dimension_numbers<[1], [0], [0], [1], [0, 0, 1, 1], [], []>} : vector<8x256xbf16>, vector<256x512xbf16>, vector<8x512xf32> -> vector<8x512xf32>
    %c0_28 = arith.constant 0 : index
    %c0_29 = arith.constant 0 : index
    %58 = vector.load %arg10[%c0_28, %c0_29] : memref<1x512xf32, #tpu.memory_space<vmem>>, vector<1x512xf32>
    %59 = vector.broadcast %58 : vector<1x512xf32> to vector<8x512xf32>
    %60 = arith.addf %57, %59 : vector<8x512xf32>
    %61 = vector.extract_strided_slice %60 {offsets = [0, 0], sizes = [8, 256], strides = [1, 1]} : vector<8x512xf32> to vector<8x256xf32>
    %62 = vector.extract_strided_slice %60 {offsets = [0, 256], sizes = [8, 256], strides = [1, 1]} : vector<8x512xf32> to vector<8x256xf32>
    %c0_30 = arith.constant 0 : index
    %c0_31 = arith.constant 0 : index
    %c0_32 = arith.constant 0 : index
    %63 = vector.load %arg2[%c0_30, %c0_31, %c0_32] : memref<1x1x8xf32, #tpu.memory_space<vmem>>, vector<1x1x8xf32>
    %64 = vector.shape_cast %63 : vector<1x1x8xf32> to vector<1x8xf32>
    %65 = tpu.iota {dimensions = array<i32: 0>} : vector<8x8xi32>
    %66 = tpu.iota {dimensions = array<i32: 1>} : vector<8x8xi32>
    %67 = arith.cmpi sle, %66, %65 : vector<8x8xi32>
    %cst_33 = arith.constant 0.000000e+00 : f32
    %cst_34 = arith.constant -1.000000e+09 : f32
    %68 = vector.broadcast %cst_33 : f32 to vector<8x8xf32>
    %69 = vector.broadcast %cst_34 : f32 to vector<8x8xf32>
    %70 = arith.select %67, %68, %69 : vector<8x8xi1>, vector<8x8xf32>
    %71 = vector.broadcast %64 : vector<1x8xf32> to vector<8x8xf32>
    %72 = arith.addf %71, %70 : vector<8x8xf32>
    %73 = vector.extract_strided_slice %54 {offsets = [0, 0], sizes = [8, 128], strides = [1, 1]} : vector<8x256xf32> to vector<8x128xf32>
    %74 = arith.truncf %73 : vector<8x128xf32> to vector<8x128xbf16>
    %75 = vector.extract_strided_slice %61 {offsets = [0, 0], sizes = [8, 128], strides = [1, 1]} : vector<8x256xf32> to vector<8x128xf32>
    %76 = arith.truncf %75 : vector<8x128xf32> to vector<8x128xbf16>
    "tpu.trace_start"() <{level = 10 : i32, message = "qd,kd->qk"}> : () -> ()
    %cst_35 = arith.constant dense<0.000000e+00> : vector<8x8xf32>
    %77 = tpu.matmul %74, %76, %cst_35 {dimension_numbers = #tpu.dot_dimension_numbers<[1], [1], [0], [0], [0, 0, 1, 0], [], []>} : vector<8x128xbf16>, vector<8x128xbf16>, vector<8x8xf32> -> vector<8x8xf32>
    "tpu.trace_stop"() : () -> ()
    %78 = arith.addf %77, %72 : vector<8x8xf32>
    %cst_36 = arith.constant dense<0xFF800000> : vector<8xf32>
    %79 = vector.multi_reduction <maximumf>, %78, %cst_36 [1] : vector<8x8xf32> to vector<8xf32>
    %80 = vector.shape_cast %79 : vector<8xf32> to vector<8x1xf32>
    %81 = vector.broadcast %80 : vector<8x1xf32> to vector<8x8xf32>
    %82 = arith.subf %78, %81 : vector<8x8xf32>
    %83 = math.exp %82 : vector<8x8xf32>
    %cst_37 = arith.constant dense<0.000000e+00> : vector<8xf32>
    %84 = vector.multi_reduction <add>, %83, %cst_37 [1] : vector<8x8xf32> to vector<8xf32>
    %85 = vector.shape_cast %84 : vector<8xf32> to vector<8x1xf32>
    %86 = tpu.reciprocal %85 {approx = true} : vector<8x1xf32> -> vector<8x1xf32>
    %87 = vector.broadcast %86 : vector<8x1xf32> to vector<8x8xf32>
    %88 = arith.mulf %83, %87 : vector<8x8xf32>
    %89 = arith.truncf %88 : vector<8x8xf32> to vector<8x8xbf16>
    %90 = vector.extract_strided_slice %62 {offsets = [0, 0], sizes = [8, 128], strides = [1, 1]} : vector<8x256xf32> to vector<8x128xf32>
    %91 = arith.truncf %90 : vector<8x128xf32> to vector<8x128xbf16>
    %cst_38 = arith.constant dense<0.000000e+00> : vector<8x128xf32>
    %92 = tpu.matmul %89, %91, %cst_38 {dimension_numbers = #tpu.dot_dimension_numbers<[1], [0], [0], [1], [0, 0, 1, 1], [], []>} : vector<8x8xbf16>, vector<8x128xbf16>, vector<8x128xf32> -> vector<8x128xf32>
    %93 = vector.extract_strided_slice %54 {offsets = [0, 128], sizes = [8, 128], strides = [1, 1]} : vector<8x256xf32> to vector<8x128xf32>
    %94 = arith.truncf %93 : vector<8x128xf32> to vector<8x128xbf16>
    %95 = vector.extract_strided_slice %61 {offsets = [0, 128], sizes = [8, 128], strides = [1, 1]} : vector<8x256xf32> to vector<8x128xf32>
    %96 = arith.truncf %95 : vector<8x128xf32> to vector<8x128xbf16>
    "tpu.trace_start"() <{level = 10 : i32, message = "qd,kd->qk"}> : () -> ()
    %cst_39 = arith.constant dense<0.000000e+00> : vector<8x8xf32>
    %97 = tpu.matmul %94, %96, %cst_39 {dimension_numbers = #tpu.dot_dimension_numbers<[1], [1], [0], [0], [0, 0, 1, 0], [], []>} : vector<8x128xbf16>, vector<8x128xbf16>, vector<8x8xf32> -> vector<8x8xf32>
    "tpu.trace_stop"() : () -> ()
    %98 = arith.addf %97, %72 : vector<8x8xf32>
    %cst_40 = arith.constant dense<0xFF800000> : vector<8xf32>
    %99 = vector.multi_reduction <maximumf>, %98, %cst_40 [1] : vector<8x8xf32> to vector<8xf32>
    %100 = vector.shape_cast %99 : vector<8xf32> to vector<8x1xf32>
    %101 = vector.broadcast %100 : vector<8x1xf32> to vector<8x8xf32>
    %102 = arith.subf %98, %101 : vector<8x8xf32>
    %103 = math.exp %102 : vector<8x8xf32>
    %cst_41 = arith.constant dense<0.000000e+00> : vector<8xf32>
    %104 = vector.multi_reduction <add>, %103, %cst_41 [1] : vector<8x8xf32> to vector<8xf32>
    %105 = vector.shape_cast %104 : vector<8xf32> to vector<8x1xf32>
    %106 = tpu.reciprocal %105 {approx = true} : vector<8x1xf32> -> vector<8x1xf32>
    %107 = vector.broadcast %106 : vector<8x1xf32> to vector<8x8xf32>
    %108 = arith.mulf %103, %107 : vector<8x8xf32>
    %109 = arith.truncf %108 : vector<8x8xf32> to vector<8x8xbf16>
    %110 = vector.extract_strided_slice %62 {offsets = [0, 128], sizes = [8, 128], strides = [1, 1]} : vector<8x256xf32> to vector<8x128xf32>
    %111 = arith.truncf %110 : vector<8x128xf32> to vector<8x128xbf16>
    %cst_42 = arith.constant dense<0.000000e+00> : vector<8x128xf32>
    %112 = tpu.matmul %109, %111, %cst_42 {dimension_numbers = #tpu.dot_dimension_numbers<[1], [0], [0], [1], [0, 0, 1, 1], [], []>} : vector<8x8xbf16>, vector<8x128xbf16>, vector<8x128xf32> -> vector<8x128xf32>
    %113 = tpu.concatenate %92, %112 in 1 : vector<8x128xf32>, vector<8x128xf32> -> vector<8x256xf32>
    %114 = arith.truncf %113 : vector<8x256xf32> to vector<8x256xbf16>
    %c0_43 = arith.constant 0 : index
    %c0_44 = arith.constant 0 : index
    %115 = vector.load %arg11[%c0_43, %c0_44] : memref<256x256xbf16, #tpu.memory_space<vmem>>, vector<256x256xbf16>
    %cst_45 = arith.constant dense<0.000000e+00> : vector<8x256xf32>
    %116 = tpu.matmul %114, %115, %cst_45 {dimension_numbers = #tpu.dot_dimension_numbers<[1], [0], [0], [1], [0, 0, 1, 1], [], []>} : vector<8x256xbf16>, vector<256x256xbf16>, vector<8x256xf32> -> vector<8x256xf32>
    %c0_46 = arith.constant 0 : index
    %c0_47 = arith.constant 0 : index
    %117 = vector.load %arg12[%c0_46, %c0_47] : memref<1x256xf32, #tpu.memory_space<vmem>>, vector<1x256xf32>
    %118 = vector.broadcast %117 : vector<1x256xf32> to vector<8x256xf32>
    %119 = arith.addf %116, %118 : vector<8x256xf32>
    %120 = arith.addf %119, %24 : vector<8x256xf32>
    %121 = arith.truncf %120 : vector<8x256xf32> to vector<8x256xbf16>
    %c0_48 = arith.constant 0 : index
    %c0_49 = arith.constant 0 : index
    %c0_50 = arith.constant 0 : index
    %122 = vector.load %arg13[%c0_48, %c0_49, %c0_50] : memref<1x8x256xbf16, #tpu.memory_space<vmem>>, vector<1x8x256xbf16>
    %123 = vector.shape_cast %122 : vector<1x8x256xbf16> to vector<8x256xbf16>
    %124 = vector.shape_cast %121 : vector<8x256xbf16> to vector<1x8x256xbf16>
    tpu.vector_store %arg13[%c0_48, %c0_49, %c0_50], %124 {strides = array<i32>} : memref<1x8x256xbf16, #tpu.memory_space<vmem>>, vector<1x8x256xbf16>,
    return
  }
  func.func @transform_0(%arg0: i32) -> (i32, i32, i32) {
    %c0_i32 = arith.constant 0 : i32
    %c0_i32_0 = arith.constant 0 : i32
    %c0_i32_1 = arith.constant 0 : i32
    return %arg0, %c0_i32, %c0_i32_0 : i32, i32, i32
  }
  func.func @transform_1(%arg0: i32) -> (i32, i32, i32) {
    %c0_i32 = arith.constant 0 : i32
    %c0_i32_0 = arith.constant 0 : i32
    %c0_i32_1 = arith.constant 0 : i32
    return %arg0, %c0_i32, %c0_i32_0 : i32, i32, i32
  }
  func.func @transform_2(%arg0: i32) -> (i32, i32) {
    %c0_i32 = arith.constant 0 : i32
    %c0_i32_0 = arith.constant 0 : i32
    %c0_i32_1 = arith.constant 0 : i32
    return %c0_i32, %c0_i32_0 : i32, i32
  }
  func.func @transform_3(%arg0: i32) -> (i32, i32) {
    %c0_i32 = arith.constant 0 : i32
    %c0_i32_0 = arith.constant 0 : i32
    %c0_i32_1 = arith.constant 0 : i32
    return %c0_i32, %c0_i32_0 : i32, i32
  }
  func.func @transform_4(%arg0: i32) -> (i32, i32) {
    %c0_i32 = arith.constant 0 : i32
    %c0_i32_0 = arith.constant 0 : i32
    %c0_i32_1 = arith.constant 0 : i32
    return %c0_i32, %c0_i32_0 : i32, i32
  }
  func.func @transform_5(%arg0: i32) -> (i32, i32) {
    %c0_i32 = arith.constant 0 : i32
    %c0_i32_0 = arith.constant 0 : i32
    %c0_i32_1 = arith.constant 0 : i32
    return %c0_i32, %c0_i32_0 : i32, i32
  }
  func.func @transform_6(%arg0: i32) -> (i32, i32) {
    %c0_i32 = arith.constant 0 : i32
    %c0_i32_0 = arith.constant 0 : i32
    %c0_i32_1 = arith.constant 0 : i32
    return %c0_i32, %c0_i32_0 : i32, i32
  }
  func.func @transform_7(%arg0: i32) -> (i32, i32) {
    %c0_i32 = arith.constant 0 : i32
    %c0_i32_0 = arith.constant 0 : i32
    %c0_i32_1 = arith.constant 0 : i32
    return %c0_i32, %c0_i32_0 : i32, i32
  }
  func.func @transform_8(%arg0: i32) -> (i32, i32) {
    %c0_i32 = arith.constant 0 : i32
    %c0_i32_0 = arith.constant 0 : i32
    %c0_i32_1 = arith.constant 0 : i32
    return %c0_i32, %c0_i32_0 : i32, i32
  }
  func.func @transform_9(%arg0: i32) -> (i32, i32) {
    %c0_i32 = arith.constant 0 : i32
    %c0_i32_0 = arith.constant 0 : i32
    %c0_i32_1 = arith.constant 0 : i32
    return %c0_i32, %c0_i32_0 : i32, i32
  }
  func.func @transform_10(%arg0: i32) -> (i32, i32) {
    %c0_i32 = arith.constant 0 : i32
    %c0_i32_0 = arith.constant 0 : i32
    %c0_i32_1 = arith.constant 0 : i32
    return %c0_i32, %c0_i32_0 : i32, i32
  }
  func.func @transform_11(%arg0: i32) -> (i32, i32) {
    %c0_i32 = arith.constant 0 : i32
    %c0_i32_0 = arith.constant 0 : i32
    %c0_i32_1 = arith.constant 0 : i32
    return %c0_i32, %c0_i32_0 : i32, i32
  }
  func.func @transform_12(%arg0: i32) -> (i32, i32, i32) {
    %c0_i32 = arith.constant 0 : i32
    %c0_i32_0 = arith.constant 0 : i32
    %c0_i32_1 = arith.constant 0 : i32
    return %arg0, %c0_i32, %c0_i32_0 : i32, i32, i32
  }
}

module attributes {stable_mosaic.version = 11 : i64} {
  func.func @_cross_attn_kernel(%arg0: i32, %arg1: i32, %arg2: memref<1x8x256xbf16, #tpu.memory_space<vmem>>, %arg3: memref<1x8x256xbf16, #tpu.memory_space<vmem>>, %arg4: memref<1x1x8xf32, #tpu.memory_space<vmem>>, %arg5: memref<1x256xf32, #tpu.memory_space<vmem>>, %arg6: memref<1x256xf32, #tpu.memory_space<vmem>>, %arg7: memref<256x256xbf16, #tpu.memory_space<vmem>>, %arg8: memref<1x256xf32, #tpu.memory_space<vmem>>, %arg9: memref<256x512xbf16, #tpu.memory_space<vmem>>, %arg10: memref<1x512xf32, #tpu.memory_space<vmem>>, %arg11: memref<256x256xbf16, #tpu.memory_space<vmem>>, %arg12: memref<1x256xf32, #tpu.memory_space<vmem>>, %arg13: memref<1x8x256xbf16, #tpu.memory_space<vmem>>) attributes {dimension_semantics = [#tpu.dimension_semantics<parallel>, #tpu.dimension_semantics<parallel>], iteration_bounds = array<i64: 2, 1>, scalar_prefetch = 0 : i64, scratch_operands = 0 : i64, tpu.core_type = #tpu.core_type<tc>, window_params = [{transform_indices = @transform_0, window_bounds = array<i64: 1, 8, 256>}, {transform_indices = @transform_1, window_bounds = array<i64: 1, 8, 256>}, {transform_indices = @transform_2, window_bounds = array<i64: 1, 1, 8>}, {pipeline_mode = #tpu.pipeline_mode<synchronous>, transform_indices = @transform_3, window_bounds = array<i64: 1, 256>}, {pipeline_mode = #tpu.pipeline_mode<synchronous>, transform_indices = @transform_4, window_bounds = array<i64: 1, 256>}, {pipeline_mode = #tpu.pipeline_mode<synchronous>, transform_indices = @transform_5, window_bounds = array<i64: 256, 256>}, {pipeline_mode = #tpu.pipeline_mode<synchronous>, transform_indices = @transform_6, window_bounds = array<i64: 1, 256>}, {pipeline_mode = #tpu.pipeline_mode<synchronous>, transform_indices = @transform_7, window_bounds = array<i64: 256, 512>}, {pipeline_mode = #tpu.pipeline_mode<synchronous>, transform_indices = @transform_8, window_bounds = array<i64: 1, 512>}, {pipeline_mode = #tpu.pipeline_mode<synchronous>, transform_indices = @transform_9, window_bounds = array<i64: 256, 256>}, {pipeline_mode = #tpu.pipeline_mode<synchronous>, transform_indices = @transform_10, window_bounds = array<i64: 1, 256>}, {transform_indices = @transform_11, window_bounds = array<i64: 1, 8, 256>}]} {
    %c0 = arith.constant 0 : index
    %c0_0 = arith.constant 0 : index
    %c0_1 = arith.constant 0 : index
    %0 = vector.load %arg2[%c0, %c0_0, %c0_1] : memref<1x8x256xbf16, #tpu.memory_space<vmem>>, vector<1x8x256xbf16>
    %1 = vector.shape_cast %0 : vector<1x8x256xbf16> to vector<8x256xbf16>
    %2 = arith.extf %1 : vector<8x256xbf16> to vector<8x256xf32>
    %c0_2 = arith.constant 0 : index
    %c0_3 = arith.constant 0 : index
    %3 = vector.load %arg5[%c0_2, %c0_3] : memref<1x256xf32, #tpu.memory_space<vmem>>, vector<1x256xf32>
    %c0_4 = arith.constant 0 : index
    %c0_5 = arith.constant 0 : index
    %4 = vector.load %arg6[%c0_4, %c0_5] : memref<1x256xf32, #tpu.memory_space<vmem>>, vector<1x256xf32>
    %cst = arith.constant dense<0.000000e+00> : vector<8xf32>
    %5 = vector.multi_reduction <add>, %2, %cst [1] : vector<8x256xf32> to vector<8xf32>
    %6 = vector.shape_cast %5 : vector<8xf32> to vector<8x1xf32>
    %cst_6 = arith.constant 2.560000e+02 : f32
    %7 = vector.broadcast %cst_6 : f32 to vector<8x1xf32>
    %8 = arith.divf %6, %7 : vector<8x1xf32>
    %9 = vector.broadcast %8 : vector<8x1xf32> to vector<8x256xf32>
    %10 = arith.subf %2, %9 : vector<8x256xf32>
    %11 = arith.mulf %10, %10 : vector<8x256xf32>
    %cst_7 = arith.constant dense<0.000000e+00> : vector<8xf32>
    %12 = vector.multi_reduction <add>, %11, %cst_7 [1] : vector<8x256xf32> to vector<8xf32>
    %13 = vector.shape_cast %12 : vector<8xf32> to vector<8x1xf32>
    %cst_8 = arith.constant 2.560000e+02 : f32
    %14 = vector.broadcast %cst_8 : f32 to vector<8x1xf32>
    %15 = arith.divf %13, %14 : vector<8x1xf32>
    %cst_9 = arith.constant 9.99999974E-6 : f32
    %16 = vector.broadcast %cst_9 : f32 to vector<8x1xf32>
    %17 = arith.addf %15, %16 : vector<8x1xf32>
    %18 = math.rsqrt %17 : vector<8x1xf32>
    %19 = vector.broadcast %18 : vector<8x1xf32> to vector<8x256xf32>
    %20 = arith.mulf %10, %19 : vector<8x256xf32>
    %21 = vector.broadcast %3 : vector<1x256xf32> to vector<8x256xf32>
    %22 = arith.mulf %20, %21 : vector<8x256xf32>
    %23 = vector.broadcast %4 : vector<1x256xf32> to vector<8x256xf32>
    %24 = arith.addf %22, %23 : vector<8x256xf32>
    %c0_10 = arith.constant 0 : index
    %c0_11 = arith.constant 0 : index
    %c0_12 = arith.constant 0 : index
    %25 = vector.load %arg3[%c0_10, %c0_11, %c0_12] : memref<1x8x256xbf16, #tpu.memory_space<vmem>>, vector<1x8x256xbf16>
    %26 = vector.shape_cast %25 : vector<1x8x256xbf16> to vector<8x256xbf16>
    %27 = arith.truncf %24 : vector<8x256xf32> to vector<8x256xbf16>
    %c0_13 = arith.constant 0 : index
    %c0_14 = arith.constant 0 : index
    %28 = vector.load %arg7[%c0_13, %c0_14] : memref<256x256xbf16, #tpu.memory_space<vmem>>, vector<256x256xbf16>
    %cst_15 = arith.constant dense<0.000000e+00> : vector<8x256xf32>
    %29 = tpu.matmul %27, %28, %cst_15 {dimension_numbers = #tpu.dot_dimension_numbers<[1], [0], [0], [1], [0, 0, 1, 1], [], []>} : vector<8x256xbf16>, vector<256x256xbf16>, vector<8x256xf32> -> vector<8x256xf32>
    %c0_16 = arith.constant 0 : index
    %c0_17 = arith.constant 0 : index
    %30 = vector.load %arg8[%c0_16, %c0_17] : memref<1x256xf32, #tpu.memory_space<vmem>>, vector<1x256xf32>
    %31 = vector.broadcast %30 : vector<1x256xf32> to vector<8x256xf32>
    %32 = arith.addf %29, %31 : vector<8x256xf32>
    %cst_18 = arith.constant 0.0883883461 : f32
    %33 = vector.broadcast %cst_18 : f32 to vector<8x256xf32>
    %34 = arith.mulf %32, %33 : vector<8x256xf32>
    %c0_19 = arith.constant 0 : index
    %c0_20 = arith.constant 0 : index
    %35 = vector.load %arg9[%c0_19, %c0_20] : memref<256x512xbf16, #tpu.memory_space<vmem>>, vector<256x512xbf16>
    %cst_21 = arith.constant dense<0.000000e+00> : vector<8x512xf32>
    %36 = tpu.matmul %26, %35, %cst_21 {dimension_numbers = #tpu.dot_dimension_numbers<[1], [0], [0], [1], [0, 0, 1, 1], [], []>} : vector<8x256xbf16>, vector<256x512xbf16>, vector<8x512xf32> -> vector<8x512xf32>
    %c0_22 = arith.constant 0 : index
    %c0_23 = arith.constant 0 : index
    %37 = vector.load %arg10[%c0_22, %c0_23] : memref<1x512xf32, #tpu.memory_space<vmem>>, vector<1x512xf32>
    %38 = vector.broadcast %37 : vector<1x512xf32> to vector<8x512xf32>
    %39 = arith.addf %36, %38 : vector<8x512xf32>
    %40 = vector.extract_strided_slice %39 {offsets = [0, 0], sizes = [8, 256], strides = [1, 1]} : vector<8x512xf32> to vector<8x256xf32>
    %41 = vector.extract_strided_slice %39 {offsets = [0, 256], sizes = [8, 256], strides = [1, 1]} : vector<8x512xf32> to vector<8x256xf32>
    %c0_24 = arith.constant 0 : index
    %c0_25 = arith.constant 0 : index
    %c0_26 = arith.constant 0 : index
    %42 = vector.load %arg4[%c0_24, %c0_25, %c0_26] : memref<1x1x8xf32, #tpu.memory_space<vmem>>, vector<1x1x8xf32>
    %43 = vector.shape_cast %42 : vector<1x1x8xf32> to vector<1x8xf32>
    %44 = vector.extract_strided_slice %34 {offsets = [0, 0], sizes = [8, 128], strides = [1, 1]} : vector<8x256xf32> to vector<8x128xf32>
    %45 = arith.truncf %44 : vector<8x128xf32> to vector<8x128xbf16>
    %46 = vector.extract_strided_slice %40 {offsets = [0, 0], sizes = [8, 128], strides = [1, 1]} : vector<8x256xf32> to vector<8x128xf32>
    %47 = arith.truncf %46 : vector<8x128xf32> to vector<8x128xbf16>
    "tpu.trace_start"() <{level = 10 : i32, message = "qd,kd->qk"}> : () -> ()
    %cst_27 = arith.constant dense<0.000000e+00> : vector<8x8xf32>
    %48 = tpu.matmul %45, %47, %cst_27 {dimension_numbers = #tpu.dot_dimension_numbers<[1], [1], [0], [0], [0, 0, 1, 0], [], []>} : vector<8x128xbf16>, vector<8x128xbf16>, vector<8x8xf32> -> vector<8x8xf32>
    "tpu.trace_stop"() : () -> ()
    %49 = vector.broadcast %43 : vector<1x8xf32> to vector<8x8xf32>
    %50 = arith.addf %48, %49 : vector<8x8xf32>
    %cst_28 = arith.constant dense<0xFF800000> : vector<8xf32>
    %51 = vector.multi_reduction <maximumf>, %50, %cst_28 [1] : vector<8x8xf32> to vector<8xf32>
    %52 = vector.shape_cast %51 : vector<8xf32> to vector<8x1xf32>
    %53 = vector.broadcast %52 : vector<8x1xf32> to vector<8x8xf32>
    %54 = arith.subf %50, %53 : vector<8x8xf32>
    %55 = math.exp %54 : vector<8x8xf32>
    %cst_29 = arith.constant dense<0.000000e+00> : vector<8xf32>
    %56 = vector.multi_reduction <add>, %55, %cst_29 [1] : vector<8x8xf32> to vector<8xf32>
    %57 = vector.shape_cast %56 : vector<8xf32> to vector<8x1xf32>
    %58 = tpu.reciprocal %57 {approx = true} : vector<8x1xf32> -> vector<8x1xf32>
    %59 = vector.broadcast %58 : vector<8x1xf32> to vector<8x8xf32>
    %60 = arith.mulf %55, %59 : vector<8x8xf32>
    %61 = arith.truncf %60 : vector<8x8xf32> to vector<8x8xbf16>
    %62 = vector.extract_strided_slice %41 {offsets = [0, 0], sizes = [8, 128], strides = [1, 1]} : vector<8x256xf32> to vector<8x128xf32>
    %63 = arith.truncf %62 : vector<8x128xf32> to vector<8x128xbf16>
    %cst_30 = arith.constant dense<0.000000e+00> : vector<8x128xf32>
    %64 = tpu.matmul %61, %63, %cst_30 {dimension_numbers = #tpu.dot_dimension_numbers<[1], [0], [0], [1], [0, 0, 1, 1], [], []>} : vector<8x8xbf16>, vector<8x128xbf16>, vector<8x128xf32> -> vector<8x128xf32>
    %65 = vector.extract_strided_slice %34 {offsets = [0, 128], sizes = [8, 128], strides = [1, 1]} : vector<8x256xf32> to vector<8x128xf32>
    %66 = arith.truncf %65 : vector<8x128xf32> to vector<8x128xbf16>
    %67 = vector.extract_strided_slice %40 {offsets = [0, 128], sizes = [8, 128], strides = [1, 1]} : vector<8x256xf32> to vector<8x128xf32>
    %68 = arith.truncf %67 : vector<8x128xf32> to vector<8x128xbf16>
    "tpu.trace_start"() <{level = 10 : i32, message = "qd,kd->qk"}> : () -> ()
    %cst_31 = arith.constant dense<0.000000e+00> : vector<8x8xf32>
    %69 = tpu.matmul %66, %68, %cst_31 {dimension_numbers = #tpu.dot_dimension_numbers<[1], [1], [0], [0], [0, 0, 1, 0], [], []>} : vector<8x128xbf16>, vector<8x128xbf16>, vector<8x8xf32> -> vector<8x8xf32>
    "tpu.trace_stop"() : () -> ()
    %70 = vector.broadcast %43 : vector<1x8xf32> to vector<8x8xf32>
    %71 = arith.addf %69, %70 : vector<8x8xf32>
    %cst_32 = arith.constant dense<0xFF800000> : vector<8xf32>
    %72 = vector.multi_reduction <maximumf>, %71, %cst_32 [1] : vector<8x8xf32> to vector<8xf32>
    %73 = vector.shape_cast %72 : vector<8xf32> to vector<8x1xf32>
    %74 = vector.broadcast %73 : vector<8x1xf32> to vector<8x8xf32>
    %75 = arith.subf %71, %74 : vector<8x8xf32>
    %76 = math.exp %75 : vector<8x8xf32>
    %cst_33 = arith.constant dense<0.000000e+00> : vector<8xf32>
    %77 = vector.multi_reduction <add>, %76, %cst_33 [1] : vector<8x8xf32> to vector<8xf32>
    %78 = vector.shape_cast %77 : vector<8xf32> to vector<8x1xf32>
    %79 = tpu.reciprocal %78 {approx = true} : vector<8x1xf32> -> vector<8x1xf32>
    %80 = vector.broadcast %79 : vector<8x1xf32> to vector<8x8xf32>
    %81 = arith.mulf %76, %80 : vector<8x8xf32>
    %82 = arith.truncf %81 : vector<8x8xf32> to vector<8x8xbf16>
    %83 = vector.extract_strided_slice %41 {offsets = [0, 128], sizes = [8, 128], strides = [1, 1]} : vector<8x256xf32> to vector<8x128xf32>
    %84 = arith.truncf %83 : vector<8x128xf32> to vector<8x128xbf16>
    %cst_34 = arith.constant dense<0.000000e+00> : vector<8x128xf32>
    %85 = tpu.matmul %82, %84, %cst_34 {dimension_numbers = #tpu.dot_dimension_numbers<[1], [0], [0], [1], [0, 0, 1, 1], [], []>} : vector<8x8xbf16>, vector<8x128xbf16>, vector<8x128xf32> -> vector<8x128xf32>
    %86 = tpu.concatenate %64, %85 in 1 : vector<8x128xf32>, vector<8x128xf32> -> vector<8x256xf32>
    %87 = arith.truncf %86 : vector<8x256xf32> to vector<8x256xbf16>
    %c0_35 = arith.constant 0 : index
    %c0_36 = arith.constant 0 : index
    %88 = vector.load %arg11[%c0_35, %c0_36] : memref<256x256xbf16, #tpu.memory_space<vmem>>, vector<256x256xbf16>
    %cst_37 = arith.constant dense<0.000000e+00> : vector<8x256xf32>
    %89 = tpu.matmul %87, %88, %cst_37 {dimension_numbers = #tpu.dot_dimension_numbers<[1], [0], [0], [1], [0, 0, 1, 1], [], []>} : vector<8x256xbf16>, vector<256x256xbf16>, vector<8x256xf32> -> vector<8x256xf32>
    %c0_38 = arith.constant 0 : index
    %c0_39 = arith.constant 0 : index
    %90 = vector.load %arg12[%c0_38, %c0_39] : memref<1x256xf32, #tpu.memory_space<vmem>>, vector<1x256xf32>
    %91 = vector.broadcast %90 : vector<1x256xf32> to vector<8x256xf32>
    %92 = arith.addf %89, %91 : vector<8x256xf32>
    %93 = arith.addf %92, %2 : vector<8x256xf32>
    %94 = arith.truncf %93 : vector<8x256xf32> to vector<8x256xbf16>
    %c0_40 = arith.constant 0 : index
    %c0_41 = arith.constant 0 : index
    %c0_42 = arith.constant 0 : index
    %95 = vector.load %arg13[%c0_40, %c0_41, %c0_42] : memref<1x8x256xbf16, #tpu.memory_space<vmem>>, vector<1x8x256xbf16>
    %96 = vector.shape_cast %95 : vector<1x8x256xbf16> to vector<8x256xbf16>
    %97 = vector.shape_cast %94 : vector<8x256xbf16> to vector<1x8x256xbf16>
    tpu.vector_store %arg13[%c0_40, %c0_41, %c0_42], %97 {strides = array<i32>} : memref<1x8x256xbf16, #tpu.memory_space<vmem>>, vector<1x8x256xbf16>,
    return
  }
  func.func @transform_0(%arg0: i32, %arg1: i32) -> (i32, i32, i32) {
    %c0_i32 = arith.constant 0 : i32
    %c0_i32_0 = arith.constant 0 : i32
    return %arg0, %arg1, %c0_i32 : i32, i32, i32
  }
  func.func @transform_1(%arg0: i32, %arg1: i32) -> (i32, i32, i32) {
    %c0_i32 = arith.constant 0 : i32
    %c0_i32_0 = arith.constant 0 : i32
    %c0_i32_1 = arith.constant 0 : i32
    return %arg0, %c0_i32, %c0_i32_0 : i32, i32, i32
  }
  func.func @transform_2(%arg0: i32, %arg1: i32) -> (i32, i32, i32) {
    %c0_i32 = arith.constant 0 : i32
    %c0_i32_0 = arith.constant 0 : i32
    %c0_i32_1 = arith.constant 0 : i32
    return %arg0, %c0_i32, %c0_i32_0 : i32, i32, i32
  }
  func.func @transform_3(%arg0: i32, %arg1: i32) -> (i32, i32) {
    %c0_i32 = arith.constant 0 : i32
    %c0_i32_0 = arith.constant 0 : i32
    %c0_i32_1 = arith.constant 0 : i32
    return %c0_i32, %c0_i32_0 : i32, i32
  }
  func.func @transform_4(%arg0: i32, %arg1: i32) -> (i32, i32) {
    %c0_i32 = arith.constant 0 : i32
    %c0_i32_0 = arith.constant 0 : i32
    %c0_i32_1 = arith.constant 0 : i32
    return %c0_i32, %c0_i32_0 : i32, i32
  }
  func.func @transform_5(%arg0: i32, %arg1: i32) -> (i32, i32) {
    %c0_i32 = arith.constant 0 : i32
    %c0_i32_0 = arith.constant 0 : i32
    %c0_i32_1 = arith.constant 0 : i32
    return %c0_i32, %c0_i32_0 : i32, i32
  }
  func.func @transform_6(%arg0: i32, %arg1: i32) -> (i32, i32) {
    %c0_i32 = arith.constant 0 : i32
    %c0_i32_0 = arith.constant 0 : i32
    %c0_i32_1 = arith.constant 0 : i32
    return %c0_i32, %c0_i32_0 : i32, i32
  }
  func.func @transform_7(%arg0: i32, %arg1: i32) -> (i32, i32) {
    %c0_i32 = arith.constant 0 : i32
    %c0_i32_0 = arith.constant 0 : i32
    %c0_i32_1 = arith.constant 0 : i32
    return %c0_i32, %c0_i32_0 : i32, i32
  }
  func.func @transform_8(%arg0: i32, %arg1: i32) -> (i32, i32) {
    %c0_i32 = arith.constant 0 : i32
    %c0_i32_0 = arith.constant 0 : i32
    %c0_i32_1 = arith.constant 0 : i32
    return %c0_i32, %c0_i32_0 : i32, i32
  }
  func.func @transform_9(%arg0: i32, %arg1: i32) -> (i32, i32) {
    %c0_i32 = arith.constant 0 : i32
    %c0_i32_0 = arith.constant 0 : i32
    %c0_i32_1 = arith.constant 0 : i32
    return %c0_i32, %c0_i32_0 : i32, i32
  }
  func.func @transform_10(%arg0: i32, %arg1: i32) -> (i32, i32) {
    %c0_i32 = arith.constant 0 : i32
    %c0_i32_0 = arith.constant 0 : i32
    %c0_i32_1 = arith.constant 0 : i32
    return %c0_i32, %c0_i32_0 : i32, i32
  }
  func.func @transform_11(%arg0: i32, %arg1: i32) -> (i32, i32, i32) {
    %c0_i32 = arith.constant 0 : i32
    %c0_i32_0 = arith.constant 0 : i32
    return %arg0, %arg1, %c0_i32 : i32, i32, i32
  }
}

module attributes {stable_mosaic.version = 11 : i64} {
  func.func @_lmhead_ce_kernel(%arg0: i32, %arg1: memref<16x256xbf16, #tpu.memory_space<vmem>>, %arg2: memref<16x1xi32, #tpu.memory_space<vmem>>, %arg3: memref<256x256xbf16, #tpu.memory_space<vmem>>, %arg4: memref<1x256xf32, #tpu.memory_space<vmem>>, %arg5: memref<16x256xbf16, #tpu.memory_space<vmem>>, %arg6: memref<16x1xf32, #tpu.memory_space<vmem>>) attributes {dimension_semantics = [#tpu.dimension_semantics<parallel>], iteration_bounds = array<i64: 1>, scalar_prefetch = 0 : i64, scratch_operands = 0 : i64, tpu.core_type = #tpu.core_type<tc>, window_params = [{transform_indices = @transform_0, window_bounds = array<i64: 16, 256>}, {transform_indices = @transform_1, window_bounds = array<i64: 16, 1>}, {pipeline_mode = #tpu.pipeline_mode<synchronous>, transform_indices = @transform_2, window_bounds = array<i64: 256, 256>}, {pipeline_mode = #tpu.pipeline_mode<synchronous>, transform_indices = @transform_3, window_bounds = array<i64: 1, 256>}, {transform_indices = @transform_4, window_bounds = array<i64: 16, 256>}, {transform_indices = @transform_5, window_bounds = array<i64: 16, 1>}]} {
    %c0 = arith.constant 0 : index
    %c0_0 = arith.constant 0 : index
    %0 = vector.load %arg1[%c0, %c0_0] : memref<16x256xbf16, #tpu.memory_space<vmem>>, vector<16x256xbf16>
    %c0_1 = arith.constant 0 : index
    %c0_2 = arith.constant 0 : index
    %1 = vector.load %arg3[%c0_1, %c0_2] : memref<256x256xbf16, #tpu.memory_space<vmem>>, vector<256x256xbf16>
    %cst = arith.constant dense<0.000000e+00> : vector<16x256xf32>
    %2 = tpu.matmul %0, %1, %cst {dimension_numbers = #tpu.dot_dimension_numbers<[1], [1], [0], [0], [0, 0, 1, 0], [], []>} : vector<16x256xbf16>, vector<256x256xbf16>, vector<16x256xf32> -> vector<16x256xf32>
    %c0_3 = arith.constant 0 : index
    %c0_4 = arith.constant 0 : index
    %3 = vector.load %arg4[%c0_3, %c0_4] : memref<1x256xf32, #tpu.memory_space<vmem>>, vector<1x256xf32>
    %4 = vector.broadcast %3 : vector<1x256xf32> to vector<16x256xf32>
    %5 = arith.addf %2, %4 : vector<16x256xf32>
    %6 = arith.truncf %5 : vector<16x256xf32> to vector<16x256xbf16>
    %c0_5 = arith.constant 0 : index
    %c0_6 = arith.constant 0 : index
    %7 = vector.load %arg5[%c0_5, %c0_6] : memref<16x256xbf16, #tpu.memory_space<vmem>>, vector<16x256xbf16>
    tpu.vector_store %arg5[%c0_5, %c0_6], %6 {strides = array<i32>} : memref<16x256xbf16, #tpu.memory_space<vmem>>, vector<16x256xbf16>,
    %cst_7 = arith.constant dense<0xFF800000> : vector<16xf32>
    %8 = vector.multi_reduction <maximumf>, %5, %cst_7 [1] : vector<16x256xf32> to vector<16xf32>
    %9 = vector.shape_cast %8 : vector<16xf32> to vector<16x1xf32>
    %10 = vector.broadcast %9 : vector<16x1xf32> to vector<16x256xf32>
    %11 = arith.subf %5, %10 : vector<16x256xf32>
    %12 = math.exp %11 : vector<16x256xf32>
    %cst_8 = arith.constant dense<0.000000e+00> : vector<16xf32>
    %13 = vector.multi_reduction <add>, %12, %cst_8 [1] : vector<16x256xf32> to vector<16xf32>
    %14 = vector.shape_cast %13 : vector<16xf32> to vector<16x1xf32>
    %15 = math.log %14 : vector<16x1xf32>
    %16 = arith.addf %9, %15 : vector<16x1xf32>
    %c0_9 = arith.constant 0 : index
    %c0_10 = arith.constant 0 : index
    %17 = vector.load %arg2[%c0_9, %c0_10] : memref<16x1xi32, #tpu.memory_space<vmem>>, vector<16x1xi32>
    %18 = tpu.iota {dimensions = array<i32: 1>} : vector<16x256xi32>
    %19 = vector.broadcast %17 : vector<16x1xi32> to vector<16x256xi32>
    %20 = arith.cmpi eq, %18, %19 : vector<16x256xi32>
    %21 = arith.extui %20 : vector<16x256xi1> to vector<16x256xi32>
    %22 = arith.sitofp %21 : vector<16x256xi32> to vector<16x256xf32>
    %c0_i32 = arith.constant 0 : i32
    %23 = vector.broadcast %c0_i32 : i32 to vector<16x1xi32>
    %24 = arith.cmpi sge, %17, %23 : vector<16x1xi32>
    %25 = arith.extui %24 : vector<16x1xi1> to vector<16x1xi32>
    %26 = arith.sitofp %25 : vector<16x1xi32> to vector<16x1xf32>
    %27 = arith.mulf %5, %22 : vector<16x256xf32>
    %cst_11 = arith.constant dense<0.000000e+00> : vector<16xf32>
    %28 = vector.multi_reduction <add>, %27, %cst_11 [1] : vector<16x256xf32> to vector<16xf32>
    %29 = vector.shape_cast %28 : vector<16xf32> to vector<16x1xf32>
    %30 = arith.subf %16, %29 : vector<16x1xf32>
    %31 = arith.mulf %30, %26 : vector<16x1xf32>
    %c0_12 = arith.constant 0 : index
    %c0_13 = arith.constant 0 : index
    %32 = vector.load %arg6[%c0_12, %c0_13] : memref<16x1xf32, #tpu.memory_space<vmem>>, vector<16x1xf32>
    tpu.vector_store %arg6[%c0_12, %c0_13], %31 {strides = array<i32>} : memref<16x1xf32, #tpu.memory_space<vmem>>, vector<16x1xf32>,
    return
  }
  func.func @transform_0(%arg0: i32) -> (i32, i32) {
    %c0_i32 = arith.constant 0 : i32
    %c0_i32_0 = arith.constant 0 : i32
    return %arg0, %c0_i32 : i32, i32
  }
  func.func @transform_1(%arg0: i32) -> (i32, i32) {
    %c0_i32 = arith.constant 0 : i32
    %c0_i32_0 = arith.constant 0 : i32
    return %arg0, %c0_i32 : i32, i32
  }
  func.func @transform_2(%arg0: i32) -> (i32, i32) {
    %c0_i32 = arith.constant 0 : i32
    %c0_i32_0 = arith.constant 0 : i32
    %c0_i32_1 = arith.constant 0 : i32
    return %c0_i32, %c0_i32_0 : i32, i32
  }
  func.func @transform_3(%arg0: i32) -> (i32, i32) {
    %c0_i32 = arith.constant 0 : i32
    %c0_i32_0 = arith.constant 0 : i32
    %c0_i32_1 = arith.constant 0 : i32
    return %c0_i32, %c0_i32_0 : i32, i32
  }
  func.func @transform_4(%arg0: i32) -> (i32, i32) {
    %c0_i32 = arith.constant 0 : i32
    %c0_i32_0 = arith.constant 0 : i32
    return %arg0, %c0_i32 : i32, i32
  }
  func.func @transform_5(%arg0: i32) -> (i32, i32) {
    %c0_i32 = arith.constant 0 : i32
    %c0_i32_0 = arith.constant 0 : i32
    return %arg0, %c0_i32 : i32, i32
  }
}

</mosaic_0001>

<bundles_post_ra>
// kernel: mbart_forward.7
= control target key start
LH: loop header
LB: loop body
LE: loop exit
PB: predicated region body
PF: predicated region fallthrough
CT: control target
= control target key end

     0   :  { %s2161_s0 = inlined_call_operand.vmem [shape: bf16[16,256], index: 0, kind: input, shape index: {}]   ;;  %s2162_s3 = inlined_call_operand.vmem [shape: bf16[256,512], index: 3, kind: input, shape index: {}]   ;;  %s2163_s5 = inlined_call_operand.vmem [shape: bf16[512,256], index: 5, kind: input, shape index: {}]   ;;  %s2164_s1 = inlined_call_operand.vmem [shape: f32[1,256], index: 1, kind: input, shape index: {}]   ;;  %s2165_s2 = inlined_call_operand.vmem [shape: f32[1,256], index: 2, kind: input, shape index: {}]   ;;  %s2166_s4 = inlined_call_operand.vmem [shape: f32[1,512], index: 4, kind: input, shape index: {}]   ;;  %s2167_s6 = inlined_call_operand.vmem [shape: f32[1,256], index: 6, kind: input, shape index: {}]   ;;  %s2168_s7 = inlined_call_operand.vmem [shape: f32[1,256], index: 7, kind: input, shape index: {}]   ;;  %s2169_s8 = inlined_call_operand.vmem [shape: f32[1,256], index: 8, kind: input, shape index: {}]   ;;  %s2170_s9 = inlined_call_operand.vmem [shape: bf16[16,256], index: 9, kind: output, shape index: {}]  }
   0x1   :  { %v32_v0 = vld [vmem:[%s2161_s0] sm:$0xff]  ;;  %v33_v1 = vld [vmem:[%s2161_s0 + $0x8] sm:$0xff]  ;;  %v1480_v57 = vld [vmem:[%s2163_s5 + $0x14] ss:$8 sps:$4 sm:$0xff]  }
   0x2   :  { %v1653_v2 = vunpack.c.l.bf16 %v32_v0  ;;  %v1655_v3 = vunpack.c.h.bf16 %v32_v0  ;;  %v1657_v4 = vunpack.c.l.bf16 %v33_v1  ;;  %v1659_v5 = vunpack.c.h.bf16 %v33_v1  ;;  %v1381_v8 = vld [vmem:[%s2162_s3 + $0x4] ss:$16 sps:$4 sm:$0xff]   ;;  %v1383_v9 = vld [vmem:[%s2162_s3] ss:$16 sps:$4 sm:$0xff]   ;;  %v1431_v54 = vld [vmem:[%s2162_s3 + $0xc] ss:$16 sps:$4 sm:$0xff]  }
   0x3   :  { %511 = vmatprep.subr.bf16.mxu1 %v1381_v8  ;;  %v1384_v10 = vld [vmem:[%s2162_s3 + $0x24] ss:$16 sps:$4 sm:$0xff]   ;;  %v1386_v11 = vld [vmem:[%s2162_s3 + $0x20] ss:$16 sps:$4 sm:$0xff]  }
   0x4   :  { %v40_v6 = vadd.f32 %v1655_v3, %v1653_v2  ;;  %v43_v7 = vadd.f32 %v1659_v5, %v1657_v4  ;;  %512 = vmatpush1.bf16.msra.mxu1 %v1383_v9  ;;  %v1387_v12 = vld [vmem:[%s2162_s3 + $0x44] ss:$16 sps:$4 sm:$0xff]   ;;  %v1389_v13 = vld [vmem:[%s2162_s3 + $0x40] ss:$16 sps:$4 sm:$0xff]  }
   0x5   :  { %513 = vmatprep.subr.bf16.mxu1 %v1384_v10  ;;  %v1390_v14 = vld [vmem:[%s2162_s3 + $0x64] ss:$16 sps:$4 sm:$0xff]   ;;  %v1392_v15 = vld [vmem:[%s2162_s3 + $0x60] ss:$16 sps:$4 sm:$0xff]  }
   0x6   :  { %41 = vadd.xlane.f32.xlu0 %v40_v6  ;;  %v1393_v16 = vld [vmem:[%s2162_s3 + $0x84] ss:$16 sps:$4 sm:$0xff]   ;;  %v1395_v17 = vld [vmem:[%s2162_s3 + $0x80] ss:$16 sps:$4 sm:$0xff]  }
   0x7   :  { %v1396_v18 = vld [vmem:[%s2162_s3 + $0xa4] ss:$16 sps:$4 sm:$0xff]   ;;  %v1398_v19 = vld [vmem:[%s2162_s3 + $0xa0] ss:$16 sps:$4 sm:$0xff]  }
   0x8   :  { %514 = vmatpush1.bf16.msra.mxu1 %v1386_v11  ;;  %v1399_v20 = vld [vmem:[%s2162_s3 + $0xc4] ss:$16 sps:$4 sm:$0xff]   ;;  %v1401_v21 = vld [vmem:[%s2162_s3 + $0xc0] ss:$16 sps:$4 sm:$0xff]  }
   0x9   :  { %515 = vmatprep.subr.bf16.mxu1 %v1387_v12  ;;  %v1402_v22 = vld [vmem:[%s2162_s3 + $0xe4] ss:$16 sps:$4 sm:$0xff]   ;;  %v1404_v23 = vld [vmem:[%s2162_s3 + $0xe0] ss:$16 sps:$4 sm:$0xff]  }
   0xa   :  { %44 = vadd.xlane.f32.xlu0 %v43_v7  ;;  %v1405_v24 = vld [vmem:[%s2162_s3 + $0x104] ss:$16 sps:$4 sm:$0xff]   ;;  %v1407_v25 = vld [vmem:[%s2162_s3 + $0x100] ss:$16 sps:$4 sm:$0xff]  }
   0xb   :  { %v1408_v26 = vld [vmem:[%s2162_s3 + $0x124] ss:$16 sps:$4 sm:$0xff]   ;;  %v1410_v41 = vld [vmem:[%s2162_s3 + $0x120] ss:$16 sps:$4 sm:$0xff]  }
   0xc   :  { %516 = vmatpush1.bf16.msra.mxu1 %v1389_v13  ;;  %v1411_v42 = vld [vmem:[%s2162_s3 + $0x144] ss:$16 sps:$4 sm:$0xff]   ;;  %v1413_v43 = vld [vmem:[%s2162_s3 + $0x140] ss:$16 sps:$4 sm:$0xff]  }
   0xd   :  { %517 = vmatprep.subr.bf16.mxu1 %v1390_v14  ;;  %v1414_v44 = vld [vmem:[%s2162_s3 + $0x164] ss:$16 sps:$4 sm:$0xff]   ;;  %v1416_v45 = vld [vmem:[%s2162_s3 + $0x160] ss:$16 sps:$4 sm:$0xff]   ;;  %v74_v14 = vlaneseq }
   0xe   :  { %v1417_v46 = vld [vmem:[%s2162_s3 + $0x184] ss:$16 sps:$4 sm:$0xff]   ;;  %v1419_v47 = vld [vmem:[%s2162_s3 + $0x180] ss:$16 sps:$4 sm:$0xff]  }
   0xf   :  { %v1420_v48 = vld [vmem:[%s2162_s3 + $0x1a4] ss:$16 sps:$4 sm:$0xff]   ;;  %v1422_v49 = vld [vmem:[%s2162_s3 + $0x1a0] ss:$16 sps:$4 sm:$0xff]  }
  0x10   :  { %518 = vmatpush1.bf16.msra.mxu1 %v1392_v15  ;;  %v1423_v50 = vld [vmem:[%s2162_s3 + $0x1c4] ss:$16 sps:$4 sm:$0xff]   ;;  %v1425_v51 = vld [vmem:[%s2162_s3 + $0x1c0] ss:$16 sps:$4 sm:$0xff]  }
  0x11   :  { %519 = vmatprep.subr.bf16.mxu1 %v1393_v16  ;;  %v1426_v52 = vld [vmem:[%s2162_s3 + $0x1e4] ss:$16 sps:$4 sm:$0xff]   ;;  %v1428_v53 = vld [vmem:[%s2162_s3 + $0x1e0] ss:$16 sps:$4 sm:$0xff]  }
  0x12   :  { %v1477_v55 = vld [vmem:[%s2163_s5 + $0x4] ss:$8 sps:$4 sm:$0xff]   ;;  %v1479_v56 = vld [vmem:[%s2163_s5] ss:$8 sps:$4 sm:$0xff]   ;;  %v1482_v58 = vld [vmem:[%s2163_s5 + $0x10] ss:$8 sps:$4 sm:$0xff]  }
  0x13   :  { %1069 = vmatprep.subr.bf16.mxu0 %v1477_v55  ;;  %v1483_v59 = vld [vmem:[%s2163_s5 + $0x24] ss:$8 sps:$4 sm:$0xff]   ;;  %v1485_v60 = vld [vmem:[%s2163_s5 + $0x20] ss:$8 sps:$4 sm:$0xff]   ;;  %v1486_v61 = vld [vmem:[%s2163_s5 + $0x34] ss:$8 sps:$4 sm:$0xff]  }
  0x14   :  { %520 = vmatpush1.bf16.msra.mxu1 %v1395_v17  ;;  %1070 = vmatpush1.bf16.msra.mxu0 %v1479_v56  ;;  %v1488_v62 = vld [vmem:[%s2163_s5 + $0x30] ss:$8 sps:$4 sm:$0xff]   ;;  %v1489_v63 = vld [vmem:[%s2163_s5 + $0x44] ss:$8 sps:$4 sm:$0xff]   ;;  %v1491_v0 = vld [vmem:[%s2163_s5 + $0x40] ss:$8 sps:$4 sm:$0xff]  }
  0x15   :  { %521 = vmatprep.subr.bf16.mxu1 %v1396_v18  ;;  %1071 = vmatprep.subr.bf16.mxu0 %v1480_v57  ;;  %v1492_v1 = vld [vmem:[%s2163_s5 + $0x54] ss:$8 sps:$4 sm:$0xff]   ;;  %v1494_v6 = vld [vmem:[%s2163_s5 + $0x50] ss:$8 sps:$4 sm:$0xff]   ;;  %v1495_v7 = vld [vmem:[%s2163_s5 + $0x64] ss:$8 sps:$4 sm:$0xff]  }
  0x16   :  { %v1497_v8 = vld [vmem:[%s2163_s5 + $0x60] ss:$8 sps:$4 sm:$0xff]   ;;  %v1498_v9 = vld [vmem:[%s2163_s5 + $0x74] ss:$8 sps:$4 sm:$0xff]   ;;  %v1829_v17 = vshrl.u32 %v74_v14, 7 }
  0x17   :  { %v1452_v55 = vld [vmem:[%s2162_s3 + $0xec] ss:$16 sps:$4 sm:$0xff]   ;;  %v1450_v56 = vld [vmem:[%s2162_s3 + $0xe8] ss:$16 sps:$4 sm:$0xff]  }
  0x18   :  { %522 = vmatpush1.bf16.msra.mxu1 %v1398_v19  ;;  %1072 = vmatpush1.bf16.msra.mxu0 %v1482_v58  ;;  %v1832_v18 = vsub.s32 0, %v1829_v17  ;;  %v1835_v19 = vsub.s32 1, %v1829_v17  ;;  %v1455_v57 = vld [vmem:[%s2162_s3 + $0x10c] ss:$16 sps:$4 sm:$0xff]   ;;  %v1453_v58 = vld [vmem:[%s2162_s3 + $0x108] ss:$16 sps:$4 sm:$0xff]  }
  0x19   :  { %523 = vmatprep.subr.bf16.mxu1 %v1399_v20  ;;  %1073 = vmatprep.subr.bf16.mxu0 %v1483_v59  ;;  %v38_v20 = vld [vmem:[%s2164_s1] sm:$0x3]  ;;  %v1458_v59 = vld [vmem:[%s2162_s3 + $0x12c] ss:$16 sps:$4 sm:$0xff]  }
  0x1a   :  { %v1501_v14 = vld [vmem:[%s2163_s5 + $0x84] ss:$8 sps:$4 sm:$0xff]  }
  0x1c   :  { %524 = vmatpush1.bf16.msra.mxu1 %v1401_v21  ;;  %1074 = vmatpush1.bf16.msra.mxu0 %v1485_v60  ;;  %v1456_v60 = vld [vmem:[%s2162_s3 + $0x128] ss:$16 sps:$4 sm:$0xff]  }
  0x1d   :  { %525 = vmatprep.subr.bf16.mxu1 %v1402_v22  ;;  %1075 = vmatprep.subr.bf16.mxu0 %v1486_v61  ;;  %v39_v22 = vld [vmem:[%s2165_s2] sm:$0x3]  ;;  %v1461_v61 = vld [vmem:[%s2162_s3 + $0x14c] ss:$16 sps:$4 sm:$0xff]  }
  0x20   :  { %526 = vmatpush1.bf16.msra.mxu1 %v1404_v23  ;;  %1076 = vmatpush1.bf16.msra.mxu0 %v1488_v62  ;;  %v1459_v62 = vld [vmem:[%s2162_s3 + $0x148] ss:$16 sps:$4 sm:$0xff]  }
  0x21   :  { %527 = vmatprep.subr.bf16.mxu1 %v1405_v24  ;;  %1077 = vmatprep.subr.bf16.mxu0 %v1489_v63  ;;  %v77_v24 = vrot.slane %v38_v20, %v1832_v18  ;;  %v1464_v63 = vld [vmem:[%s2162_s3 + $0x16c] ss:$16 sps:$4 sm:$0xff]  }
  0x24   :  { %528 = vmatpush1.bf16.msra.mxu1 %v1407_v25  ;;  %1078 = vmatpush1.bf16.msra.mxu0 %v1491_v0  ;;  %v81_v25 = vrot.slane %v38_v20, %v1835_v19  ;;  %v1462_v0 = vld [vmem:[%s2162_s3 + $0x168] ss:$16 sps:$4 sm:$0xff]  }
  0x25   :  { %529 = vmatprep.subr.bf16.mxu1 %v1408_v26  ;;  %1079 = vmatprep.subr.bf16.mxu0 %v1492_v1  ;;  %v1467_v1 = vld [vmem:[%s2162_s3 + $0x18c] ss:$16 sps:$4 sm:$0xff]   ;;  %v1506_v20 = vld [vmem:[%s2163_s5 + $0x90] ss:$8 sps:$4 sm:$0xff]  }
  0x28   :  { %530 = vmatpush1.bf16.msra.mxu1 %v1410_v41  ;;  %1080 = vmatpush1.bf16.msra.mxu0 %v1494_v6  ;;  %v1465_v6 = vld [vmem:[%s2162_s3 + $0x188] ss:$16 sps:$4 sm:$0xff]  }
  0x29   :  { %531 = vmatprep.subr.bf16.mxu1 %v1411_v42  ;;  %1081 = vmatprep.subr.bf16.mxu0 %v1495_v7  ;;  %v1470_v7 = vld [vmem:[%s2162_s3 + $0x1ac] ss:$16 sps:$4 sm:$0xff]  }
  0x2c   :  { %532 = vmatpush1.bf16.msra.mxu1 %v1413_v43  ;;  %1082 = vmatpush1.bf16.msra.mxu0 %v1497_v8  ;;  %v1468_v8 = vld [vmem:[%s2162_s3 + $0x1a8] ss:$16 sps:$4 sm:$0xff]  }
  0x2d   :  { %533 = vmatprep.subr.bf16.mxu1 %v1414_v44  ;;  %1083 = vmatprep.subr.bf16.mxu0 %v1498_v9  ;;  %v1473_v9 = vld [vmem:[%s2162_s3 + $0x1cc] ss:$16 sps:$4 sm:$0xff]  }
  0x30   :  { %534 = vmatpush1.bf16.msra.mxu1 %v1416_v45  ;;  %v1437_v45 = vld [vmem:[%s2162_s3 + $0x4c] ss:$16 sps:$4 sm:$0xff]  }
  0x31   :  { %535 = vmatprep.subr.bf16.mxu1 %v1417_v46  ;;  %v1435_v46 = vld [vmem:[%s2162_s3 + $0x48] ss:$16 sps:$4 sm:$0xff]  }
  0x34   :  { %536 = vmatpush1.bf16.msra.mxu1 %v1419_v47  ;;  %v1440_v47 = vld [vmem:[%s2162_s3 + $0x6c] ss:$16 sps:$4 sm:$0xff]  }
  0x35   :  { %537 = vmatprep.subr.bf16.mxu1 %v1420_v48  ;;  %v1438_v48 = vld [vmem:[%s2162_s3 + $0x68] ss:$16 sps:$4 sm:$0xff]  }
  0x38   :  { %538 = vmatpush1.bf16.msra.mxu1 %v1422_v49  ;;  %v1443_v49 = vld [vmem:[%s2162_s3 + $0x8c] ss:$16 sps:$4 sm:$0xff]  }
  0x39   :  { %539 = vmatprep.subr.bf16.mxu1 %v1423_v50  ;;  %v1441_v50 = vld [vmem:[%s2162_s3 + $0x88] ss:$16 sps:$4 sm:$0xff]  }
  0x3c   :  { %540 = vmatpush1.bf16.msra.mxu1 %v1425_v51  ;;  %v1446_v51 = vld [vmem:[%s2162_s3 + $0xac] ss:$16 sps:$4 sm:$0xff]  }
  0x3d   :  { %541 = vmatprep.subr.bf16.mxu1 %v1426_v52  ;;  %v1444_v52 = vld [vmem:[%s2162_s3 + $0xa8] ss:$16 sps:$4 sm:$0xff]  }
  0x40   :  { %542 = vmatpush1.bf16.msra.mxu1 %v1428_v53  ;;  %v1449_v53 = vld [vmem:[%s2162_s3 + $0xcc] ss:$16 sps:$4 sm:$0xff]  }
  0x41   :  { %554 = vmatprep.subr.bf16.mxu1 %v1431_v54  ;;  %v1447_v54 = vld [vmem:[%s2162_s3 + $0xc8] ss:$16 sps:$4 sm:$0xff]  }
  0x93   :  { %v42_v27 = vpop.xlane.xlu0 %41 }
  0x94   :  { %v47_v28 = vmul.f32 0.00390625, %v42_v27 }
  0x96   :  { %v1723_v29 = vsub.f32 %v1653_v2, %v47_v28  ;;  %v1726_v30 = vsub.f32 %v1655_v3, %v47_v28  ;;  %v92_v28 = vrot.slane %v39_v22, %v1832_v18 }
  0x97   :  { %v45_v31 = vpop.xlane.xlu0 %44 }
  0x98   :  { %v48_v32 = vmul.f32 0.00390625, %v45_v31  ;;  %v53_v33 = vmul.f32 %v1723_v29, %v1723_v29  ;;  %v54_v34 = vmul.f32 %v1726_v30, %v1726_v30  ;;  %v96_v31 = vrot.slane %v39_v22, %v1835_v19  ;;  %v1509_v22 = vld [vmem:[%s2163_s5 + $0xa0] ss:$8 sps:$4 sm:$0xff]  }
  0x9a   :  { %v1733_v35 = vsub.f32 %v1657_v4, %v48_v32  ;;  %v1736_v36 = vsub.f32 %v1659_v5, %v48_v32  ;;  %v57_v37 = vadd.f32 %v54_v34, %v53_v33 }
  0x9c   :  { %58 = vadd.xlane.f32.xlu1 %v57_v37  ;;  %v55_v38 = vmul.f32 %v1733_v35, %v1733_v35  ;;  %v56_v39 = vmul.f32 %v1736_v36, %v1736_v36 }
  0x9e   :  { %v60_v40 = vadd.f32 %v56_v39, %v55_v38 }
  0xa0   :  { %61 = vadd.xlane.f32.xlu1 %v60_v40 }
 0x129   :  { %v59_v10 = vpop.xlane.xlu1 %58 }
 0x12a   :  { %v63_v11 = vmul.f32 0.00390625, %v59_v10  ;;  %v1471_v10 = vld [vmem:[%s2162_s3 + $0x1c8] ss:$16 sps:$4 sm:$0xff]  }
 0x12c   :  { %v65_v12 = vadd.f32 1e-05, %v63_v11  ;;  %v1476_v11 = vld [vmem:[%s2162_s3 + $0x1ec] ss:$16 sps:$4 sm:$0xff]  }
 0x12d   :  { %v62_v13 = vpop.xlane.xlu1 %61 }
 0x12e   :  { %1573 = vrsqrt.f32 %v65_v12  ;;  %v64_v15 = vmul.f32 0.00390625, %v62_v13  ;;  %v1474_v12 = vld [vmem:[%s2162_s3 + $0x1e8] ss:$16 sps:$4 sm:$0xff]  }
 0x12f   :  { %v1500_v13 = vld [vmem:[%s2163_s5 + $0x70] ss:$8 sps:$4 sm:$0xff]  }
 0x130   :  { %v66_v16 = vadd.f32 1e-05, %v64_v15  ;;  %1084 = vmatpush1.bf16.msra.mxu0 %v1500_v13  ;;  %v1503_v15 = vld [vmem:[%s2163_s5 + $0x80] ss:$8 sps:$4 sm:$0xff]  }
 0x131   :  { %1085 = vmatprep.subr.bf16.mxu0 %v1501_v14 }
 0x132   :  { %1575 = vrsqrt.f32 %v66_v16  ;;  %v1504_v16 = vld [vmem:[%s2163_s5 + $0x94] ss:$8 sps:$4 sm:$0xff]  }
 0x134   :  { %1086 = vmatpush1.bf16.msra.mxu0 %v1503_v15 }
 0x135   :  { %1087 = vmatprep.subr.bf16.mxu0 %v1504_v16 }
 0x138   :  { %v1574_v21 = vpop.eup %1573  ;;  %1088 = vmatpush1.bf16.msra.mxu0 %v1506_v20 }
 0x139   :  { %v70_v23 = vmul.f32 %v1574_v21, %v1726_v30  ;;  %v69_v26 = vmul.f32 %v1574_v21, %v1723_v29  ;;  %v1429_v29 = vld [vmem:[%s2162_s3 + $0x8] ss:$16 sps:$4 sm:$0xff]   ;;  %v1507_v21 = vld [vmem:[%s2163_s5 + $0xa4] ss:$8 sps:$4 sm:$0xff]  }
 0x13a   :  { %1089 = vmatprep.subr.bf16.mxu0 %v1507_v21 }
 0x13b   :  { %v85_v33 = vmul.f32 %v81_v25, %v70_v23  ;;  %v84_v37 = vmul.f32 %v77_v24, %v69_v26  ;;  %v1510_v23 = vld [vmem:[%s2163_s5 + $0xb4] ss:$8 sps:$4 sm:$0xff]   ;;  %v1515_v26 = vld [vmem:[%s2163_s5 + $0xc0] ss:$8 sps:$4 sm:$0xff]  }
 0x13c   :  { %v1576_v27 = vpop.eup %1575  ;;  %1090 = vmatpush1.bf16.msra.mxu0 %v1509_v22 }
 0x13d   :  { %v72_v32 = vmul.f32 %v1576_v27, %v1736_v36  ;;  %v71_v34 = vmul.f32 %v1576_v27, %v1733_v35  ;;  %v100_v30 = vadd.f32 %v96_v31, %v85_v33  ;;  %v99_v41 = vadd.f32 %v92_v28, %v84_v37  ;;  %v1434_v36 = vld [vmem:[%s2162_s3 + $0x2c] ss:$16 sps:$4 sm:$0xff]   ;;  %v1432_v35 = vld [vmem:[%s2162_s3 + $0x28] ss:$16 sps:$4 sm:$0xff]   ;;  %1091 = vmatprep.subr.bf16.mxu0 %v1510_v23 }
 0x13e   :  { %v1516_v27 = vld [vmem:[%s2163_s5 + $0xd4] ss:$8 sps:$4 sm:$0xff]   ;;  %v1527_v37 = vld [vmem:[%s2163_s5 + $0x104] ss:$8 sps:$4 sm:$0xff]  }
 0x13f   :  { %v87_v38 = vmul.f32 %v81_v25, %v72_v32  ;;  %v86_v39 = vmul.f32 %v77_v24, %v71_v34  ;;  %v1512_v24 = vld [vmem:[%s2163_s5 + $0xb0] ss:$8 sps:$4 sm:$0xff]   ;;  %v1513_v25 = vld [vmem:[%s2163_s5 + $0xc4] ss:$8 sps:$4 sm:$0xff]   ;;  %v1521_v32 = vld [vmem:[%s2163_s5 + $0xe0] ss:$8 sps:$4 sm:$0xff]  }
 0x140   :  { %1092 = vmatpush1.bf16.msra.mxu0 %v1512_v24  ;;  %v1522_v33 = vld [vmem:[%s2163_s5 + $0xf4] ss:$8 sps:$4 sm:$0xff]   ;;  %v1524_v34 = vld [vmem:[%s2163_s5 + $0xf0] ss:$8 sps:$4 sm:$0xff]  }
 0x141   :  { %v102_v40 = vadd.f32 %v96_v31, %v87_v38  ;;  %v101_v42 = vadd.f32 %v92_v28, %v86_v39  ;;  %1093 = vmatprep.subr.bf16.mxu0 %v1513_v25  ;;  %v1518_v28 = vld [vmem:[%s2163_s5 + $0xd0] ss:$8 sps:$4 sm:$0xff]   ;;  %v1519_v31 = vld [vmem:[%s2163_s5 + $0xe4] ss:$8 sps:$4 sm:$0xff]   ;;  %v2005_v38 = vld [vmem:[%s2166_s4] sm:$0xf] }
 0x142   :  { %v174_v39 = vrot.slane %v2005_v38, %v1832_v18 }
 0x143   :  { %v104_v43 = vpack.c.bf16 %v102_v40, %v100_v30  ;;  %v1854_v44 = vpack.c.bf16 %v101_v42, %v99_v41  ;;  %v178_v30 = vrot.slane %v2005_v38, %v1835_v19 }
 0x144   :  { %1094 = vmatpush1.bf16.msra.mxu0 %v1515_v26  ;;  %v1525_v26 = vld [vmem:[%s2163_s5 + $0x100] ss:$8 sps:$4 sm:$0xff]  }
 0x145   :  { %543 = vmatprep.mubr.bf16.mxu1 %v104_v43  ;;  %1095 = vmatprep.subr.bf16.mxu0 %v1516_v27  ;;  %v1530_v27 = vld [vmem:[%s2163_s5 + $0x114] ss:$8 sps:$4 sm:$0xff]  }
 0x146   :  { %544 = vmatmul.mubr.bf16.vlgmr.msra.gmra.mrb[0].mxu1 %v1854_v44 }
 0x147   :  { %555 = vmatpush1.bf16.msra.mxu1 %v1429_v29  ;;  %586 = vmatprep.mubr.bf16.mxu1 %v104_v43 }
 0x148   :  { %556 = vmatprep.subr.bf16.mxu1 %v1434_v36  ;;  %1096 = vmatpush1.bf16.msra.mxu0 %v1518_v28  ;;  %v1528_v28 = vld [vmem:[%s2163_s5 + $0x110] ss:$8 sps:$4 sm:$0xff]  }
 0x149   :  { %1097 = vmatprep.subr.bf16.mxu0 %v1519_v31  ;;  %v1533_v31 = vld [vmem:[%s2163_s5 + $0x124] ss:$8 sps:$4 sm:$0xff]  }
 0x14b   :  { %557 = vmatpush1.bf16.msra.mxu1 %v1432_v35 }
 0x14c   :  { %558 = vmatprep.subr.bf16.mxu1 %v1437_v45  ;;  %1098 = vmatpush1.bf16.msra.mxu0 %v1521_v32  ;;  %v1531_v32 = vld [vmem:[%s2163_s5 + $0x120] ss:$8 sps:$4 sm:$0xff]  }
 0x14d   :  { %1099 = vmatprep.subr.bf16.mxu0 %v1522_v33  ;;  %v1536_v33 = vld [vmem:[%s2163_s5 + $0x134] ss:$8 sps:$4 sm:$0xff]  }
 0x14f   :  { %559 = vmatpush1.bf16.msra.mxu1 %v1435_v46 }
 0x150   :  { %560 = vmatprep.subr.bf16.mxu1 %v1440_v47  ;;  %1100 = vmatpush1.bf16.msra.mxu0 %v1524_v34  ;;  %v1534_v34 = vld [vmem:[%s2163_s5 + $0x130] ss:$8 sps:$4 sm:$0xff]  }
 0x151   :  { %1112 = vmatprep.subr.bf16.mxu0 %v1527_v37  ;;  %v1539_v37 = vld [vmem:[%s2163_s5 + $0x144] ss:$8 sps:$4 sm:$0xff]  }
 0x153   :  { %561 = vmatpush1.bf16.msra.mxu1 %v1438_v48 }
 0x154   :  { %562 = vmatprep.subr.bf16.mxu1 %v1443_v49 }
 0x157   :  { %563 = vmatpush1.bf16.msra.mxu1 %v1441_v50 }
 0x158   :  { %564 = vmatprep.subr.bf16.mxu1 %v1446_v51 }
 0x15b   :  { %565 = vmatpush1.bf16.msra.mxu1 %v1444_v52 }
 0x15c   :  { %566 = vmatprep.subr.bf16.mxu1 %v1449_v53 }
 0x15f   :  { %567 = vmatpush1.bf16.msra.mxu1 %v1447_v54 }
 0x160   :  { %568 = vmatprep.subr.bf16.mxu1 %v1452_v55 }
 0x163   :  { %569 = vmatpush1.bf16.msra.mxu1 %v1450_v56 }
 0x164   :  { %570 = vmatprep.subr.bf16.mxu1 %v1455_v57 }
 0x167   :  { %571 = vmatpush1.bf16.msra.mxu1 %v1453_v58 }
 0x168   :  { %572 = vmatprep.subr.bf16.mxu1 %v1458_v59 }
 0x16b   :  { %573 = vmatpush1.bf16.msra.mxu1 %v1456_v60 }
 0x16c   :  { %574 = vmatprep.subr.bf16.mxu1 %v1461_v61 }
 0x16f   :  { %575 = vmatpush1.bf16.msra.mxu1 %v1459_v62 }
 0x170   :  { %576 = vmatprep.subr.bf16.mxu1 %v1464_v63 }
 0x173   :  { %577 = vmatpush1.bf16.msra.mxu1 %v1462_v0 }
 0x174   :  { %578 = vmatprep.subr.bf16.mxu1 %v1467_v1 }
 0x177   :  { %579 = vmatpush1.bf16.msra.mxu1 %v1465_v6 }
 0x178   :  { %580 = vmatprep.subr.bf16.mxu1 %v1470_v7 }
 0x17b   :  { %581 = vmatpush1.bf16.msra.mxu1 %v1468_v8 }
 0x17c   :  { %582 = vmatprep.subr.bf16.mxu1 %v1473_v9 }
 0x17f   :  { %583 = vmatpush1.bf16.msra.mxu1 %v1471_v10 }
 0x180   :  { %584 = vmatprep.subr.bf16.mxu1 %v1476_v11 }
 0x183   :  { %585 = vmatpush1.bf16.msra.mxu1 %v1474_v12 }
 0x186   :  { %587 = vmatmul.mubr.bf16.vlgmr.msra.gmra.mrb[4].mxu1 %v1854_v44 }
 0x219   :  { %v545_v40 = vpop.f32.mrb[0].mxu1 }
 0x21a   :  { %v546_v41 = vadd.f32 %v545_v40, %v174_v39  ;;  %v547_v42 = vpop.f32.mrb[1].mxu1  ;;  %v1540_v40 = vld [vmem:[%s2163_s5 + $0x150] ss:$8 sps:$4 sm:$0xff]  }
 0x21b   :  { %v548_v43 = vadd.f32 %v547_v42, %v178_v30  ;;  %v549_v29 = vpop.f32.mrb[2].mxu1  ;;  %v1543_v42 = vld [vmem:[%s2163_s5 + $0x160] ss:$8 sps:$4 sm:$0xff]  }
 0x21c   :  { %v597_v44 = vmul.f32 %v546_v41, %v546_v41  ;;  %v550_v36 = vadd.f32 %v549_v29, %v174_v39  ;;  %v551_v35 = vpop.f32.mrb[3].mxu1  ;;  %v1537_v39 = vld [vmem:[%s2163_s5 + $0x140] ss:$8 sps:$4 sm:$0xff]   ;;  %v1548_v29 = vld [vmem:[%s2163_s5 + $0x174] ss:$8 sps:$4 sm:$0xff]  }
 0x21d   :  { %v598_v45 = vmul.f32 %v548_v43, %v548_v43  ;;  %v552_v46 = vadd.f32 %v551_v35, %v178_v30  ;;  %v1542_v30 = vld [vmem:[%s2163_s5 + $0x154] ss:$8 sps:$4 sm:$0xff]   ;;  %v1546_v35 = vld [vmem:[%s2163_s5 + $0x170] ss:$8 sps:$4 sm:$0xff]  }
 0x21e   :  { %v605_v47 = vmul.f32 %v597_v44, %v546_v41  ;;  %v601_v48 = vmul.f32 %v550_v36, %v550_v36  ;;  %v185_v44 = vsub.s32 3, %v1829_v17 }
 0x21f   :  { %v606_v49 = vmul.f32 %v598_v45, %v548_v43  ;;  %v602_v50 = vmul.f32 %v552_v46, %v552_v46 }
 0x220   :  { %v613_v51 = vmul.f32 0.044715, %v605_v47  ;;  %v609_v52 = vmul.f32 %v601_v48, %v550_v36  ;;  %v186_v45 = vrot.slane %v2005_v38, %v185_v44  ;;  %v1570_v44 = vld [vmem:[%s2163_s5 + $0x1f0] ss:$8 sps:$4 sm:$0xff]  }
 0x221   :  { %v614_v53 = vmul.f32 0.044715, %v606_v49  ;;  %v610_v54 = vmul.f32 %v602_v50, %v552_v46 }
 0x222   :  { %v621_v55 = vadd.f32 %v613_v51, %v546_v41  ;;  %v617_v56 = vmul.f32 0.044715, %v609_v52 }
 0x223   :  { %v618_v57 = vmul.f32 0.044715, %v610_v54  ;;  %v622_v58 = vadd.f32 %v614_v53, %v548_v43 }
 0x224   :  { %v629_v59 = vmul.f32 0.7978846, %v621_v55  ;;  %v625_v60 = vadd.f32 %v617_v56, %v550_v36 }
 0x225   :  { %v626_v61 = vadd.f32 %v618_v57, %v552_v46  ;;  %v630_v62 = vmul.f32 0.7978846, %v622_v58 }
 0x226   :  { %1577 = vtanh.f32 %v629_v59  ;;  %v633_v63 = vmul.f32 0.7978846, %v625_v60  ;;  %v1552_v59 = vld [vmem:[%s2163_s5 + $0x190] ss:$8 sps:$4 sm:$0xff]  }
 0x227   :  { %v634_v0 = vmul.f32 0.7978846, %v626_v61  ;;  %1579 = vtanh.f32 %v630_v62  ;;  %v1557_v62 = vld [vmem:[%s2163_s5 + $0x1a4] ss:$8 sps:$4 sm:$0xff]  }
 0x228   :  { %1581 = vtanh.f32 %v633_v63 }
 0x229   :  { %1583 = vtanh.f32 %v634_v0 }
 0x230   :  { %v1578_v1 = vpop.eup %1577 }
 0x231   :  { %v1580_v6 = vpop.eup %1579  ;;  %v645_v7 = vadd.f32 1.0, %v1578_v1 }
 0x232   :  { %v1582_v8 = vpop.eup %1581  ;;  %v646_v9 = vadd.f32 1.0, %v1580_v6 }
 0x233   :  { %v1584_v10 = vpop.eup %1583  ;;  %v649_v11 = vadd.f32 1.0, %v1582_v8  ;;  %v653_v12 = vmul.f32 0.5, %v645_v7 }
 0x234   :  { %v650_v13 = vadd.f32 1.0, %v1584_v10  ;;  %v654_v14 = vmul.f32 0.5, %v646_v9  ;;  %v1555_v9 = vld [vmem:[%s2163_s5 + $0x1a0] ss:$8 sps:$4 sm:$0xff]  }
 0x235   :  { %v657_v15 = vmul.f32 0.5, %v649_v11  ;;  %v661_v20 = vmul.f32 %v653_v12, %v546_v41  ;;  %v1545_v41 = vld [vmem:[%s2163_s5 + $0x164] ss:$8 sps:$4 sm:$0xff]   ;;  %v1560_v12 = vld [vmem:[%s2163_s5 + $0x1b4] ss:$8 sps:$4 sm:$0xff]  }
 0x236   :  { %v658_v16 = vmul.f32 0.5, %v650_v13  ;;  %v662_v22 = vmul.f32 %v654_v14, %v548_v43  ;;  %v181_v43 = vsub.s32 2, %v1829_v17  ;;  %v1549_v17 = vld [vmem:[%s2163_s5 + $0x180] ss:$8 sps:$4 sm:$0xff]  }
 0x237   :  { %v665_v21 = vmul.f32 %v657_v15, %v550_v36 }
 0x238   :  { %v666_v23 = vmul.f32 %v658_v16, %v552_v46  ;;  %v182_v36 = vrot.slane %v2005_v38, %v181_v43  ;;  %v1551_v46 = vld [vmem:[%s2163_s5 + $0x184] ss:$8 sps:$4 sm:$0xff]   ;;  %v1554_v38 = vld [vmem:[%s2163_s5 + $0x194] ss:$8 sps:$4 sm:$0xff]  }
 0x239   :  { %v669_v24 = vpack.c.bf16 %v665_v21, %v661_v20  ;;  %v1558_v21 = vld [vmem:[%s2163_s5 + $0x1b0] ss:$8 sps:$4 sm:$0xff]  }
 0x23a   :  { %v670_v25 = vpack.c.bf16 %v666_v23, %v662_v22  ;;  %v1563_v23 = vld [vmem:[%s2163_s5 + $0x1c4] ss:$8 sps:$4 sm:$0xff]  }
 0x23c   :  { %1101 = vmatprep.mubr.bf16.mxu0 %v670_v25  ;;  %v1566_v25 = vld [vmem:[%s2163_s5 + $0x1d4] ss:$8 sps:$4 sm:$0xff]  }
 0x23d   :  { %1102 = vmatmul.mubr.bf16.vlgmr.msra.gmra.mrb[0].mxu0 %v669_v24  ;;  %v1561_v24 = vld [vmem:[%s2163_s5 + $0x1c0] ss:$8 sps:$4 sm:$0xff]  }
 0x23e   :  { %1113 = vmatpush1.bf16.msra.mxu0 %v1525_v26  ;;  %v1564_v26 = vld [vmem:[%s2163_s5 + $0x1d0] ss:$8 sps:$4 sm:$0xff]  }
 0x23f   :  { %1114 = vmatprep.subr.bf16.mxu0 %v1530_v27  ;;  %v1569_v27 = vld [vmem:[%s2163_s5 + $0x1e4] ss:$8 sps:$4 sm:$0xff]  }
 0x242   :  { %1115 = vmatpush1.bf16.msra.mxu0 %v1528_v28 }
 0x243   :  { %1116 = vmatprep.subr.bf16.mxu0 %v1533_v31 }
 0x246   :  { %1117 = vmatpush1.bf16.msra.mxu0 %v1531_v32 }
 0x247   :  { %1118 = vmatprep.subr.bf16.mxu0 %v1536_v33 }
 0x24a   :  { %1119 = vmatpush1.bf16.msra.mxu0 %v1534_v34  ;;  %v1567_v34 = vld [vmem:[%s2163_s5 + $0x1e0] ss:$8 sps:$4 sm:$0xff]  }
 0x24b   :  { %1120 = vmatprep.subr.bf16.mxu0 %v1539_v37 }
 0x24e   :  { %1121 = vmatpush1.bf16.msra.mxu0 %v1537_v39 }
 0x24f   :  { %1122 = vmatprep.subr.bf16.mxu0 %v1542_v30 }
 0x252   :  { %1123 = vmatpush1.bf16.msra.mxu0 %v1540_v40 }
 0x253   :  { %1124 = vmatprep.subr.bf16.mxu0 %v1545_v41  ;;  %v1572_v41 = vld [vmem:[%s2163_s5 + $0x1f4] ss:$8 sps:$4 sm:$0xff]  }
 0x256   :  { %1125 = vmatpush1.bf16.msra.mxu0 %v1543_v42 }
 0x257   :  { %1126 = vmatprep.subr.bf16.mxu0 %v1548_v29 }
 0x259   :  { %v588_v47 = vpop.f32.mrb[4].mxu1 }
 0x25a   :  { %v2063_v48 = vadd.f32 %v588_v47, %v182_v36  ;;  %v590_v49 = vpop.f32.mrb[5].mxu1  ;;  %1127 = vmatpush1.bf16.msra.mxu0 %v1546_v35 }
 0x25b   :  { %v2068_v50 = vadd.f32 %v590_v49, %v186_v45  ;;  %v592_v51 = vpop.f32.mrb[6].mxu1  ;;  %1128 = vmatprep.subr.bf16.mxu0 %v1551_v46 }
 0x25c   :  { %v599_v52 = vmul.f32 %v2063_v48, %v2063_v48  ;;  %v2075_v53 = vadd.f32 %v592_v51, %v182_v36  ;;  %v594_v54 = vpop.f32.mrb[7].mxu1  ;;  %v737_v51 = vld [vmem:[%s2167_s6] sm:$0x3] }
 0x25d   :  { %v600_v55 = vmul.f32 %v2068_v50, %v2068_v50  ;;  %v2079_v56 = vadd.f32 %v594_v54, %v186_v45 }
 0x25e   :  { %v607_v57 = vmul.f32 %v599_v52, %v2063_v48  ;;  %v603_v58 = vmul.f32 %v2075_v53, %v2075_v53  ;;  %1129 = vmatpush1.bf16.msra.mxu0 %v1549_v17 }
 0x25f   :  { %v608_v60 = vmul.f32 %v600_v55, %v2068_v50  ;;  %v604_v61 = vmul.f32 %v2079_v56, %v2079_v56  ;;  %1130 = vmatprep.subr.bf16.mxu0 %v1554_v38  ;;  %v742_v38 = vrot.slane %v737_v51, %v1832_v18 }
 0x260   :  { %v615_v63 = vmul.f32 0.044715, %v607_v57  ;;  %v611_v0 = vmul.f32 %v603_v58, %v2075_v53 }
 0x261   :  { %v616_v1 = vmul.f32 0.044715, %v608_v60  ;;  %v612_v6 = vmul.f32 %v604_v61, %v2079_v56 }
 0x262   :  { %v623_v7 = vadd.f32 %v615_v63, %v2063_v48  ;;  %v619_v8 = vmul.f32 0.044715, %v611_v0  ;;  %1131 = vmatpush1.bf16.msra.mxu0 %v1552_v59 }
 0x263   :  { %v624_v10 = vadd.f32 %v616_v1, %v2068_v50  ;;  %v620_v11 = vmul.f32 0.044715, %v612_v6  ;;  %1132 = vmatprep.subr.bf16.mxu0 %v1557_v62 }
 0x264   :  { %v631_v13 = vmul.f32 0.7978846, %v623_v7  ;;  %v627_v14 = vadd.f32 %v619_v8, %v2075_v53 }
 0x265   :  { %v632_v15 = vmul.f32 0.7978846, %v624_v10  ;;  %v628_v16 = vadd.f32 %v620_v11, %v2079_v56 }
 0x266   :  { %1585 = vtanh.f32 %v631_v13  ;;  %v635_v20 = vmul.f32 0.7978846, %v627_v14  ;;  %1133 = vmatpush1.bf16.msra.mxu0 %v1555_v9 }
 0x267   :  { %1587 = vtanh.f32 %v632_v15  ;;  %v636_v22 = vmul.f32 0.7978846, %v628_v16  ;;  %1134 = vmatprep.subr.bf16.mxu0 %v1560_v12 }
 0x268   :  { %1589 = vtanh.f32 %v635_v20 }
 0x269   :  { %1591 = vtanh.f32 %v636_v22 }
 0x26a   :  { %1135 = vmatpush1.bf16.msra.mxu0 %v1558_v21 }
 0x26b   :  { %1136 = vmatprep.subr.bf16.mxu0 %v1563_v23 }
 0x26e   :  { %1137 = vmatpush1.bf16.msra.mxu0 %v1561_v24  ;;  %v1159_v24 = vld [vmem:[%s2168_s7] sm:$0x3] }
 0x26f   :  { %1138 = vmatprep.subr.bf16.mxu0 %v1566_v25  ;;  %v1160_v25 = vld [vmem:[%s2169_s8] sm:$0x3] }
 0x270   :  { %v1586_v28 = vpop.eup %1585 }
 0x271   :  { %v1588_v31 = vpop.eup %1587  ;;  %v647_v32 = vadd.f32 1.0, %v1586_v28 }
 0x272   :  { %v1590_v33 = vpop.eup %1589  ;;  %1139 = vmatpush1.bf16.msra.mxu0 %v1564_v26  ;;  %v648_v37 = vadd.f32 1.0, %v1588_v31  ;;  %v1197_v26 = vrot.slane %v1159_v24, %v1832_v18  ;;  %v1212_v31 = vrot.slane %v1160_v25, %v1832_v18 }
 0x273   :  { %v1592_v39 = vpop.eup %1591  ;;  %v655_v30 = vmul.f32 0.5, %v647_v32  ;;  %v651_v40 = vadd.f32 1.0, %v1590_v33  ;;  %1140 = vmatprep.subr.bf16.mxu0 %v1569_v27  ;;  %v1201_v27 = vrot.slane %v1159_v24, %v1835_v19  ;;  %v1216_v32 = vrot.slane %v1160_v25, %v1835_v19 }
 0x274   :  { %v652_v42 = vadd.f32 1.0, %v1592_v39  ;;  %v656_v43 = vmul.f32 0.5, %v648_v37 }
 0x275   :  { %v659_v29 = vmul.f32 0.5, %v651_v40  ;;  %v663_v35 = vmul.f32 %v655_v30, %v2063_v48  ;;  %v746_v48 = vrot.slane %v737_v51, %v1835_v19 }
 0x276   :  { %1141 = vmatpush1.bf16.msra.mxu0 %v1567_v34  ;;  %v660_v36 = vmul.f32 0.5, %v652_v42  ;;  %v664_v46 = vmul.f32 %v656_v43, %v2068_v50 }
 0x277   :  { %v667_v45 = vmul.f32 %v659_v29, %v2075_v53  ;;  %1142 = vmatprep.subr.bf16.mxu0 %v1572_v41 }
 0x278   :  { %v668_v47 = vmul.f32 %v660_v36, %v2079_v56 }
 0x279   :  { %v671_v49 = vpack.c.bf16 %v667_v45, %v663_v35 }
 0x27a   :  { %1143 = vmatpush1.bf16.msra.mxu0 %v1570_v44  ;;  %v672_v17 = vpack.c.bf16 %v668_v47, %v664_v46 }
 0x27c   :  { %1144 = vmatprep.mubr.bf16.mxu0 %v672_v17 }
 0x27d   :  { %1145 = vmatmul.mubr.bf16.vlgmr.msra.gmra.mrb[0].mxu0 %v671_v49 }
 0x350   :  { %v1146_v52 = vpop.f32.mrb[0].mxu0 }
 0x351   :  { %v1373_v53 = vadd.f32 %v1146_v52, %v742_v38  ;;  %v1148_v54 = vpop.f32.mrb[1].mxu0 }
 0x352   :  { %v1374_v55 = vadd.f32 %v1148_v54, %v746_v48  ;;  %v1150_v50 = vpop.f32.mrb[2].mxu0 }
 0x353   :  { %v1155_v56 = vadd.f32 %v1373_v53, %v1653_v2  ;;  %v1375_v57 = vadd.f32 %v1150_v50, %v742_v38  ;;  %v1152_v58 = vpop.f32.mrb[3].mxu0 }
 0x354   :  { %v1156_v59 = vadd.f32 %v1374_v55, %v1655_v3  ;;  %v1376_v60 = vadd.f32 %v1152_v58, %v746_v48 }
 0x355   :  { %v1157_v61 = vadd.f32 %v1375_v57, %v1657_v4 }
 0x356   :  { %v1158_v62 = vadd.f32 %v1376_v60, %v1659_v5  ;;  %v1161_v63 = vadd.f32 %v1156_v59, %v1155_v56 }
 0x358   :  { %1162 = vadd.xlane.f32.xlu0 %v1161_v63  ;;  %v1164_v0 = vadd.f32 %v1158_v62, %v1157_v61 }
 0x35a   :  { %1165 = vadd.xlane.f32.xlu1 %v1164_v0 }
 0x3e5   :  { %v1163_v1 = vpop.xlane.xlu0 %1162 }
 0x3e6   :  { %v1167_v6 = vmul.f32 0.00390625, %v1163_v1 }
 0x3e7   :  { %v1166_v7 = vpop.xlane.xlu1 %1165 }
 0x3e8   :  { %v1169_v8 = vsub.f32 %v1155_v56, %v1167_v6  ;;  %v1170_v9 = vsub.f32 %v1156_v59, %v1167_v6  ;;  %v1168_v10 = vmul.f32 0.00390625, %v1166_v7 }
 0x3ea   :  { %v1171_v2 = vsub.f32 %v1157_v61, %v1168_v10  ;;  %v1172_v11 = vsub.f32 %v1158_v62, %v1168_v10  ;;  %v1173_v12 = vmul.f32 %v1169_v8, %v1169_v8  ;;  %v1174_v13 = vmul.f32 %v1170_v9, %v1170_v9 }
 0x3ec   :  { %v1177_v3 = vadd.f32 %v1174_v13, %v1173_v12  ;;  %v1175_v14 = vmul.f32 %v1171_v2, %v1171_v2  ;;  %v1176_v15 = vmul.f32 %v1172_v11, %v1172_v11 }
 0x3ee   :  { %1178 = vadd.xlane.f32.xlu0 %v1177_v3  ;;  %v1180_v4 = vadd.f32 %v1176_v15, %v1175_v14 }
 0x3f0   :  { %1181 = vadd.xlane.f32.xlu1 %v1180_v4 }
 0x47b   :  { %v1179_v5 = vpop.xlane.xlu0 %1178 }
 0x47c   :  { %v1183_v16 = vmul.f32 0.00390625, %v1179_v5 }
 0x47d   :  { %v1182_v20 = vpop.xlane.xlu1 %1181 }
 0x47e   :  { %v1185_v21 = vadd.f32 1e-05, %v1183_v16  ;;  %v1184_v22 = vmul.f32 0.00390625, %v1182_v20 }
 0x480   :  { %1593 = vrsqrt.f32 %v1185_v21  ;;  %v1186_v23 = vadd.f32 1e-05, %v1184_v22 }
 0x482   :  { %1595 = vrsqrt.f32 %v1186_v23 }
 0x48a   :  { %v1594_v28 = vpop.eup %1593 }
 0x48b   :  { %v1189_v33 = vmul.f32 %v1594_v28, %v1169_v8  ;;  %v1190_v34 = vmul.f32 %v1594_v28, %v1170_v9 }
 0x48c   :  { %v1596_v37 = vpop.eup %1595 }
 0x48d   :  { %v1204_v39 = vmul.f32 %v1197_v26, %v1189_v33  ;;  %v1205_v30 = vmul.f32 %v1201_v27, %v1190_v34  ;;  %v1191_v40 = vmul.f32 %v1596_v37, %v1171_v2  ;;  %v1192_v41 = vmul.f32 %v1596_v37, %v1172_v11 }
 0x48f   :  { %v1219_v42 = vadd.f32 %v1212_v31, %v1204_v39  ;;  %v1220_v43 = vadd.f32 %v1216_v32, %v1205_v30  ;;  %v1206_v29 = vmul.f32 %v1197_v26, %v1191_v40  ;;  %v1207_v44 = vmul.f32 %v1201_v27, %v1192_v41 }
 0x491   :  { %v1371_v36 = vpack.c.bf16 %v1220_v43, %v1219_v42  ;;  %v1221_v35 = vadd.f32 %v1212_v31, %v1206_v29  ;;  %v1222_v45 = vadd.f32 %v1216_v32, %v1207_v44 }
 0x493   :  { %1235 = vst [vmem:[%s2170_s9] sm:$0xff] %v1371_v36  ;;  %v1372_v18 = vpack.c.bf16 %v1222_v45, %v1221_v35 }
 0x495   :  { %1236 = vst [vmem:[%s2170_s9 + $0x8] sm:$0xff] %v1372_v18 }

// kernel: mbart_forward.8
= control target key start
LH: loop header
LB: loop body
LE: loop exit
PB: predicated region body
PF: predicated region fallthrough
CT: control target
= control target key end

     0   :  { %s2267_s21 = smov 0   ;;  %s2757_s0 = inlined_call_operand.vmem [shape: bf16[2,8,256], index: 0, kind: input, shape index: {}]   ;;  %s2758_s1 = inlined_call_operand.vmem [shape: f32[2,1,8], index: 1, kind: input, shape index: {}]   ;;  %s2759_s2 = inlined_call_operand.vmem [shape: f32[1,256], index: 2, kind: input, shape index: {}]   ;;  %s2760_s3 = inlined_call_operand.vmem [shape: f32[1,256], index: 3, kind: input, shape index: {}]   ;;  %s2761_s4 = inlined_call_operand.vmem [shape: f32[1,256], index: 4, kind: input, shape index: {}]   ;;  %s2762_s5 = inlined_call_operand.vmem [shape: f32[1,256], index: 5, kind: input, shape index: {}]   ;;  %s2763_s6 = inlined_call_operand.vmem [shape: bf16[256,256], index: 6, kind: input, shape index: {}]   ;;  %s2764_s7 = inlined_call_operand.vmem [shape: f32[1,256], index: 7, kind: input, shape index: {}]   ;;  %s2765_s8 = inlined_call_operand.vmem [shape: bf16[256,512], index: 8, kind: input, shape index: {}]   ;;  %s2766_s9 = inlined_call_operand.vmem [shape: f32[1,512], index: 9, kind: input, shape index: {}]   ;;  %s2767_s10 = inlined_call_operand.vmem [shape: bf16[256,256], index: 10, kind: input, shape index: {}]   ;;  %s2768_s11 = inlined_call_operand.vmem [shape: f32[1,256], index: 11, kind: input, shape index: {}]   ;;  %s2769_s12 = inlined_call_operand.vmem [shape: bf16[2,8,256], index: 12, kind: output, shape index: {}]  }
   0x1 LB: > { %s1798_s22 = sadd.s32 4294967295, %s2197_s21   ;;  %p1802_p0 = scmp.ge.s32.totalorder %s2197_s21, 1  ;;  %s2197_s21 = sphi %s2267_s21, %s22_s21  }
   0x2   : > { %p370_p1 = scmp.lt.s32.totalorder %s2197_s21, 3 }
   0x4   : > { %p371_p2 = pnand %p1802_p0, %p370_p1 }
   0x5   : > { %p415_p3 = scmp.lt.s32.totalorder (!%p371_p2), %s1798_s22, 1  ;;  %v452_v13 = vlaneseq (!%p371_p2)  ;;  %v432_v18 = vld [vmem:[%s2759_s2] sm:$0x3] (!%p371_p2)  ;;  %v1987_v32 = vld [vmem:[%s2763_s6 + $0x4] ss:$8 sps:$4 sm:$0xff] (!%p371_p2)   ;;  %vm2200_vm0 = vmmov (!%p371_p2), 0  }
   0x6   : > { %374 = sbr.rel (%p371_p2) target bundleno = 1841 (0x731), region = 68  ;;  %v433_v19 = vld [vmem:[%s2760_s3] sm:$0x3] (!%p371_p2)  ;;  %v1990_v34 = vld [vmem:[%s2765_s8 + $0x4] ss:$16 sps:$4 sm:$0xff] (!%p371_p2)   ;;  %727 = vmatprep.subr.bf16.mxu0 (!%p371_p2), %v1987_v32  ;;  %vm1331_vm1 = vcmask (!%p371_p2), 1043456  }
   0x7   : > { %v2284_v15 = vshrl.u32 (!%p371_p2), %v452_v13, 7  ;;  %v1989_v33 = vld [vmem:[%s2763_s6] ss:$8 sps:$4 sm:$0xff] (!%p371_p2)   ;;  %v1993_v36 = vld [vmem:[%s2763_s6 + $0x14] ss:$8 sps:$4 sm:$0xff] (!%p371_p2)   ;;  %1176 = vmatprep.subr.bf16.mxu1 (!%p371_p2), %v1990_v34  ;;  %vm1314_vm3 = vcmask (!%p371_p2), 64512  }
   0x8   : > { %v1992_v35 = vld [vmem:[%s2765_s8] ss:$16 sps:$4 sm:$0xff] (!%p371_p2)   ;;  %v1996_v37 = vld [vmem:[%s2765_s8 + $0x24] ss:$16 sps:$4 sm:$0xff] (!%p371_p2)   ;;  %728 = vmatpush1.bf16.msra.mxu0 (!%p371_p2), %v1989_v33 }
   0x9   : > { %v2287_v16 = vsub.s32 (!%p371_p2), 0, %v2284_v15  ;;  %v2290_v17 = vsub.s32 (!%p371_p2), 1, %v2284_v15  ;;  %1177 = vmatpush1.bf16.msra.mxu1 (!%p371_p2), %v1992_v35  ;;  %v1995_v38 = vld [vmem:[%s2763_s6 + $0x10] ss:$8 sps:$4 sm:$0xff] (!%p371_p2)   ;;  %729 = vmatprep.subr.bf16.mxu0 (!%p371_p2), %v1993_v36  ;;  %v1999_v40 = vld [vmem:[%s2763_s6 + $0x24] ss:$8 sps:$4 sm:$0xff] (!%p371_p2)  }
   0xa   : > { %v1998_v39 = vld [vmem:[%s2765_s8 + $0x20] ss:$16 sps:$4 sm:$0xff] (!%p371_p2)   ;;  %1178 = vmatprep.subr.bf16.mxu1 (!%p371_p2), %v1996_v37  ;;  %v2002_v41 = vld [vmem:[%s2765_s8 + $0x44] ss:$16 sps:$4 sm:$0xff] (!%p371_p2)  }
   0xb   : > { %v455_v20 = vrot.slane (!%p371_p2), %v432_v18, %v2287_v16  ;;  %v459_v21 = vrot.slane (!%p371_p2), %v432_v18, %v2290_v17  ;;  %v468_v25 = vrot.slane (!%p371_p2), %v433_v19, %v2287_v16  ;;  %v472_v26 = vrot.slane (!%p371_p2), %v433_v19, %v2290_v17  ;;  %v2001_v42 = vld [vmem:[%s2763_s6 + $0x20] ss:$8 sps:$4 sm:$0xff] (!%p371_p2)   ;;  %v2005_v44 = vld [vmem:[%s2763_s6 + $0x34] ss:$8 sps:$4 sm:$0xff] (!%p371_p2)   ;;  %v2007_v46 = vld [vmem:[%s2763_s6 + $0x30] ss:$8 sps:$4 sm:$0xff] (!%p371_p2)  }
   0xc   : > { %730 = vmatpush1.bf16.msra.mxu0 (!%p371_p2), %v1995_v38  ;;  %v2004_v43 = vld [vmem:[%s2765_s8 + $0x40] ss:$16 sps:$4 sm:$0xff] (!%p371_p2)   ;;  %v2008_v45 = vld [vmem:[%s2765_s8 + $0x64] ss:$16 sps:$4 sm:$0xff] (!%p371_p2)  }
   0xd   : > { %s2771_s22 = smov (!%p415_p3, %s1798_s22), 1  ;;  %1179 = vmatpush1.bf16.msra.mxu1 %v1998_v39  ;;  %731 = vmatprep.subr.bf16.mxu0 %v1999_v40  ;;  %v2010_v47 = vld [vmem:[%s2765_s8 + $0x60] ss:$16 sps:$4 sm:$0xff]   ;;  %v2011_v48 = vld [vmem:[%s2763_s6 + $0x44] ss:$8 sps:$4 sm:$0xff]  }
   0xe   : > { %s1941_s23 = sshll.u32 %s2771_s22, 3  ;;  %1180 = vmatprep.subr.bf16.mxu1 %v2002_v41  ;;  %v2014_v49 = vld [vmem:[%s2765_s8 + $0x84] ss:$16 sps:$4 sm:$0xff]   ;;  %v2013_v50 = vld [vmem:[%s2763_s6 + $0x40] ss:$8 sps:$4 sm:$0xff]   ;;  %s422_s20 = scalar_lea.vmem %s2758_s1, %s2771_s22 }
   0xf   : > { %s419_s26 = scalar_lea.vmem %s2757_s0, %s1941_s23  ;;  %v2016_v51 = vld [vmem:[%s2765_s8 + $0x80] ss:$16 sps:$4 sm:$0xff]   ;;  %v2017_v52 = vld [vmem:[%s2763_s6 + $0x54] ss:$8 sps:$4 sm:$0xff]   ;;  %v2023_v56 = vld [vmem:[%s2763_s6 + $0x64] ss:$8 sps:$4 sm:$0xff]   ;;  %s427_s14 = scalar_lea.vmem %s2769_s12, %s1941_s23 }
  0x10   : > { %v429_v0 = vld [vmem:[%s419_s26] sm:$0xff]  ;;  %732 = vmatpush1.bf16.msra.mxu0 %v2001_v42  ;;  %v2019_v54 = vld [vmem:[%s2763_s6 + $0x50] ss:$8 sps:$4 sm:$0xff]   ;;  %v2029_v60 = vld [vmem:[%s2763_s6 + $0x74] ss:$8 sps:$4 sm:$0xff]  }
  0x11   : > { %v430_v1 = vunpack.c.l.bf16 %v429_v0  ;;  %v431_v2 = vunpack.c.h.bf16 %v429_v0  ;;  %1181 = vmatpush1.bf16.msra.mxu1 %v2004_v43  ;;  %733 = vmatprep.subr.bf16.mxu0 %v2005_v44  ;;  %v2020_v53 = vld [vmem:[%s2765_s8 + $0xa4] ss:$16 sps:$4 sm:$0xff]   ;;  %v2022_v55 = vld [vmem:[%s2765_s8 + $0xa0] ss:$16 sps:$4 sm:$0xff]  }
  0x12   : > { %1182 = vmatprep.subr.bf16.mxu1 %v2008_v45  ;;  %v2026_v57 = vld [vmem:[%s2765_s8 + $0xc4] ss:$16 sps:$4 sm:$0xff]   ;;  %v2025_v58 = vld [vmem:[%s2763_s6 + $0x60] ss:$8 sps:$4 sm:$0xff]   ;;  %v2031_v62 = vld [vmem:[%s2763_s6 + $0x70] ss:$8 sps:$4 sm:$0xff]  }
  0x13   : > { %v434_v3 = vadd.f32 %v431_v2, %v430_v1  ;;  %v2028_v59 = vld [vmem:[%s2765_s8 + $0xc0] ss:$16 sps:$4 sm:$0xff]   ;;  %v2032_v61 = vld [vmem:[%s2765_s8 + $0xe4] ss:$16 sps:$4 sm:$0xff]   ;;  %v2085_v45 = vld [vmem:[%s2765_s8 + $0xc] ss:$16 sps:$4 sm:$0xff]  }
  0x14   : > { %734 = vmatpush1.bf16.msra.mxu0 %v2007_v46  ;;  %v2034_v63 = vld [vmem:[%s2765_s8 + $0xe0] ss:$16 sps:$4 sm:$0xff]   ;;  %v2035_v0 = vld [vmem:[%s2763_s6 + $0x84] ss:$8 sps:$4 sm:$0xff]   ;;  %v2065_v33 = vld [vmem:[%s2763_s6 + $0xd4] ss:$8 sps:$4 sm:$0xff]  }
  0x15   : > { %435 = vadd.xlane.f32.xlu0 %v434_v3  ;;  %1183 = vmatpush1.bf16.msra.mxu1 %v2010_v47  ;;  %v2040_v3 = vld [vmem:[%s2765_s8 + $0x100] ss:$16 sps:$4 sm:$0xff]   ;;  %v2068_v34 = vld [vmem:[%s2765_s8 + $0x1a4] ss:$16 sps:$4 sm:$0xff]  }
  0x16   : > { %735 = vmatprep.subr.bf16.mxu0 %v2011_v48  ;;  %1184 = vmatprep.subr.bf16.mxu1 %v2014_v49  ;;  %v2064_v32 = vld [vmem:[%s2765_s8 + $0x180] ss:$16 sps:$4 sm:$0xff]   ;;  %v2071_v37 = vld [vmem:[%s2763_s6 + $0xe4] ss:$8 sps:$4 sm:$0xff]   ;;  %v2077_v41 = vld [vmem:[%s2763_s6 + $0xf4] ss:$8 sps:$4 sm:$0xff]  }
  0x17   : > { %v2067_v35 = vld [vmem:[%s2763_s6 + $0xd0] ss:$8 sps:$4 sm:$0xff]   ;;  %v2074_v38 = vld [vmem:[%s2765_s8 + $0x1c4] ss:$16 sps:$4 sm:$0xff]   ;;  %v2073_v39 = vld [vmem:[%s2763_s6 + $0xe0] ss:$8 sps:$4 sm:$0xff]  }
  0x18   : > { %736 = vmatpush1.bf16.msra.mxu0 %v2013_v50  ;;  %v2070_v36 = vld [vmem:[%s2765_s8 + $0x1a0] ss:$16 sps:$4 sm:$0xff]   ;;  %v2080_v42 = vld [vmem:[%s2765_s8 + $0x1e4] ss:$16 sps:$4 sm:$0xff]  }
  0x19   : > { %1185 = vmatpush1.bf16.msra.mxu1 %v2016_v51  ;;  %737 = vmatprep.subr.bf16.mxu0 %v2017_v52  ;;  %v2076_v40 = vld [vmem:[%s2765_s8 + $0x1c0] ss:$16 sps:$4 sm:$0xff]  }
  0x1a   : > { %1186 = vmatprep.subr.bf16.mxu1 %v2020_v53  ;;  %v2079_v43 = vld [vmem:[%s2763_s6 + $0xf0] ss:$8 sps:$4 sm:$0xff]   ;;  %v477_v49 = vld [vmem:[%s2761_s4] sm:$0x3] }
  0x1b   : > { %v2082_v44 = vld [vmem:[%s2765_s8 + $0x1e0] ss:$16 sps:$4 sm:$0xff]   ;;  %v503_v51 = vrot.slane %v477_v49, %v2290_v17  ;;  %v499_v52 = vrot.slane %v477_v49, %v2287_v16 }
  0x1c   : > { %738 = vmatpush1.bf16.msra.mxu0 %v2019_v54  ;;  %v478_v50 = vld [vmem:[%s2762_s5] sm:$0x3] }
  0x1d   : > { %1187 = vmatpush1.bf16.msra.mxu1 %v2022_v55  ;;  %739 = vmatprep.subr.bf16.mxu0 %v2023_v56  ;;  %v516_v55 = vrot.slane %v478_v50, %v2290_v17 }
  0x1e   : > { %1188 = vmatprep.subr.bf16.mxu1 %v2026_v57  ;;  %v512_v57 = vrot.slane %v478_v50, %v2287_v16 }
  0x20   : > { %740 = vmatpush1.bf16.msra.mxu0 %v2025_v58 }
  0x21   : > { %1189 = vmatpush1.bf16.msra.mxu1 %v2028_v59  ;;  %741 = vmatprep.subr.bf16.mxu0 %v2029_v60 }
  0x22   : > { %1190 = vmatprep.subr.bf16.mxu1 %v2032_v61 }
  0x24   : > { %742 = vmatpush1.bf16.msra.mxu0 %v2031_v62 }
  0x25   : > { %1191 = vmatpush1.bf16.msra.mxu1 %v2034_v63  ;;  %743 = vmatprep.subr.bf16.mxu0 %v2035_v0  ;;  %v2083_v63 = vld [vmem:[%s2765_s8 + $0x8] ss:$16 sps:$4 sm:$0xff]  }
  0xa2   : > { %v436_v4 = vpop.xlane.xlu0 %435 }
  0xa3   : > { %v438_v5 = vmul.f32 0.00390625, %v436_v4  ;;  %v2041_v4 = vld [vmem:[%s2763_s6 + $0x94] ss:$8 sps:$4 sm:$0xff]  }
  0xa5   : > { %v439_v6 = vsub.f32 %v430_v1, %v438_v5  ;;  %v440_v7 = vsub.f32 %v431_v2, %v438_v5  ;;  %v2038_v1 = vld [vmem:[%s2765_s8 + $0x104] ss:$16 sps:$4 sm:$0xff]   ;;  %v2037_v2 = vld [vmem:[%s2763_s6 + $0x80] ss:$8 sps:$4 sm:$0xff]  }
  0xa6   : > { %1192 = vmatprep.subr.bf16.mxu1 %v2038_v1  ;;  %v2044_v5 = vld [vmem:[%s2765_s8 + $0x124] ss:$16 sps:$4 sm:$0xff]   ;;  %744 = vmatpush1.bf16.msra.mxu0 %v2037_v2  ;;  %v2088_v1 = vld [vmem:[%s2765_s8 + $0x2c] ss:$16 sps:$4 sm:$0xff]   ;;  %v2086_v2 = vld [vmem:[%s2765_s8 + $0x28] ss:$16 sps:$4 sm:$0xff]  }
  0xa7   : > { %v441_v8 = vmul.f32 %v439_v6, %v439_v6  ;;  %v442_v9 = vmul.f32 %v440_v7, %v440_v7  ;;  %1193 = vmatpush1.bf16.msra.mxu1 %v2040_v3  ;;  %745 = vmatprep.subr.bf16.mxu0 %v2041_v4  ;;  %v2091_v3 = vld [vmem:[%s2765_s8 + $0x4c] ss:$16 sps:$4 sm:$0xff]   ;;  %v2089_v4 = vld [vmem:[%s2765_s8 + $0x48] ss:$16 sps:$4 sm:$0xff]  }
  0xa8   : > { %1194 = vmatprep.subr.bf16.mxu1 %v2044_v5  ;;  %v2094_v5 = vld [vmem:[%s2765_s8 + $0x6c] ss:$16 sps:$4 sm:$0xff]  }
  0xa9   : > { %v443_v10 = vadd.f32 %v442_v9, %v441_v8  ;;  %v2047_v8 = vld [vmem:[%s2763_s6 + $0xa4] ss:$8 sps:$4 sm:$0xff]  }
  0xab   : > { %444 = vadd.xlane.f32.xlu0 %v443_v10 }
 0x138   : > { %v445_v11 = vpop.xlane.xlu0 %444 }
 0x139   : > { %v446_v12 = vmul.f32 0.00390625, %v445_v11 }
 0x13b   : > { %v447_v14 = vadd.f32 1e-05, %v446_v12 }
 0x13d   : > { %2179 = vrsqrt.f32 %v447_v14 }
 0x147   : > { %v2180_v22 = vpop.eup %2179 }
 0x148   : > { %v449_v23 = vmul.f32 %v2180_v22, %v439_v6  ;;  %v450_v24 = vmul.f32 %v2180_v22, %v440_v7  ;;  %v2043_v6 = vld [vmem:[%s2763_s6 + $0x90] ss:$8 sps:$4 sm:$0xff]  }
 0x149   : > { %v2046_v7 = vld [vmem:[%s2765_s8 + $0x120] ss:$16 sps:$4 sm:$0xff]   ;;  %746 = vmatpush1.bf16.msra.mxu0 %v2043_v6  ;;  %v2092_v6 = vld [vmem:[%s2765_s8 + $0x68] ss:$16 sps:$4 sm:$0xff]  }
 0x14a   : > { %v462_v27 = vmul.f32 %v455_v20, %v449_v23  ;;  %v463_v28 = vmul.f32 %v459_v21, %v450_v24  ;;  %1195 = vmatpush1.bf16.msra.mxu1 %v2046_v7  ;;  %747 = vmatprep.subr.bf16.mxu0 %v2047_v8  ;;  %v2049_v20 = vld [vmem:[%s2763_s6 + $0xa0] ss:$8 sps:$4 sm:$0xff]   ;;  %v2050_v21 = vld [vmem:[%s2765_s8 + $0x144] ss:$16 sps:$4 sm:$0xff]   ;;  %v2055_v24 = vld [vmem:[%s2763_s6 + $0xb0] ss:$8 sps:$4 sm:$0xff]  }
 0x14b   : > { %v2052_v22 = vld [vmem:[%s2765_s8 + $0x140] ss:$16 sps:$4 sm:$0xff]   ;;  %1196 = vmatprep.subr.bf16.mxu1 %v2050_v21  ;;  %v2053_v23 = vld [vmem:[%s2763_s6 + $0xb4] ss:$8 sps:$4 sm:$0xff]   ;;  %v2095_v8 = vld [vmem:[%s2765_s8 + $0x88] ss:$16 sps:$4 sm:$0xff]  }
 0x14c   : > { %v2302_v29 = vadd.f32 %v468_v25, %v462_v27  ;;  %v2304_v30 = vadd.f32 %v472_v26, %v463_v28  ;;  %v2056_v25 = vld [vmem:[%s2765_s8 + $0x164] ss:$16 sps:$4 sm:$0xff]   ;;  %v2058_v26 = vld [vmem:[%s2765_s8 + $0x160] ss:$16 sps:$4 sm:$0xff]   ;;  %v2097_v7 = vld [vmem:[%s2765_s8 + $0x8c] ss:$16 sps:$4 sm:$0xff]  }
 0x14d   : > { %748 = vmatpush1.bf16.msra.mxu0 %v2049_v20  ;;  %v2059_v27 = vld [vmem:[%s2763_s6 + $0xc4] ss:$8 sps:$4 sm:$0xff]   ;;  %v2061_v28 = vld [vmem:[%s2763_s6 + $0xc0] ss:$8 sps:$4 sm:$0xff]  }
 0x14e   : > { %v479_v31 = vadd.f32 %v2304_v30, %v2302_v29  ;;  %1197 = vmatpush1.bf16.msra.mxu1 %v2052_v22  ;;  %749 = vmatprep.subr.bf16.mxu0 %v2053_v23  ;;  %v2107_v20 = vld [vmem:[%s2765_s8 + $0x108] ss:$16 sps:$4 sm:$0xff]   ;;  %v2112_v21 = vld [vmem:[%s2765_s8 + $0x12c] ss:$16 sps:$4 sm:$0xff]  }
 0x14f   : > { %1198 = vmatprep.subr.bf16.mxu1 %v2056_v25  ;;  %v2110_v22 = vld [vmem:[%s2765_s8 + $0x128] ss:$16 sps:$4 sm:$0xff]   ;;  %v2115_v23 = vld [vmem:[%s2765_s8 + $0x14c] ss:$16 sps:$4 sm:$0xff]  }
 0x150   : > { %480 = vadd.xlane.f32.xlu1 %v479_v31  ;;  %v2062_v31 = vld [vmem:[%s2765_s8 + $0x184] ss:$16 sps:$4 sm:$0xff]   ;;  %v2118_v25 = vld [vmem:[%s2765_s8 + $0x16c] ss:$16 sps:$4 sm:$0xff]  }
 0x151   : > { %750 = vmatpush1.bf16.msra.mxu0 %v2055_v24  ;;  %v2113_v24 = vld [vmem:[%s2765_s8 + $0x148] ss:$16 sps:$4 sm:$0xff]  }
 0x152   : > { %1199 = vmatpush1.bf16.msra.mxu1 %v2058_v26  ;;  %751 = vmatprep.subr.bf16.mxu0 %v2059_v27  ;;  %v2116_v26 = vld [vmem:[%s2765_s8 + $0x168] ss:$16 sps:$4 sm:$0xff]   ;;  %v2121_v27 = vld [vmem:[%s2765_s8 + $0x18c] ss:$16 sps:$4 sm:$0xff]  }
 0x153   : > { %1200 = vmatprep.subr.bf16.mxu1 %v2062_v31  ;;  %v2124_v31 = vld [vmem:[%s2765_s8 + $0x1ac] ss:$16 sps:$4 sm:$0xff]  }
 0x155   : > { %752 = vmatpush1.bf16.msra.mxu0 %v2061_v28  ;;  %v2119_v28 = vld [vmem:[%s2765_s8 + $0x188] ss:$16 sps:$4 sm:$0xff]  }
 0x156   : > { %1201 = vmatpush1.bf16.msra.mxu1 %v2064_v32  ;;  %753 = vmatprep.subr.bf16.mxu0 %v2065_v33  ;;  %v2122_v32 = vld [vmem:[%s2765_s8 + $0x1a8] ss:$16 sps:$4 sm:$0xff]   ;;  %v2127_v33 = vld [vmem:[%s2765_s8 + $0x1cc] ss:$16 sps:$4 sm:$0xff]  }
 0x157   : > { %1202 = vmatprep.subr.bf16.mxu1 %v2068_v34  ;;  %v2125_v34 = vld [vmem:[%s2765_s8 + $0x1c8] ss:$16 sps:$4 sm:$0xff]  }
 0x159   : > { %754 = vmatpush1.bf16.msra.mxu0 %v2067_v35  ;;  %v2130_v35 = vld [vmem:[%s2765_s8 + $0x1ec] ss:$16 sps:$4 sm:$0xff]  }
 0x15a   : > { %1203 = vmatpush1.bf16.msra.mxu1 %v2070_v36  ;;  %755 = vmatprep.subr.bf16.mxu0 %v2071_v37  ;;  %v2128_v36 = vld [vmem:[%s2765_s8 + $0x1e8] ss:$16 sps:$4 sm:$0xff]   ;;  %v2199_v37 = vmov 0.0  }
 0x15b   : > { %1204 = vmatprep.subr.bf16.mxu1 %v2074_v38  ;;  %v834_v38 = vld [vmem:[%s2766_s9] sm:$0xf] }
 0x15d   : > { %756 = vmatpush1.bf16.msra.mxu0 %v2073_v39  ;;  %v555_v39 = vld [vmem:[%s2764_s7] sm:$0x3] }
 0x15e   : > { %1205 = vmatpush1.bf16.msra.mxu1 %v2076_v40  ;;  %757 = vmatprep.subr.bf16.mxu0 %v2077_v41  ;;  %v839_v40 = vrot.slane %v834_v38, %v2287_v16  ;;  %v560_v41 = vrot.slane %v555_v39, %v2287_v16 }
 0x15f   : > { %1206 = vmatprep.subr.bf16.mxu1 %v2080_v42  ;;  %v843_v42 = vrot.slane %v834_v38, %v2290_v17 }
 0x161   : > { %758 = vmatpush1.bf16.msra.mxu0 %v2079_v43  ;;  %v564_v43 = vrot.slane %v555_v39, %v2290_v17 }
 0x162   : > { %1207 = vmatpush1.bf16.msra.mxu1 %v2082_v44  ;;  %1217 = vmatprep.subr.bf16.mxu0 %v2085_v45 }
 0x163   : > { %1964 = vmatprep.subr.bf16.mxu1 %v2199_v37 }
 0x1dd   : > { %v481_v9 = vpop.xlane.xlu1 %480 }
 0x1de   : > { %v482_v10 = vmul.f32 0.00390625, %v481_v9  ;;  %v2100_v9 = vld [vmem:[%s2765_s8 + $0xac] ss:$16 sps:$4 sm:$0xff]  }
 0x1e0   : > { %v2432_v11 = vsub.f32 %v2302_v29, %v482_v10  ;;  %v484_v12 = vsub.f32 %v2304_v30, %v482_v10  ;;  %v2098_v10 = vld [vmem:[%s2765_s8 + $0xa8] ss:$16 sps:$4 sm:$0xff]  }
 0x1e2   : > { %v485_v14 = vmul.f32 %v2432_v11, %v2432_v11  ;;  %v486_v18 = vmul.f32 %v484_v12, %v484_v12 }
 0x1e4   : > { %v487_v19 = vadd.f32 %v486_v18, %v485_v14  ;;  %v2106_v14 = vld [vmem:[%s2765_s8 + $0xec] ss:$16 sps:$4 sm:$0xff]   ;;  %v2104_v18 = vld [vmem:[%s2765_s8 + $0xe8] ss:$16 sps:$4 sm:$0xff]  }
 0x1e6   : > { %488 = vadd.xlane.f32.xlu1 %v487_v19  ;;  %v2109_v19 = vld [vmem:[%s2765_s8 + $0x10c] ss:$16 sps:$4 sm:$0xff]  }
 0x273   : > { %v489_v46 = vpop.xlane.xlu1 %488 }
 0x274   : > { %v490_v47 = vmul.f32 0.00390625, %v489_v46 }
 0x276   : > { %v491_v48 = vadd.f32 1e-05, %v490_v47 }
 0x278   : > { %2181 = vrsqrt.f32 %v491_v48 }
 0x282   : > { %v2182_v53 = vpop.eup %2181 }
 0x283   : > { %v494_v54 = vmul.f32 %v2182_v53, %v484_v12  ;;  %v493_v56 = vmul.f32 %v2182_v53, %v2432_v11  ;;  %v2103_v11 = vld [vmem:[%s2765_s8 + $0xcc] ss:$16 sps:$4 sm:$0xff]   ;;  %v2101_v12 = vld [vmem:[%s2765_s8 + $0xc8] ss:$16 sps:$4 sm:$0xff]  }
 0x285   : > { %v507_v58 = vmul.f32 %v503_v51, %v494_v54  ;;  %v506_v59 = vmul.f32 %v499_v52, %v493_v56 }
 0x287   : > { %v520_v60 = vadd.f32 %v516_v55, %v507_v58  ;;  %v519_v61 = vadd.f32 %v512_v57, %v506_v59 }
 0x289   : > { %v522_v62 = vpack.c.bf16 %v520_v60, %v520_v60  ;;  %v2523_v0 = vpack.c.bf16 %v519_v61, %v519_v61 }
 0x28b   : > { %759 = vmatprep.mubr.bf16.mxu0 %v522_v62  ;;  %1208 = vmatprep.mubr.bf16.mxu1 %v522_v62 }
 0x28c   : > { %760 = vmatmul.mubr.bf16.vlgmr.msra.gmra.mrb[0].mxu0 %v2523_v0  ;;  %1209 = vmatmul.mubr.bf16.vlgmr.msra.gmra.mrb[0].mxu1 %v2523_v0 }
 0x28d   : > { %1218 = vmatpush1.bf16.msra.mxu0 %v2083_v63  ;;  %1249 = vmatprep.mubr.bf16.mxu0 %v522_v62  ;;  %v846_v62 = vsub.s32 2, %v2284_v15  ;;  %v850_v63 = vsub.s32 3, %v2284_v15 }
 0x28e   : > { %1219 = vmatprep.subr.bf16.mxu0 %v2088_v1  ;;  %1966 = vmatprep.mubr.msk.bf16.mxu1 %vm2200_vm0, %v2199_v37 }
 0x28f   : > { %v851_v1 = vrot.slane %v834_v38, %v850_v63  ;;  %v2151_v63 = vld [vmem:[%s2767_s10 + $0x64] ss:$8 sps:$4 sm:$0xff]  }
 0x291   : > { %1220 = vmatpush1.bf16.msra.mxu0 %v2086_v2 }
 0x292   : > { %1221 = vmatprep.subr.bf16.mxu0 %v2091_v3 }
 0x295   : > { %1222 = vmatpush1.bf16.msra.mxu0 %v2089_v4 }
 0x296   : > { %1223 = vmatprep.subr.bf16.mxu0 %v2094_v5 }
 0x299   : > { %1224 = vmatpush1.bf16.msra.mxu0 %v2092_v6 }
 0x29a   : > { %1225 = vmatprep.subr.bf16.mxu0 %v2097_v7 }
 0x29d   : > { %1226 = vmatpush1.bf16.msra.mxu0 %v2095_v8 }
 0x29e   : > { %1227 = vmatprep.subr.bf16.mxu0 %v2100_v9 }
 0x2a1   : > { %1228 = vmatpush1.bf16.msra.mxu0 %v2098_v10 }
 0x2a2   : > { %1229 = vmatprep.subr.bf16.mxu0 %v2103_v11 }
 0x2a5   : > { %1230 = vmatpush1.bf16.msra.mxu0 %v2101_v12  ;;  %v1262_v12 = vand.u32 127, %v452_v13 }
 0x2a6   : > { %1231 = vmatprep.subr.bf16.mxu0 %v2106_v14  ;;  %v1903_v14 = vld [vmem:[%s422_s20] ss:$0 sm:$0xff] }
 0x2a7   : > { %vm1263_vm2 = vcmp.le.s32.totalorder %v1262_v12, %v2284_v15  ;;  %v2167_v12 = vld [vmem:[%s2767_s10 + $0xc0] ss:$8 sps:$4 sm:$0xff]  }
 0x2a9   : > { %1232 = vmatpush1.bf16.msra.mxu0 %v2104_v18  ;;  %v2201_v18 = vmov -1e+09  }
 0x2aa   : > { %1233 = vmatprep.subr.bf16.mxu0 %v2109_v19  ;;  %v1264_v19 = vsel %vm1263_vm2, 0.0, %v2201_v18  ;;  %v2170_v18 = vld [vmem:[%s2767_s10 + $0xd0] ss:$8 sps:$4 sm:$0xff]  }
 0x2ad   : > { %1234 = vmatpush1.bf16.msra.mxu0 %v2107_v20  ;;  %v1271_v20 = vadd.f32 %v1903_v14, %v1264_v19  ;;  %v2172_v14 = vld [vmem:[%s2767_s10 + $0xd4] ss:$8 sps:$4 sm:$0xff]   ;;  %v2175_v19 = vld [vmem:[%s2767_s10 + $0xe4] ss:$8 sps:$4 sm:$0xff]  }
 0x2ae   : > { %1235 = vmatprep.subr.bf16.mxu0 %v2112_v21 }
 0x2b1   : > { %1236 = vmatpush1.bf16.msra.mxu0 %v2110_v22 }
 0x2b2   : > { %1237 = vmatprep.subr.bf16.mxu0 %v2115_v23 }
 0x2b5   : > { %1238 = vmatpush1.bf16.msra.mxu0 %v2113_v24 }
 0x2b6   : > { %1239 = vmatprep.subr.bf16.mxu0 %v2118_v25 }
 0x2b9   : > { %1240 = vmatpush1.bf16.msra.mxu0 %v2116_v26 }
 0x2ba   : > { %1241 = vmatprep.subr.bf16.mxu0 %v2121_v27 }
 0x2bd   : > { %1242 = vmatpush1.bf16.msra.mxu0 %v2119_v28 }
 0x2be   : > { %1243 = vmatprep.subr.bf16.mxu0 %v2124_v31 }
 0x2c1   : > { %1244 = vmatpush1.bf16.msra.mxu0 %v2122_v32 }
 0x2c2   : > { %1245 = vmatprep.subr.bf16.mxu0 %v2127_v33 }
 0x2c5   : > { %1246 = vmatpush1.bf16.msra.mxu0 %v2125_v34 }
 0x2c6   : > { %1247 = vmatprep.subr.bf16.mxu0 %v2130_v35 }
 0x2c9   : > { %1248 = vmatpush1.bf16.msra.mxu0 %v2128_v36 }
 0x2ca   : > { %1952 = vmatprep.subr.bf16.mxu0 %v2199_v37 }
 0x2cc   : > { %1250 = vmatmul.mubr.bf16.vlgmr.msra.gmra.mrb[4].mxu0 %v2523_v0  ;;  %v847_v0 = vrot.slane %v834_v38, %v846_v62  ;;  %v2146_v62 = vld [vmem:[%s2767_s10 + $0x50] ss:$8 sps:$4 sm:$0xff]  }
 0x2cd   : > { %1954 = vmatprep.mubr.msk.bf16.mxu0 %vm2200_vm0, %v2199_v37 }
 0x35f   : > { %v761_v44 = vpop.f32.mrb[0].mxu0  ;;  %v1210_v45 = vpop.f32.mrb[0].mxu1 }
 0x360   : > { %v1211_v46 = vadd.f32 %v1210_v45, %v839_v40  ;;  %v763_v47 = vpop.f32.mrb[1].mxu0  ;;  %v1212_v48 = vpop.f32.mrb[1].mxu1  ;;  %v762_v49 = vadd.f32 %v761_v44, %v560_v41 }
 0x361   : > { %v1213_v50 = vadd.f32 %v1212_v48, %v843_v42  ;;  %v765_v51 = vpop.f32.mrb[2].mxu0  ;;  %v1214_v52 = vpop.f32.mrb[2].mxu1  ;;  %v764_v54 = vadd.f32 %v763_v47, %v564_v43  ;;  %v2133_v43 = vld [vmem:[%s2767_s10 + $0x4] ss:$8 sps:$4 sm:$0xff]  }
 0x362   : > { %v1273_v53 = vpack.c.bf16 %v1211_v46, %v1211_v46  ;;  %v766_v55 = vpop.f32.mrb[3].mxu0  ;;  %v1215_v56 = vpop.f32.mrb[3].mxu1  ;;  %v768_v58 = vmul.f32 0.088388346, %v762_v49  ;;  %v2131_v51 = vld [vmem:[%s2767_s10] ss:$8 sps:$4 sm:$0xff]  }
 0x363   : > { %v1376_v57 = vpack.c.bf16 %v1213_v50, %v1213_v50  ;;  %v769_v59 = vmul.f32 0.088388346, %v764_v54  ;;  %v2134_v54 = vld [vmem:[%s2767_s10 + $0x10] ss:$8 sps:$4 sm:$0xff]   ;;  %v2139_v55 = vld [vmem:[%s2767_s10 + $0x24] ss:$8 sps:$4 sm:$0xff]  }
 0x364   : > { %1953 = vmatpush3.bf16.xpose.msra.mxu0 %v1273_v53  ;;  %v1272_v60 = vpack.c.bf16 %v768_v58, %v768_v58  ;;  %v2136_v53 = vld [vmem:[%s2767_s10 + $0x14] ss:$8 sps:$4 sm:$0xff]   ;;  %v2137_v56 = vld [vmem:[%s2767_s10 + $0x20] ss:$8 sps:$4 sm:$0xff]   ;;  %v2140_v58 = vld [vmem:[%s2767_s10 + $0x30] ss:$8 sps:$4 sm:$0xff]  }
 0x365   : > { %1965 = vmatpush3.bf16.xpose.msra.mxu1 %v1376_v57  ;;  %1958 = vmatprep.subr.bf16.mxu0 %v2199_v37  ;;  %v1375_v61 = vpack.c.bf16 %v769_v59, %v769_v59  ;;  %v2142_v57 = vld [vmem:[%s2767_s10 + $0x34] ss:$8 sps:$4 sm:$0xff]   ;;  %v2145_v59 = vld [vmem:[%s2767_s10 + $0x44] ss:$8 sps:$4 sm:$0xff]  }
 0x366   : > { %1970 = vmatprep.subr.bf16.mxu1 %v2199_v37 }
 0x36b   : > { %1955 = vmatmul.mubr.bf16.vlgmr.msra.gmra.mrb[8].mxu0 %v1272_v60  ;;  %v2143_v60 = vld [vmem:[%s2767_s10 + $0x40] ss:$8 sps:$4 sm:$0xff]  }
 0x36c   : > { %1967 = vmatmul.mubr.bf16.vlgmr.msra.gmra.mrb[4].mxu1 %v1375_v61  ;;  %1960 = vmatprep.mubr.msk.bf16.mxu0 %vm2200_vm0, %v2199_v37  ;;  %v2148_v61 = vld [vmem:[%s2767_s10 + $0x54] ss:$8 sps:$4 sm:$0xff]  }
 0x36d   : > { %1972 = vmatprep.mubr.msk.bf16.mxu1 %vm2200_vm0, %v2199_v37 }
 0x39f   : > { %v1251_v2 = vpop.f32.mrb[4].mxu0 }
 0x3a0   : > { %v1252_v3 = vadd.f32 %v1251_v2, %v847_v0  ;;  %v1253_v4 = vpop.f32.mrb[5].mxu0  ;;  %v2149_v0 = vld [vmem:[%s2767_s10 + $0x60] ss:$8 sps:$4 sm:$0xff]   ;;  %v2152_v2 = vld [vmem:[%s2767_s10 + $0x70] ss:$8 sps:$4 sm:$0xff]  }
 0x3a1   : > { %v1254_v5 = vadd.f32 %v1253_v4, %v851_v1  ;;  %v1255_v6 = vpop.f32.mrb[6].mxu0  ;;  %v2154_v1 = vld [vmem:[%s2767_s10 + $0x74] ss:$8 sps:$4 sm:$0xff]   ;;  %v2155_v4 = vld [vmem:[%s2767_s10 + $0x80] ss:$8 sps:$4 sm:$0xff]  }
 0x3a2   : > { %v1327_v7 = vpack.c.bf16 %v1252_v3, %v1252_v3  ;;  %v1256_v8 = vpop.f32.mrb[7].mxu0  ;;  %v2157_v3 = vld [vmem:[%s2767_s10 + $0x84] ss:$8 sps:$4 sm:$0xff]   ;;  %v2158_v6 = vld [vmem:[%s2767_s10 + $0x90] ss:$8 sps:$4 sm:$0xff]  }
 0x3a3   : > { %v1429_v9 = vpack.c.bf16 %v1254_v5, %v1254_v5  ;;  %v2160_v5 = vld [vmem:[%s2767_s10 + $0x94] ss:$8 sps:$4 sm:$0xff]   ;;  %v2161_v8 = vld [vmem:[%s2767_s10 + $0xa0] ss:$8 sps:$4 sm:$0xff]  }
 0x3a4   : > { %v1333_v10 = vsel %vm1331_vm1, %v1327_v7, 0  ;;  %v2163_v7 = vld [vmem:[%s2767_s10 + $0xa4] ss:$8 sps:$4 sm:$0xff]  }
 0x3a5   : > { %v1434_v11 = vsel %vm1331_vm1, %v1429_v9, 0  ;;  %1959 = vmatpush3.bf16.msra.mxu0 %v1333_v10  ;;  %v2166_v9 = vld [vmem:[%s2767_s10 + $0xb4] ss:$8 sps:$4 sm:$0xff]   ;;  %v2164_v10 = vld [vmem:[%s2767_s10 + $0xb0] ss:$8 sps:$4 sm:$0xff]  }
 0x3a6   : > { %1971 = vmatpush3.bf16.msra.mxu1 %v1434_v11  ;;  %v2169_v11 = vld [vmem:[%s2767_s10 + $0xc4] ss:$8 sps:$4 sm:$0xff]  }
 0x3a7   : > { %1682 = vmatprep.subr.bf16.mxu1 %v2133_v43 }
 0x43e   : > { %v1308_v21 = vpop.f32.mrb[8].mxu0 }
 0x43f   : > { %v1309_v22 = vadd.f32 %v1308_v21, %v1271_v20  ;;  %v1956_v23 = vpop.f32.mrb[9].mxu0  ;;  %v1411_v24 = vpop.f32.mrb[4].mxu1  ;;  %v2178_v21 = vld [vmem:[%s2767_s10 + $0xf4] ss:$8 sps:$4 sm:$0xff]  }
 0x440   : > { %v1412_v25 = vadd.f32 %v1411_v24, %v1271_v20  ;;  %v1311_v26 = vpop.f32.mrb[10].mxu0  ;;  %v1968_v27 = vpop.f32.mrb[5].mxu1  ;;  %v2173_v20 = vld [vmem:[%s2767_s10 + $0xe0] ss:$8 sps:$4 sm:$0xff]  }
 0x441   : > { %v1957_v28 = vpop.f32.mrb[11].mxu0  ;;  %v1414_v13 = vpop.f32.mrb[6].mxu1  ;;  %v1315_v31 = vsel %vm1314_vm3, %v1309_v22, -inf }
 0x442   : > { %v1969_v32 = vpop.f32.mrb[7].mxu1  ;;  %1316 = vmax.xlane.f32.xlu1 %v1315_v31  ;;  %v1417_v15 = vsel %vm1314_vm3, %v1412_v25, -inf }
 0x443   : > { %1418 = vmax.xlane.f32.xlu0 %v1417_v15 }
 0x4cf   : > { %v1317_v33 = vpop.xlane.xlu1 %1316 }
 0x4d0   : > { %v1318_v34 = vsub.f32 %v1309_v22, %v1317_v33  ;;  %v1419_v35 = vpop.xlane.xlu0 %1418  ;;  %v2176_v22 = vld [vmem:[%s2767_s10 + $0xf0] ss:$8 sps:$4 sm:$0xff]   ;;  %v1510_v33 = vld [vmem:[%s2768_s11] sm:$0x3] }
 0x4d1   : > { %v1420_v36 = vsub.f32 %v1412_v25, %v1419_v35  ;;  %v1519_v35 = vrot.slane %v1510_v33, %v2290_v17 }
 0x4d2   : > { %v1319_v37 = vmul.f32 1.442695, %v1318_v34  ;;  %v1515_v34 = vrot.slane %v1510_v33, %v2287_v16 }
 0x4d3   : > { %v1421_v38 = vmul.f32 1.442695, %v1420_v36 }
 0x4d4   : > { %2183 = vpow2.f32 %v1319_v37 }
 0x4d5   : > { %2185 = vpow2.f32 %v1421_v38 }
 0x4de   : > { %v2184_v39 = vpop.eup %2183 }
 0x4df   : > { %v2186_v40 = vpop.eup %2185  ;;  %v1321_v41 = vsel %vm1314_vm3, %v2184_v39, 0.0 }
 0x4e0   : > { %1322 = vadd.xlane.f32.xlu1 %v1321_v41  ;;  %v1423_v42 = vsel %vm1314_vm3, %v2186_v40, 0.0 }
 0x4e1   : > { %1424 = vadd.xlane.f32.xlu0 %v1423_v42 }
 0x56d   : > { %v1323_v44 = vpop.xlane.xlu1 %1322 }
 0x56e   : > { %2187 = vrcp.f32 %v1323_v44  ;;  %v1425_v45 = vpop.xlane.xlu0 %1424 }
 0x56f   : > { %2189 = vrcp.f32 %v1425_v45 }
 0x578   : > { %v2188_v46 = vpop.eup %2187 }
 0x579   : > { %v2190_v47 = vpop.eup %2189  ;;  %v1325_v48 = vmul.f32 %v2188_v46, %v2184_v39 }
 0x57a   : > { %v1427_v49 = vmul.f32 %v2190_v47, %v2186_v40 }
 0x57b   : > { %v1326_v50 = vpack.c.bf16 %v1325_v48, %v1325_v48 }
 0x57c   : > { %v1428_v52 = vpack.c.bf16 %v1427_v49, %v1427_v49 }
 0x57d   : > { %1961 = vmatmul.mubr.msk.bf16.vlgmr.msra.gmra.mrb[12].mxu0 %vm1314_vm3, %v1326_v50 }
 0x57e   : > { %1973 = vmatmul.mubr.msk.bf16.vlgmr.msra.gmra.mrb[8].mxu1 %vm1314_vm3, %v1428_v52 }
 0x57f   : > { %1683 = vmatpush1.bf16.msra.mxu1 %v2131_v51 }
 0x580   : > { %1684 = vmatprep.subr.bf16.mxu1 %v2136_v53 }
 0x583   : > { %1685 = vmatpush1.bf16.msra.mxu1 %v2134_v54 }
 0x584   : > { %1686 = vmatprep.subr.bf16.mxu1 %v2139_v55 }
 0x587   : > { %1687 = vmatpush1.bf16.msra.mxu1 %v2137_v56 }
 0x588   : > { %1688 = vmatprep.subr.bf16.mxu1 %v2142_v57 }
 0x58b   : > { %1689 = vmatpush1.bf16.msra.mxu1 %v2140_v58 }
 0x58c   : > { %1690 = vmatprep.subr.bf16.mxu1 %v2145_v59 }
 0x58f   : > { %1691 = vmatpush1.bf16.msra.mxu1 %v2143_v60 }
 0x590   : > { %1692 = vmatprep.subr.bf16.mxu1 %v2148_v61 }
 0x593   : > { %1693 = vmatpush1.bf16.msra.mxu1 %v2146_v62 }
 0x594   : > { %1694 = vmatprep.subr.bf16.mxu1 %v2151_v63 }
 0x597   : > { %1695 = vmatpush1.bf16.msra.mxu1 %v2149_v0 }
 0x598   : > { %1696 = vmatprep.subr.bf16.mxu1 %v2154_v1 }
 0x59b   : > { %1697 = vmatpush1.bf16.msra.mxu1 %v2152_v2 }
 0x59c   : > { %1698 = vmatprep.subr.bf16.mxu1 %v2157_v3 }
 0x59f   : > { %1699 = vmatpush1.bf16.msra.mxu1 %v2155_v4 }
 0x5a0   : > { %1700 = vmatprep.subr.bf16.mxu1 %v2160_v5 }
 0x5a3   : > { %1701 = vmatpush1.bf16.msra.mxu1 %v2158_v6 }
 0x5a4   : > { %1702 = vmatprep.subr.bf16.mxu1 %v2163_v7 }
 0x5a7   : > { %1703 = vmatpush1.bf16.msra.mxu1 %v2161_v8 }
 0x5a8   : > { %1704 = vmatprep.subr.bf16.mxu1 %v2166_v9 }
 0x5ab   : > { %1705 = vmatpush1.bf16.msra.mxu1 %v2164_v10 }
 0x5ac   : > { %1706 = vmatprep.subr.bf16.mxu1 %v2169_v11 }
 0x5af   : > { %1707 = vmatpush1.bf16.msra.mxu1 %v2167_v12 }
 0x5b0   : > { %1708 = vmatprep.subr.bf16.mxu1 %v2172_v14 }
 0x5b3   : > { %1709 = vmatpush1.bf16.msra.mxu1 %v2170_v18 }
 0x5b4   : > { %1710 = vmatprep.subr.bf16.mxu1 %v2175_v19 }
 0x5b7   : > { %1711 = vmatpush1.bf16.msra.mxu1 %v2173_v20 }
 0x5b8   : > { %1712 = vmatprep.subr.bf16.mxu1 %v2178_v21 }
 0x5bb   : > { %1713 = vmatpush1.bf16.msra.mxu1 %v2176_v22 }
 0x650   : > { %v1369_v23 = vpop.f32.mrb[12].mxu0 }
 0x651   : > { %v1962_v24 = vpop.f32.mrb[13].mxu0  ;;  %v1470_v25 = vpop.f32.mrb[8].mxu1  ;;  %v1476_v13 = vpack.c.bf16 %v1369_v23, %v1369_v23 }
 0x652   : > { %v1477_v26 = vpack.c.bf16 %v1470_v25, %v1470_v25  ;;  %v1372_v27 = vpop.f32.mrb[14].mxu0  ;;  %v1974_v28 = vpop.f32.mrb[9].mxu1 }
 0x653   : > { %v1963_v31 = vpop.f32.mrb[15].mxu0  ;;  %v1473_v32 = vpop.f32.mrb[10].mxu1 }
 0x654   : > { %v1975_v15 = vpop.f32.mrb[11].mxu1  ;;  %1714 = vmatprep.mubr.bf16.mxu1 %v1477_v26 }
 0x655   : > { %1715 = vmatmul.mubr.bf16.vlgmr.msra.gmra.mrb[12].mxu1 %v1476_v13 }
 0x728   : > { %v1716_v36 = vpop.f32.mrb[12].mxu1 }
 0x729   : > { %v1717_v37 = vadd.f32 %v1716_v36, %v1515_v34  ;;  %v1718_v38 = vpop.f32.mrb[13].mxu1 }
 0x72a   : > { %v1719_v39 = vadd.f32 %v1718_v38, %v1519_v35  ;;  %v1720_v40 = vpop.f32.mrb[14].mxu1 }
 0x72b   : > { %v1723_v41 = vadd.f32 %v1717_v37, %v2302_v29  ;;  %v1721_v42 = vpop.f32.mrb[15].mxu1 }
 0x72c   : > { %v1724_v43 = vadd.f32 %v1719_v39, %v2304_v30 }
 0x72e   : > { %v1943_v44 = vpack.c.bf16 %v1724_v43, %v1723_v41 }
 0x730   : > { %1733 = vst [vmem:[%s427_s14] sm:$0xff] %v1943_v44 }
 0x731 PF: > { %s22_s21 = sadd.s32 1, %s2197_s21  }
 0x732   : > { %p19_p4 = scmp.ge.s32.totalorder %s22_s21, 4  }
 0x734   :  { %21 = sbr.rel (!%p19_p4) target bundleno = 1 (0x1), region = 101 }

// kernel: mbart_forward.6
= control target key start
LH: loop header
LB: loop body
LE: loop exit
PB: predicated region body
PF: predicated region fallthrough
CT: control target
= control target key end

     0   :  { %s2258_s21 = smov 0   ;;  %s2745_s0 = inlined_call_operand.vmem [shape: bf16[2,8,256], index: 0, kind: input, shape index: {}]   ;;  %s2746_s1 = inlined_call_operand.vmem [shape: f32[2,1,8], index: 1, kind: input, shape index: {}]   ;;  %s2747_s2 = inlined_call_operand.vmem [shape: f32[1,256], index: 2, kind: input, shape index: {}]   ;;  %s2748_s3 = inlined_call_operand.vmem [shape: f32[1,256], index: 3, kind: input, shape index: {}]   ;;  %s2749_s4 = inlined_call_operand.vmem [shape: f32[1,256], index: 4, kind: input, shape index: {}]   ;;  %s2750_s5 = inlined_call_operand.vmem [shape: f32[1,256], index: 5, kind: input, shape index: {}]   ;;  %s2751_s6 = inlined_call_operand.vmem [shape: bf16[256,256], index: 6, kind: input, shape index: {}]   ;;  %s2752_s7 = inlined_call_operand.vmem [shape: f32[1,256], index: 7, kind: input, shape index: {}]   ;;  %s2753_s8 = inlined_call_operand.vmem [shape: bf16[256,512], index: 8, kind: input, shape index: {}]   ;;  %s2754_s9 = inlined_call_operand.vmem [shape: f32[1,512], index: 9, kind: input, shape index: {}]   ;;  %s2755_s10 = inlined_call_operand.vmem [shape: bf16[256,256], index: 10, kind: input, shape index: {}]   ;;  %s2756_s11 = inlined_call_operand.vmem [shape: f32[1,256], index: 11, kind: input, shape index: {}]   ;;  %s2757_s12 = inlined_call_operand.vmem [shape: bf16[2,8,256], index: 12, kind: output, shape index: {}]  }
   0x1 LB: > { %s1791_s22 = sadd.s32 4294967295, %s2189_s21   ;;  %p1795_p0 = scmp.ge.s32.totalorder %s2189_s21, 1  ;;  %s2189_s21 = sphi %s2258_s21, %s22_s21  }
   0x2   : > { %p370_p1 = scmp.lt.s32.totalorder %s2189_s21, 3 }
   0x4   : > { %p371_p2 = pnand %p1795_p0, %p370_p1 }
   0x5   : > { %p415_p3 = scmp.lt.s32.totalorder (!%p371_p2), %s1791_s22, 1  ;;  %v452_v13 = vlaneseq (!%p371_p2)  ;;  %v432_v18 = vld [vmem:[%s2747_s2] sm:$0x3] (!%p371_p2)  ;;  %v1979_v32 = vld [vmem:[%s2751_s6 + $0x4] ss:$8 sps:$4 sm:$0xff] (!%p371_p2)   ;;  %vm2192_vm0 = vmmov (!%p371_p2), 0  }
   0x6   : > { %374 = sbr.rel (%p371_p2) target bundleno = 1841 (0x731), region = 68  ;;  %v433_v19 = vld [vmem:[%s2748_s3] sm:$0x3] (!%p371_p2)  ;;  %v1982_v34 = vld [vmem:[%s2753_s8 + $0x4] ss:$16 sps:$4 sm:$0xff] (!%p371_p2)   ;;  %727 = vmatprep.subr.bf16.mxu0 (!%p371_p2), %v1979_v32  ;;  %vm1324_vm1 = vcmask (!%p371_p2), 1043456  }
   0x7   : > { %v2274_v15 = vshrl.u32 (!%p371_p2), %v452_v13, 7  ;;  %v1981_v33 = vld [vmem:[%s2751_s6] ss:$8 sps:$4 sm:$0xff] (!%p371_p2)   ;;  %v1985_v36 = vld [vmem:[%s2751_s6 + $0x14] ss:$8 sps:$4 sm:$0xff] (!%p371_p2)   ;;  %1176 = vmatprep.subr.bf16.mxu1 (!%p371_p2), %v1982_v34  ;;  %vm1307_vm2 = vcmask (!%p371_p2), 64512  }
   0x8   : > { %v1984_v35 = vld [vmem:[%s2753_s8] ss:$16 sps:$4 sm:$0xff] (!%p371_p2)   ;;  %v1988_v37 = vld [vmem:[%s2753_s8 + $0x24] ss:$16 sps:$4 sm:$0xff] (!%p371_p2)   ;;  %728 = vmatpush1.bf16.msra.mxu0 (!%p371_p2), %v1981_v33 }
   0x9   : > { %v2277_v16 = vsub.s32 (!%p371_p2), 0, %v2274_v15  ;;  %v2280_v17 = vsub.s32 (!%p371_p2), 1, %v2274_v15  ;;  %1177 = vmatpush1.bf16.msra.mxu1 (!%p371_p2), %v1984_v35  ;;  %v1987_v38 = vld [vmem:[%s2751_s6 + $0x10] ss:$8 sps:$4 sm:$0xff] (!%p371_p2)   ;;  %729 = vmatprep.subr.bf16.mxu0 (!%p371_p2), %v1985_v36  ;;  %v1991_v40 = vld [vmem:[%s2751_s6 + $0x24] ss:$8 sps:$4 sm:$0xff] (!%p371_p2)  }
   0xa   : > { %v1990_v39 = vld [vmem:[%s2753_s8 + $0x20] ss:$16 sps:$4 sm:$0xff] (!%p371_p2)   ;;  %1178 = vmatprep.subr.bf16.mxu1 (!%p371_p2), %v1988_v37  ;;  %v1994_v41 = vld [vmem:[%s2753_s8 + $0x44] ss:$16 sps:$4 sm:$0xff] (!%p371_p2)  }
   0xb   : > { %v455_v20 = vrot.slane (!%p371_p2), %v432_v18, %v2277_v16  ;;  %v459_v21 = vrot.slane (!%p371_p2), %v432_v18, %v2280_v17  ;;  %v468_v25 = vrot.slane (!%p371_p2), %v433_v19, %v2277_v16  ;;  %v472_v26 = vrot.slane (!%p371_p2), %v433_v19, %v2280_v17  ;;  %v1993_v42 = vld [vmem:[%s2751_s6 + $0x20] ss:$8 sps:$4 sm:$0xff] (!%p371_p2)   ;;  %v1997_v44 = vld [vmem:[%s2751_s6 + $0x34] ss:$8 sps:$4 sm:$0xff] (!%p371_p2)   ;;  %v1999_v46 = vld [vmem:[%s2751_s6 + $0x30] ss:$8 sps:$4 sm:$0xff] (!%p371_p2)  }
   0xc   : > { %730 = vmatpush1.bf16.msra.mxu0 (!%p371_p2), %v1987_v38  ;;  %v1996_v43 = vld [vmem:[%s2753_s8 + $0x40] ss:$16 sps:$4 sm:$0xff] (!%p371_p2)   ;;  %v2000_v45 = vld [vmem:[%s2753_s8 + $0x64] ss:$16 sps:$4 sm:$0xff] (!%p371_p2)  }
   0xd   : > { %s2759_s22 = smov (!%p415_p3, %s1791_s22), 1  ;;  %1179 = vmatpush1.bf16.msra.mxu1 %v1990_v39  ;;  %731 = vmatprep.subr.bf16.mxu0 %v1991_v40  ;;  %v2002_v47 = vld [vmem:[%s2753_s8 + $0x60] ss:$16 sps:$4 sm:$0xff]   ;;  %v2003_v48 = vld [vmem:[%s2751_s6 + $0x44] ss:$8 sps:$4 sm:$0xff]  }
   0xe   : > { %s1934_s23 = sshll.u32 %s2759_s22, 3  ;;  %1180 = vmatprep.subr.bf16.mxu1 %v1994_v41  ;;  %v2006_v49 = vld [vmem:[%s2753_s8 + $0x84] ss:$16 sps:$4 sm:$0xff]   ;;  %v2005_v50 = vld [vmem:[%s2751_s6 + $0x40] ss:$8 sps:$4 sm:$0xff]   ;;  %s422_s20 = scalar_lea.vmem %s2746_s1, %s2759_s22 }
   0xf   : > { %s419_s26 = scalar_lea.vmem %s2745_s0, %s1934_s23  ;;  %v2008_v51 = vld [vmem:[%s2753_s8 + $0x80] ss:$16 sps:$4 sm:$0xff]   ;;  %v2009_v52 = vld [vmem:[%s2751_s6 + $0x54] ss:$8 sps:$4 sm:$0xff]   ;;  %v2015_v56 = vld [vmem:[%s2751_s6 + $0x64] ss:$8 sps:$4 sm:$0xff]   ;;  %s427_s14 = scalar_lea.vmem %s2757_s12, %s1934_s23 }
  0x10   : > { %v429_v0 = vld [vmem:[%s419_s26] sm:$0xff]  ;;  %732 = vmatpush1.bf16.msra.mxu0 %v1993_v42  ;;  %v2011_v54 = vld [vmem:[%s2751_s6 + $0x50] ss:$8 sps:$4 sm:$0xff]   ;;  %v2021_v60 = vld [vmem:[%s2751_s6 + $0x74] ss:$8 sps:$4 sm:$0xff]  }
  0x11   : > { %v430_v1 = vunpack.c.l.bf16 %v429_v0  ;;  %v431_v2 = vunpack.c.h.bf16 %v429_v0  ;;  %1181 = vmatpush1.bf16.msra.mxu1 %v1996_v43  ;;  %733 = vmatprep.subr.bf16.mxu0 %v1997_v44  ;;  %v2012_v53 = vld [vmem:[%s2753_s8 + $0xa4] ss:$16 sps:$4 sm:$0xff]   ;;  %v2014_v55 = vld [vmem:[%s2753_s8 + $0xa0] ss:$16 sps:$4 sm:$0xff]   ;;  %v2077_v44 = vld [vmem:[%s2753_s8 + $0xc] ss:$16 sps:$4 sm:$0xff]  }
  0x12   : > { %1182 = vmatprep.subr.bf16.mxu1 %v2000_v45  ;;  %v2018_v57 = vld [vmem:[%s2753_s8 + $0xc4] ss:$16 sps:$4 sm:$0xff]   ;;  %v2017_v58 = vld [vmem:[%s2751_s6 + $0x60] ss:$8 sps:$4 sm:$0xff]   ;;  %v2023_v62 = vld [vmem:[%s2751_s6 + $0x70] ss:$8 sps:$4 sm:$0xff]  }
  0x13   : > { %v434_v3 = vadd.f32 %v431_v2, %v430_v1  ;;  %v2020_v59 = vld [vmem:[%s2753_s8 + $0xc0] ss:$16 sps:$4 sm:$0xff]   ;;  %v2024_v61 = vld [vmem:[%s2753_s8 + $0xe4] ss:$16 sps:$4 sm:$0xff]  }
  0x14   : > { %734 = vmatpush1.bf16.msra.mxu0 %v1999_v46  ;;  %v2026_v63 = vld [vmem:[%s2753_s8 + $0xe0] ss:$16 sps:$4 sm:$0xff]   ;;  %v2027_v0 = vld [vmem:[%s2751_s6 + $0x84] ss:$8 sps:$4 sm:$0xff]   ;;  %v2057_v32 = vld [vmem:[%s2751_s6 + $0xd4] ss:$8 sps:$4 sm:$0xff]  }
  0x15   : > { %435 = vadd.xlane.f32.xlu0 %v434_v3  ;;  %1183 = vmatpush1.bf16.msra.mxu1 %v2002_v47  ;;  %v2032_v3 = vld [vmem:[%s2753_s8 + $0x100] ss:$16 sps:$4 sm:$0xff]   ;;  %v2060_v33 = vld [vmem:[%s2753_s8 + $0x1a4] ss:$16 sps:$4 sm:$0xff]  }
  0x16   : > { %735 = vmatprep.subr.bf16.mxu0 %v2003_v48  ;;  %1184 = vmatprep.subr.bf16.mxu1 %v2006_v49  ;;  %v2041_v19 = vld [vmem:[%s2751_s6 + $0xa0] ss:$8 sps:$4 sm:$0xff]   ;;  %v2059_v34 = vld [vmem:[%s2751_s6 + $0xd0] ss:$8 sps:$4 sm:$0xff]   ;;  %v2063_v36 = vld [vmem:[%s2751_s6 + $0xe4] ss:$8 sps:$4 sm:$0xff]  }
  0x17   : > { %v2062_v35 = vld [vmem:[%s2753_s8 + $0x1a0] ss:$16 sps:$4 sm:$0xff]   ;;  %v2066_v37 = vld [vmem:[%s2753_s8 + $0x1c4] ss:$16 sps:$4 sm:$0xff]  }
  0x18   : > { %736 = vmatpush1.bf16.msra.mxu0 %v2005_v50  ;;  %v2065_v38 = vld [vmem:[%s2751_s6 + $0xe0] ss:$8 sps:$4 sm:$0xff]   ;;  %v2069_v40 = vld [vmem:[%s2751_s6 + $0xf4] ss:$8 sps:$4 sm:$0xff]   ;;  %v2071_v42 = vld [vmem:[%s2751_s6 + $0xf0] ss:$8 sps:$4 sm:$0xff]  }
  0x19   : > { %1185 = vmatpush1.bf16.msra.mxu1 %v2008_v51  ;;  %737 = vmatprep.subr.bf16.mxu0 %v2009_v52  ;;  %v2068_v39 = vld [vmem:[%s2753_s8 + $0x1c0] ss:$16 sps:$4 sm:$0xff]   ;;  %v2072_v41 = vld [vmem:[%s2753_s8 + $0x1e4] ss:$16 sps:$4 sm:$0xff]  }
  0x1a   : > { %1186 = vmatprep.subr.bf16.mxu1 %v2012_v53  ;;  %v2074_v43 = vld [vmem:[%s2753_s8 + $0x1e0] ss:$16 sps:$4 sm:$0xff]  }
  0x1b   : > { %v477_v48 = vld [vmem:[%s2749_s4] sm:$0x3] }
  0x1c   : > { %738 = vmatpush1.bf16.msra.mxu0 %v2011_v54  ;;  %v478_v49 = vld [vmem:[%s2750_s5] sm:$0x3]  ;;  %v503_v50 = vrot.slane %v477_v48, %v2280_v17  ;;  %v499_v51 = vrot.slane %v477_v48, %v2277_v16 }
  0x1d   : > { %1187 = vmatpush1.bf16.msra.mxu1 %v2014_v55  ;;  %739 = vmatprep.subr.bf16.mxu0 %v2015_v56  ;;  %v516_v54 = vrot.slane %v478_v49, %v2280_v17  ;;  %v512_v56 = vrot.slane %v478_v49, %v2277_v16 }
  0x1e   : > { %1188 = vmatprep.subr.bf16.mxu1 %v2018_v57 }
  0x20   : > { %740 = vmatpush1.bf16.msra.mxu0 %v2017_v58 }
  0x21   : > { %1189 = vmatpush1.bf16.msra.mxu1 %v2020_v59  ;;  %741 = vmatprep.subr.bf16.mxu0 %v2021_v60 }
  0x22   : > { %1190 = vmatprep.subr.bf16.mxu1 %v2024_v61 }
  0x24   : > { %742 = vmatpush1.bf16.msra.mxu0 %v2023_v62  ;;  %v2075_v62 = vld [vmem:[%s2753_s8 + $0x8] ss:$16 sps:$4 sm:$0xff]  }
  0x25   : > { %1191 = vmatpush1.bf16.msra.mxu1 %v2026_v63  ;;  %743 = vmatprep.subr.bf16.mxu0 %v2027_v0  ;;  %v2080_v0 = vld [vmem:[%s2753_s8 + $0x2c] ss:$16 sps:$4 sm:$0xff]  }
  0xa2   : > { %v436_v4 = vpop.xlane.xlu0 %435 }
  0xa3   : > { %v438_v5 = vmul.f32 0.00390625, %v436_v4  ;;  %v2033_v4 = vld [vmem:[%s2751_s6 + $0x94] ss:$8 sps:$4 sm:$0xff]  }
  0xa5   : > { %v439_v6 = vsub.f32 %v430_v1, %v438_v5  ;;  %v440_v7 = vsub.f32 %v431_v2, %v438_v5  ;;  %v2030_v1 = vld [vmem:[%s2753_s8 + $0x104] ss:$16 sps:$4 sm:$0xff]   ;;  %v2029_v2 = vld [vmem:[%s2751_s6 + $0x80] ss:$8 sps:$4 sm:$0xff]  }
  0xa6   : > { %1192 = vmatprep.subr.bf16.mxu1 %v2030_v1  ;;  %v2036_v5 = vld [vmem:[%s2753_s8 + $0x124] ss:$16 sps:$4 sm:$0xff]   ;;  %744 = vmatpush1.bf16.msra.mxu0 %v2029_v2  ;;  %v2078_v1 = vld [vmem:[%s2753_s8 + $0x28] ss:$16 sps:$4 sm:$0xff]   ;;  %v2083_v2 = vld [vmem:[%s2753_s8 + $0x4c] ss:$16 sps:$4 sm:$0xff]  }
  0xa7   : > { %v441_v8 = vmul.f32 %v439_v6, %v439_v6  ;;  %v442_v9 = vmul.f32 %v440_v7, %v440_v7  ;;  %1193 = vmatpush1.bf16.msra.mxu1 %v2032_v3  ;;  %745 = vmatprep.subr.bf16.mxu0 %v2033_v4  ;;  %v2081_v3 = vld [vmem:[%s2753_s8 + $0x48] ss:$16 sps:$4 sm:$0xff]   ;;  %v2086_v4 = vld [vmem:[%s2753_s8 + $0x6c] ss:$16 sps:$4 sm:$0xff]  }
  0xa8   : > { %1194 = vmatprep.subr.bf16.mxu1 %v2036_v5  ;;  %v2084_v5 = vld [vmem:[%s2753_s8 + $0x68] ss:$16 sps:$4 sm:$0xff]  }
  0xa9   : > { %v443_v10 = vadd.f32 %v442_v9, %v441_v8  ;;  %v2039_v8 = vld [vmem:[%s2751_s6 + $0xa4] ss:$8 sps:$4 sm:$0xff]  }
  0xab   : > { %444 = vadd.xlane.f32.xlu0 %v443_v10 }
 0x138   : > { %v445_v11 = vpop.xlane.xlu0 %444 }
 0x139   : > { %v446_v12 = vmul.f32 0.00390625, %v445_v11 }
 0x13b   : > { %v447_v14 = vadd.f32 1e-05, %v446_v12 }
 0x13d   : > { %2171 = vrsqrt.f32 %v447_v14 }
 0x147   : > { %v2172_v22 = vpop.eup %2171 }
 0x148   : > { %v449_v23 = vmul.f32 %v2172_v22, %v439_v6  ;;  %v450_v24 = vmul.f32 %v2172_v22, %v440_v7  ;;  %v2035_v6 = vld [vmem:[%s2751_s6 + $0x90] ss:$8 sps:$4 sm:$0xff]   ;;  %v2045_v22 = vld [vmem:[%s2751_s6 + $0xb4] ss:$8 sps:$4 sm:$0xff]  }
 0x149   : > { %v2038_v7 = vld [vmem:[%s2753_s8 + $0x120] ss:$16 sps:$4 sm:$0xff]   ;;  %746 = vmatpush1.bf16.msra.mxu0 %v2035_v6  ;;  %v2089_v6 = vld [vmem:[%s2753_s8 + $0x8c] ss:$16 sps:$4 sm:$0xff]  }
 0x14a   : > { %v462_v27 = vmul.f32 %v455_v20, %v449_v23  ;;  %v463_v28 = vmul.f32 %v459_v21, %v450_v24  ;;  %1195 = vmatpush1.bf16.msra.mxu1 %v2038_v7  ;;  %747 = vmatprep.subr.bf16.mxu0 %v2039_v8  ;;  %v2042_v20 = vld [vmem:[%s2753_s8 + $0x144] ss:$16 sps:$4 sm:$0xff]   ;;  %v2044_v21 = vld [vmem:[%s2753_s8 + $0x140] ss:$16 sps:$4 sm:$0xff]   ;;  %v2087_v7 = vld [vmem:[%s2753_s8 + $0x88] ss:$16 sps:$4 sm:$0xff]  }
 0x14b   : > { %1196 = vmatprep.subr.bf16.mxu1 %v2042_v20  ;;  %v2047_v23 = vld [vmem:[%s2751_s6 + $0xb0] ss:$8 sps:$4 sm:$0xff]   ;;  %v2048_v24 = vld [vmem:[%s2753_s8 + $0x164] ss:$16 sps:$4 sm:$0xff]   ;;  %v2092_v8 = vld [vmem:[%s2753_s8 + $0xac] ss:$16 sps:$4 sm:$0xff]  }
 0x14c   : > { %v2292_v29 = vadd.f32 %v468_v25, %v462_v27  ;;  %v2294_v30 = vadd.f32 %v472_v26, %v463_v28  ;;  %v2050_v25 = vld [vmem:[%s2753_s8 + $0x160] ss:$16 sps:$4 sm:$0xff]   ;;  %v2051_v26 = vld [vmem:[%s2751_s6 + $0xc4] ss:$8 sps:$4 sm:$0xff]   ;;  %v2102_v20 = vld [vmem:[%s2753_s8 + $0x128] ss:$16 sps:$4 sm:$0xff]  }
 0x14d   : > { %748 = vmatpush1.bf16.msra.mxu0 %v2041_v19  ;;  %v2053_v27 = vld [vmem:[%s2751_s6 + $0xc0] ss:$8 sps:$4 sm:$0xff]   ;;  %v2054_v28 = vld [vmem:[%s2753_s8 + $0x184] ss:$16 sps:$4 sm:$0xff]   ;;  %v2104_v19 = vld [vmem:[%s2753_s8 + $0x12c] ss:$16 sps:$4 sm:$0xff]  }
 0x14e   : > { %v479_v31 = vadd.f32 %v2294_v30, %v2292_v29  ;;  %1197 = vmatpush1.bf16.msra.mxu1 %v2044_v21  ;;  %749 = vmatprep.subr.bf16.mxu0 %v2045_v22  ;;  %v2107_v21 = vld [vmem:[%s2753_s8 + $0x14c] ss:$16 sps:$4 sm:$0xff]   ;;  %v2105_v22 = vld [vmem:[%s2753_s8 + $0x148] ss:$16 sps:$4 sm:$0xff]  }
 0x14f   : > { %1198 = vmatprep.subr.bf16.mxu1 %v2048_v24  ;;  %v2108_v24 = vld [vmem:[%s2753_s8 + $0x168] ss:$16 sps:$4 sm:$0xff]  }
 0x150   : > { %480 = vadd.xlane.f32.xlu1 %v479_v31  ;;  %v2056_v31 = vld [vmem:[%s2753_s8 + $0x180] ss:$16 sps:$4 sm:$0xff]  }
 0x151   : > { %750 = vmatpush1.bf16.msra.mxu0 %v2047_v23  ;;  %v2110_v23 = vld [vmem:[%s2753_s8 + $0x16c] ss:$16 sps:$4 sm:$0xff]  }
 0x152   : > { %1199 = vmatpush1.bf16.msra.mxu1 %v2050_v25  ;;  %751 = vmatprep.subr.bf16.mxu0 %v2051_v26  ;;  %v2113_v25 = vld [vmem:[%s2753_s8 + $0x18c] ss:$16 sps:$4 sm:$0xff]   ;;  %v2111_v26 = vld [vmem:[%s2753_s8 + $0x188] ss:$16 sps:$4 sm:$0xff]  }
 0x153   : > { %1200 = vmatprep.subr.bf16.mxu1 %v2054_v28  ;;  %v2114_v28 = vld [vmem:[%s2753_s8 + $0x1a8] ss:$16 sps:$4 sm:$0xff]  }
 0x155   : > { %752 = vmatpush1.bf16.msra.mxu0 %v2053_v27  ;;  %v2116_v27 = vld [vmem:[%s2753_s8 + $0x1ac] ss:$16 sps:$4 sm:$0xff]  }
 0x156   : > { %1201 = vmatpush1.bf16.msra.mxu1 %v2056_v31  ;;  %753 = vmatprep.subr.bf16.mxu0 %v2057_v32  ;;  %v2119_v31 = vld [vmem:[%s2753_s8 + $0x1cc] ss:$16 sps:$4 sm:$0xff]   ;;  %v2117_v32 = vld [vmem:[%s2753_s8 + $0x1c8] ss:$16 sps:$4 sm:$0xff]  }
 0x157   : > { %1202 = vmatprep.subr.bf16.mxu1 %v2060_v33  ;;  %v2122_v33 = vld [vmem:[%s2753_s8 + $0x1ec] ss:$16 sps:$4 sm:$0xff]  }
 0x159   : > { %754 = vmatpush1.bf16.msra.mxu0 %v2059_v34  ;;  %v2120_v34 = vld [vmem:[%s2753_s8 + $0x1e8] ss:$16 sps:$4 sm:$0xff]  }
 0x15a   : > { %1203 = vmatpush1.bf16.msra.mxu1 %v2062_v35  ;;  %755 = vmatprep.subr.bf16.mxu0 %v2063_v36  ;;  %v2191_v35 = vmov 0.0   ;;  %v834_v36 = vld [vmem:[%s2754_s9] sm:$0xf] }
 0x15b   : > { %1204 = vmatprep.subr.bf16.mxu1 %v2066_v37  ;;  %v555_v37 = vld [vmem:[%s2752_s7] sm:$0x3] }
 0x15d   : > { %756 = vmatpush1.bf16.msra.mxu0 %v2065_v38  ;;  %v839_v38 = vrot.slane %v834_v36, %v2277_v16 }
 0x15e   : > { %1205 = vmatpush1.bf16.msra.mxu1 %v2068_v39  ;;  %757 = vmatprep.subr.bf16.mxu0 %v2069_v40  ;;  %v560_v39 = vrot.slane %v555_v37, %v2277_v16  ;;  %v843_v40 = vrot.slane %v834_v36, %v2280_v17 }
 0x15f   : > { %1206 = vmatprep.subr.bf16.mxu1 %v2072_v41  ;;  %v564_v41 = vrot.slane %v555_v37, %v2280_v17  ;;  %v2125_v37 = vld [vmem:[%s2755_s10 + $0x4] ss:$8 sps:$4 sm:$0xff]  }
 0x161   : > { %758 = vmatpush1.bf16.msra.mxu0 %v2071_v42 }
 0x162   : > { %1207 = vmatpush1.bf16.msra.mxu1 %v2074_v43  ;;  %1217 = vmatprep.subr.bf16.mxu0 %v2077_v44 }
 0x163   : > { %1957 = vmatprep.subr.bf16.mxu1 %v2191_v35 }
 0x1dd   : > { %v481_v9 = vpop.xlane.xlu1 %480 }
 0x1de   : > { %v482_v10 = vmul.f32 0.00390625, %v481_v9  ;;  %v2090_v9 = vld [vmem:[%s2753_s8 + $0xa8] ss:$16 sps:$4 sm:$0xff]  }
 0x1e0   : > { %v2422_v11 = vsub.f32 %v2292_v29, %v482_v10  ;;  %v484_v12 = vsub.f32 %v2294_v30, %v482_v10  ;;  %v2095_v10 = vld [vmem:[%s2753_s8 + $0xcc] ss:$16 sps:$4 sm:$0xff]  }
 0x1e2   : > { %v485_v13 = vmul.f32 %v2422_v11, %v2422_v11  ;;  %v486_v14 = vmul.f32 %v484_v12, %v484_v12 }
 0x1e4   : > { %v487_v18 = vadd.f32 %v486_v14, %v485_v13  ;;  %v2096_v13 = vld [vmem:[%s2753_s8 + $0xe8] ss:$16 sps:$4 sm:$0xff]   ;;  %v2101_v14 = vld [vmem:[%s2753_s8 + $0x10c] ss:$16 sps:$4 sm:$0xff]  }
 0x1e6   : > { %488 = vadd.xlane.f32.xlu1 %v487_v18  ;;  %v2099_v18 = vld [vmem:[%s2753_s8 + $0x108] ss:$16 sps:$4 sm:$0xff]  }
 0x273   : > { %v489_v45 = vpop.xlane.xlu1 %488 }
 0x274   : > { %v490_v46 = vmul.f32 0.00390625, %v489_v45 }
 0x276   : > { %v491_v47 = vadd.f32 1e-05, %v490_v46 }
 0x278   : > { %2173 = vrsqrt.f32 %v491_v47 }
 0x282   : > { %v2174_v52 = vpop.eup %2173 }
 0x283   : > { %v494_v53 = vmul.f32 %v2174_v52, %v484_v12  ;;  %v493_v55 = vmul.f32 %v2174_v52, %v2422_v11  ;;  %v2093_v11 = vld [vmem:[%s2753_s8 + $0xc8] ss:$16 sps:$4 sm:$0xff]   ;;  %v2098_v12 = vld [vmem:[%s2753_s8 + $0xec] ss:$16 sps:$4 sm:$0xff]  }
 0x285   : > { %v507_v57 = vmul.f32 %v503_v50, %v494_v53  ;;  %v506_v58 = vmul.f32 %v499_v51, %v493_v55 }
 0x287   : > { %v520_v59 = vadd.f32 %v516_v54, %v507_v57  ;;  %v519_v60 = vadd.f32 %v512_v56, %v506_v58 }
 0x289   : > { %v522_v61 = vpack.c.bf16 %v520_v59, %v520_v59  ;;  %v2513_v63 = vpack.c.bf16 %v519_v60, %v519_v60  ;;  %v846_v60 = vsub.s32 2, %v2274_v15 }
 0x28b   : > { %759 = vmatprep.mubr.bf16.mxu0 %v522_v61  ;;  %1208 = vmatprep.mubr.bf16.mxu1 %v522_v61 }
 0x28c   : > { %760 = vmatmul.mubr.bf16.vlgmr.msra.gmra.mrb[0].mxu0 %v2513_v63  ;;  %1209 = vmatmul.mubr.bf16.vlgmr.msra.gmra.mrb[0].mxu1 %v2513_v63 }
 0x28d   : > { %1218 = vmatpush1.bf16.msra.mxu0 %v2075_v62  ;;  %1249 = vmatprep.mubr.bf16.mxu0 %v522_v61  ;;  %v850_v61 = vsub.s32 3, %v2274_v15  ;;  %v847_v62 = vrot.slane %v834_v36, %v846_v60  ;;  %v1896_v15 = vld [vmem:[%s422_s20] ss:$0 sm:$0xff]  ;;  %v2144_v60 = vld [vmem:[%s2755_s10 + $0x70] ss:$8 sps:$4 sm:$0xff]  }
 0x28e   : > { %1219 = vmatprep.subr.bf16.mxu0 %v2080_v0  ;;  %1959 = vmatprep.mubr.msk.bf16.mxu1 %vm2192_vm0, %v2191_v35 }
 0x291   : > { %1220 = vmatpush1.bf16.msra.mxu0 %v2078_v1 }
 0x292   : > { %1221 = vmatprep.subr.bf16.mxu0 %v2083_v2 }
 0x295   : > { %1222 = vmatpush1.bf16.msra.mxu0 %v2081_v3 }
 0x296   : > { %1223 = vmatprep.subr.bf16.mxu0 %v2086_v4 }
 0x299   : > { %1224 = vmatpush1.bf16.msra.mxu0 %v2084_v5 }
 0x29a   : > { %1225 = vmatprep.subr.bf16.mxu0 %v2089_v6 }
 0x29d   : > { %1226 = vmatpush1.bf16.msra.mxu0 %v2087_v7 }
 0x29e   : > { %1227 = vmatprep.subr.bf16.mxu0 %v2092_v8 }
 0x2a1   : > { %1228 = vmatpush1.bf16.msra.mxu0 %v2090_v9 }
 0x2a2   : > { %1229 = vmatprep.subr.bf16.mxu0 %v2095_v10 }
 0x2a5   : > { %1230 = vmatpush1.bf16.msra.mxu0 %v2093_v11 }
 0x2a6   : > { %1231 = vmatprep.subr.bf16.mxu0 %v2098_v12 }
 0x2a9   : > { %1232 = vmatpush1.bf16.msra.mxu0 %v2096_v13 }
 0x2aa   : > { %1233 = vmatprep.subr.bf16.mxu0 %v2101_v14 }
 0x2ad   : > { %1234 = vmatpush1.bf16.msra.mxu0 %v2099_v18 }
 0x2ae   : > { %1235 = vmatprep.subr.bf16.mxu0 %v2104_v19 }
 0x2b1   : > { %1236 = vmatpush1.bf16.msra.mxu0 %v2102_v20 }
 0x2b2   : > { %1237 = vmatprep.subr.bf16.mxu0 %v2107_v21 }
 0x2b5   : > { %1238 = vmatpush1.bf16.msra.mxu0 %v2105_v22 }
 0x2b6   : > { %1239 = vmatprep.subr.bf16.mxu0 %v2110_v23 }
 0x2b9   : > { %1240 = vmatpush1.bf16.msra.mxu0 %v2108_v24 }
 0x2ba   : > { %1241 = vmatprep.subr.bf16.mxu0 %v2113_v25 }
 0x2bd   : > { %1242 = vmatpush1.bf16.msra.mxu0 %v2111_v26 }
 0x2be   : > { %1243 = vmatprep.subr.bf16.mxu0 %v2116_v27 }
 0x2c1   : > { %1244 = vmatpush1.bf16.msra.mxu0 %v2114_v28 }
 0x2c2   : > { %1245 = vmatprep.subr.bf16.mxu0 %v2119_v31 }
 0x2c5   : > { %1246 = vmatpush1.bf16.msra.mxu0 %v2117_v32 }
 0x2c6   : > { %1247 = vmatprep.subr.bf16.mxu0 %v2122_v33 }
 0x2c9   : > { %1248 = vmatpush1.bf16.msra.mxu0 %v2120_v34 }
 0x2ca   : > { %1945 = vmatprep.subr.bf16.mxu0 %v2191_v35 }
 0x2cc   : > { %1250 = vmatmul.mubr.bf16.vlgmr.msra.gmra.mrb[4].mxu0 %v2513_v63  ;;  %v851_v63 = vrot.slane %v834_v36, %v850_v61  ;;  %v2149_v61 = vld [vmem:[%s2755_s10 + $0x84] ss:$8 sps:$4 sm:$0xff]  }
 0x2cd   : > { %1947 = vmatprep.mubr.msk.bf16.mxu0 %vm2192_vm0, %v2191_v35 }
 0x35f   : > { %v761_v42 = vpop.f32.mrb[0].mxu0  ;;  %v1210_v43 = vpop.f32.mrb[0].mxu1 }
 0x360   : > { %v1211_v44 = vadd.f32 %v1210_v43, %v839_v38  ;;  %v763_v45 = vpop.f32.mrb[1].mxu0  ;;  %v1212_v46 = vpop.f32.mrb[1].mxu1  ;;  %v762_v47 = vadd.f32 %v761_v42, %v560_v39 }
 0x361   : > { %v1213_v48 = vadd.f32 %v1212_v46, %v843_v40  ;;  %v765_v49 = vpop.f32.mrb[2].mxu0  ;;  %v1214_v50 = vpop.f32.mrb[2].mxu1  ;;  %v764_v52 = vadd.f32 %v763_v45, %v564_v41  ;;  %v2123_v45 = vld [vmem:[%s2755_s10] ss:$8 sps:$4 sm:$0xff]  }
 0x362   : > { %v1260_v51 = vpack.c.bf16 %v1211_v44, %v1211_v44  ;;  %v766_v53 = vpop.f32.mrb[3].mxu0  ;;  %v1215_v54 = vpop.f32.mrb[3].mxu1  ;;  %v768_v56 = vmul.f32 0.088388346, %v762_v47  ;;  %v2128_v47 = vld [vmem:[%s2755_s10 + $0x14] ss:$8 sps:$4 sm:$0xff]  }
 0x363   : > { %v1369_v55 = vpack.c.bf16 %v1213_v48, %v1213_v48  ;;  %v769_v57 = vmul.f32 0.088388346, %v764_v52  ;;  %v2126_v48 = vld [vmem:[%s2755_s10 + $0x10] ss:$8 sps:$4 sm:$0xff]   ;;  %v2131_v49 = vld [vmem:[%s2755_s10 + $0x24] ss:$8 sps:$4 sm:$0xff]  }
 0x364   : > { %1946 = vmatpush3.bf16.xpose.msra.mxu0 %v1260_v51  ;;  %v1259_v58 = vpack.c.bf16 %v768_v56, %v768_v56  ;;  %v2129_v50 = vld [vmem:[%s2755_s10 + $0x20] ss:$8 sps:$4 sm:$0xff]   ;;  %v2134_v51 = vld [vmem:[%s2755_s10 + $0x34] ss:$8 sps:$4 sm:$0xff]   ;;  %v2132_v52 = vld [vmem:[%s2755_s10 + $0x30] ss:$8 sps:$4 sm:$0xff]  }
 0x365   : > { %1958 = vmatpush3.bf16.xpose.msra.mxu1 %v1369_v55  ;;  %1951 = vmatprep.subr.bf16.mxu0 %v2191_v35  ;;  %v1368_v59 = vpack.c.bf16 %v769_v57, %v769_v57  ;;  %v2137_v53 = vld [vmem:[%s2755_s10 + $0x44] ss:$8 sps:$4 sm:$0xff]   ;;  %v2135_v54 = vld [vmem:[%s2755_s10 + $0x40] ss:$8 sps:$4 sm:$0xff]   ;;  %v2140_v55 = vld [vmem:[%s2755_s10 + $0x54] ss:$8 sps:$4 sm:$0xff]  }
 0x366   : > { %1963 = vmatprep.subr.bf16.mxu1 %v2191_v35  ;;  %v2138_v56 = vld [vmem:[%s2755_s10 + $0x50] ss:$8 sps:$4 sm:$0xff]   ;;  %v2143_v57 = vld [vmem:[%s2755_s10 + $0x64] ss:$8 sps:$4 sm:$0xff]  }
 0x36b   : > { %1948 = vmatmul.mubr.bf16.vlgmr.msra.gmra.mrb[8].mxu0 %v1259_v58  ;;  %v2141_v58 = vld [vmem:[%s2755_s10 + $0x60] ss:$8 sps:$4 sm:$0xff]  }
 0x36c   : > { %1960 = vmatmul.mubr.bf16.vlgmr.msra.gmra.mrb[4].mxu1 %v1368_v59  ;;  %1953 = vmatprep.mubr.msk.bf16.mxu0 %vm2192_vm0, %v2191_v35  ;;  %v2146_v59 = vld [vmem:[%s2755_s10 + $0x74] ss:$8 sps:$4 sm:$0xff]  }
 0x36d   : > { %1965 = vmatprep.mubr.msk.bf16.mxu1 %vm2192_vm0, %v2191_v35 }
 0x39f   : > { %v1251_v0 = vpop.f32.mrb[4].mxu0 }
 0x3a0   : > { %v1252_v1 = vadd.f32 %v1251_v0, %v847_v62  ;;  %v1253_v2 = vpop.f32.mrb[5].mxu0  ;;  %v2147_v62 = vld [vmem:[%s2755_s10 + $0x80] ss:$8 sps:$4 sm:$0xff]   ;;  %v2150_v0 = vld [vmem:[%s2755_s10 + $0x90] ss:$8 sps:$4 sm:$0xff]  }
 0x3a1   : > { %v1254_v3 = vadd.f32 %v1253_v2, %v851_v63  ;;  %v1255_v4 = vpop.f32.mrb[6].mxu0  ;;  %v2152_v63 = vld [vmem:[%s2755_s10 + $0x94] ss:$8 sps:$4 sm:$0xff]   ;;  %v2153_v2 = vld [vmem:[%s2755_s10 + $0xa0] ss:$8 sps:$4 sm:$0xff]  }
 0x3a2   : > { %v1320_v5 = vpack.c.bf16 %v1252_v1, %v1252_v1  ;;  %v1256_v6 = vpop.f32.mrb[7].mxu0  ;;  %v2155_v1 = vld [vmem:[%s2755_s10 + $0xa4] ss:$8 sps:$4 sm:$0xff]   ;;  %v2156_v4 = vld [vmem:[%s2755_s10 + $0xb0] ss:$8 sps:$4 sm:$0xff]  }
 0x3a3   : > { %v1422_v7 = vpack.c.bf16 %v1254_v3, %v1254_v3  ;;  %v2158_v3 = vld [vmem:[%s2755_s10 + $0xb4] ss:$8 sps:$4 sm:$0xff]   ;;  %v2159_v6 = vld [vmem:[%s2755_s10 + $0xc0] ss:$8 sps:$4 sm:$0xff]  }
 0x3a4   : > { %v1326_v8 = vsel %vm1324_vm1, %v1320_v5, 0  ;;  %v2161_v5 = vld [vmem:[%s2755_s10 + $0xc4] ss:$8 sps:$4 sm:$0xff]  }
 0x3a5   : > { %v1427_v9 = vsel %vm1324_vm1, %v1422_v7, 0  ;;  %1952 = vmatpush3.bf16.msra.mxu0 %v1326_v8  ;;  %v2164_v7 = vld [vmem:[%s2755_s10 + $0xd4] ss:$8 sps:$4 sm:$0xff]   ;;  %v2162_v8 = vld [vmem:[%s2755_s10 + $0xd0] ss:$8 sps:$4 sm:$0xff]  }
 0x3a6   : > { %1964 = vmatpush3.bf16.msra.mxu1 %v1427_v9  ;;  %v2167_v9 = vld [vmem:[%s2755_s10 + $0xe4] ss:$8 sps:$4 sm:$0xff]  }
 0x3a7   : > { %1675 = vmatprep.subr.bf16.mxu1 %v2125_v37 }
 0x43e   : > { %v1301_v10 = vpop.f32.mrb[8].mxu0 }
 0x43f   : > { %v1302_v11 = vadd.f32 %v1896_v15, %v1301_v10  ;;  %v1949_v12 = vpop.f32.mrb[9].mxu0  ;;  %v1404_v13 = vpop.f32.mrb[4].mxu1  ;;  %v2170_v10 = vld [vmem:[%s2755_s10 + $0xf4] ss:$8 sps:$4 sm:$0xff]  }
 0x440   : > { %v1405_v14 = vadd.f32 %v1896_v15, %v1404_v13  ;;  %v1304_v18 = vpop.f32.mrb[10].mxu0  ;;  %v1961_v19 = vpop.f32.mrb[5].mxu1  ;;  %v2165_v15 = vld [vmem:[%s2755_s10 + $0xe0] ss:$8 sps:$4 sm:$0xff]  }
 0x441   : > { %v1950_v20 = vpop.f32.mrb[11].mxu0  ;;  %v1407_v21 = vpop.f32.mrb[6].mxu1  ;;  %v1308_v22 = vsel %vm1307_vm2, %v1302_v11, -inf }
 0x442   : > { %v1962_v23 = vpop.f32.mrb[7].mxu1  ;;  %1309 = vmax.xlane.f32.xlu1 %v1308_v22  ;;  %v1410_v24 = vsel %vm1307_vm2, %v1405_v14, -inf }
 0x443   : > { %1411 = vmax.xlane.f32.xlu0 %v1410_v24 }
 0x4cf   : > { %v1310_v25 = vpop.xlane.xlu1 %1309 }
 0x4d0   : > { %v1311_v26 = vsub.f32 %v1302_v11, %v1310_v25  ;;  %v1412_v27 = vpop.xlane.xlu0 %1411  ;;  %v2168_v11 = vld [vmem:[%s2755_s10 + $0xf0] ss:$8 sps:$4 sm:$0xff]   ;;  %v1503_v25 = vld [vmem:[%s2756_s11] sm:$0x3] }
 0x4d1   : > { %v1413_v28 = vsub.f32 %v1405_v14, %v1412_v27  ;;  %v1512_v27 = vrot.slane %v1503_v25, %v2280_v17 }
 0x4d2   : > { %v1312_v31 = vmul.f32 1.442695, %v1311_v26  ;;  %v1508_v26 = vrot.slane %v1503_v25, %v2277_v16 }
 0x4d3   : > { %v1414_v32 = vmul.f32 1.442695, %v1413_v28 }
 0x4d4   : > { %2175 = vpow2.f32 %v1312_v31 }
 0x4d5   : > { %2177 = vpow2.f32 %v1414_v32 }
 0x4de   : > { %v2176_v33 = vpop.eup %2175 }
 0x4df   : > { %v2178_v34 = vpop.eup %2177  ;;  %v1314_v35 = vsel %vm1307_vm2, %v2176_v33, 0.0 }
 0x4e0   : > { %1315 = vadd.xlane.f32.xlu1 %v1314_v35  ;;  %v1416_v36 = vsel %vm1307_vm2, %v2178_v34, 0.0 }
 0x4e1   : > { %1417 = vadd.xlane.f32.xlu0 %v1416_v36 }
 0x56d   : > { %v1316_v38 = vpop.xlane.xlu1 %1315 }
 0x56e   : > { %2179 = vrcp.f32 %v1316_v38  ;;  %v1418_v39 = vpop.xlane.xlu0 %1417 }
 0x56f   : > { %2181 = vrcp.f32 %v1418_v39 }
 0x578   : > { %v2180_v40 = vpop.eup %2179 }
 0x579   : > { %v2182_v41 = vpop.eup %2181  ;;  %v1318_v42 = vmul.f32 %v2180_v40, %v2176_v33 }
 0x57a   : > { %v1420_v43 = vmul.f32 %v2182_v41, %v2178_v34 }
 0x57b   : > { %v1319_v44 = vpack.c.bf16 %v1318_v42, %v1318_v42 }
 0x57c   : > { %v1421_v46 = vpack.c.bf16 %v1420_v43, %v1420_v43 }
 0x57d   : > { %1954 = vmatmul.mubr.msk.bf16.vlgmr.msra.gmra.mrb[12].mxu0 %vm1307_vm2, %v1319_v44 }
 0x57e   : > { %1966 = vmatmul.mubr.msk.bf16.vlgmr.msra.gmra.mrb[8].mxu1 %vm1307_vm2, %v1421_v46 }
 0x57f   : > { %1676 = vmatpush1.bf16.msra.mxu1 %v2123_v45 }
 0x580   : > { %1677 = vmatprep.subr.bf16.mxu1 %v2128_v47 }
 0x583   : > { %1678 = vmatpush1.bf16.msra.mxu1 %v2126_v48 }
 0x584   : > { %1679 = vmatprep.subr.bf16.mxu1 %v2131_v49 }
 0x587   : > { %1680 = vmatpush1.bf16.msra.mxu1 %v2129_v50 }
 0x588   : > { %1681 = vmatprep.subr.bf16.mxu1 %v2134_v51 }
 0x58b   : > { %1682 = vmatpush1.bf16.msra.mxu1 %v2132_v52 }
 0x58c   : > { %1683 = vmatprep.subr.bf16.mxu1 %v2137_v53 }
 0x58f   : > { %1684 = vmatpush1.bf16.msra.mxu1 %v2135_v54 }
 0x590   : > { %1685 = vmatprep.subr.bf16.mxu1 %v2140_v55 }
 0x593   : > { %1686 = vmatpush1.bf16.msra.mxu1 %v2138_v56 }
 0x594   : > { %1687 = vmatprep.subr.bf16.mxu1 %v2143_v57 }
 0x597   : > { %1688 = vmatpush1.bf16.msra.mxu1 %v2141_v58 }
 0x598   : > { %1689 = vmatprep.subr.bf16.mxu1 %v2146_v59 }
 0x59b   : > { %1690 = vmatpush1.bf16.msra.mxu1 %v2144_v60 }
 0x59c   : > { %1691 = vmatprep.subr.bf16.mxu1 %v2149_v61 }
 0x59f   : > { %1692 = vmatpush1.bf16.msra.mxu1 %v2147_v62 }
 0x5a0   : > { %1693 = vmatprep.subr.bf16.mxu1 %v2152_v63 }
 0x5a3   : > { %1694 = vmatpush1.bf16.msra.mxu1 %v2150_v0 }
 0x5a4   : > { %1695 = vmatprep.subr.bf16.mxu1 %v2155_v1 }
 0x5a7   : > { %1696 = vmatpush1.bf16.msra.mxu1 %v2153_v2 }
 0x5a8   : > { %1697 = vmatprep.subr.bf16.mxu1 %v2158_v3 }
 0x5ab   : > { %1698 = vmatpush1.bf16.msra.mxu1 %v2156_v4 }
 0x5ac   : > { %1699 = vmatprep.subr.bf16.mxu1 %v2161_v5 }
 0x5af   : > { %1700 = vmatpush1.bf16.msra.mxu1 %v2159_v6 }
 0x5b0   : > { %1701 = vmatprep.subr.bf16.mxu1 %v2164_v7 }
 0x5b3   : > { %1702 = vmatpush1.bf16.msra.mxu1 %v2162_v8 }
 0x5b4   : > { %1703 = vmatprep.subr.bf16.mxu1 %v2167_v9 }
 0x5b7   : > { %1704 = vmatpush1.bf16.msra.mxu1 %v2165_v15 }
 0x5b8   : > { %1705 = vmatprep.subr.bf16.mxu1 %v2170_v10 }
 0x5bb   : > { %1706 = vmatpush1.bf16.msra.mxu1 %v2168_v11 }
 0x650   : > { %v1362_v12 = vpop.f32.mrb[12].mxu0 }
 0x651   : > { %v1955_v13 = vpop.f32.mrb[13].mxu0  ;;  %v1463_v14 = vpop.f32.mrb[8].mxu1  ;;  %v1469_v21 = vpack.c.bf16 %v1362_v12, %v1362_v12 }
 0x652   : > { %v1470_v18 = vpack.c.bf16 %v1463_v14, %v1463_v14  ;;  %v1365_v19 = vpop.f32.mrb[14].mxu0  ;;  %v1967_v20 = vpop.f32.mrb[9].mxu1 }
 0x653   : > { %v1956_v22 = vpop.f32.mrb[15].mxu0  ;;  %v1466_v23 = vpop.f32.mrb[10].mxu1 }
 0x654   : > { %v1968_v24 = vpop.f32.mrb[11].mxu1  ;;  %1707 = vmatprep.mubr.bf16.mxu1 %v1470_v18 }
 0x655   : > { %1708 = vmatmul.mubr.bf16.vlgmr.msra.gmra.mrb[12].mxu1 %v1469_v21 }
 0x728   : > { %v1709_v28 = vpop.f32.mrb[12].mxu1 }
 0x729   : > { %v1710_v31 = vadd.f32 %v1709_v28, %v1508_v26  ;;  %v1711_v32 = vpop.f32.mrb[13].mxu1 }
 0x72a   : > { %v1712_v33 = vadd.f32 %v1711_v32, %v1512_v27  ;;  %v1713_v34 = vpop.f32.mrb[14].mxu1 }
 0x72b   : > { %v1716_v35 = vadd.f32 %v1710_v31, %v2292_v29  ;;  %v1714_v36 = vpop.f32.mrb[15].mxu1 }
 0x72c   : > { %v1717_v37 = vadd.f32 %v1712_v33, %v2294_v30 }
 0x72e   : > { %v1936_v38 = vpack.c.bf16 %v1717_v37, %v1716_v35 }
 0x730   : > { %1726 = vst [vmem:[%s427_s14] sm:$0xff] %v1936_v38 }
 0x731 PF: > { %s22_s21 = sadd.s32 1, %s2189_s21  }
 0x732   : > { %p19_p4 = scmp.ge.s32.totalorder %s22_s21, 4  }
 0x734   :  { %21 = sbr.rel (!%p19_p4) target bundleno = 1 (0x1), region = 101 }

// kernel: mbart_forward.9
= control target key start
LH: loop header
LB: loop body
LE: loop exit
PB: predicated region body
PF: predicated region fallthrough
CT: control target
= control target key end

     0   :  { %s2332_s17 = smov 0   ;;  %s2334_s18 = smov 0   ;;  %s2841_s0 = inlined_call_operand.vmem [shape: bf16[2,8,256], index: 0, kind: input, shape index: {}]   ;;  %s2842_s1 = inlined_call_operand.vmem [shape: bf16[2,8,256], index: 1, kind: input, shape index: {}]   ;;  %s2843_s2 = inlined_call_operand.vmem [shape: f32[2,1,8], index: 2, kind: input, shape index: {}]   ;;  %s2844_s3 = inlined_call_operand.vmem [shape: f32[1,256], index: 3, kind: input, shape index: {}]   ;;  %s2845_s4 = inlined_call_operand.vmem [shape: f32[1,256], index: 4, kind: input, shape index: {}]   ;;  %s2846_s5 = inlined_call_operand.vmem [shape: bf16[256,256], index: 5, kind: input, shape index: {}]   ;;  %s2847_s6 = inlined_call_operand.vmem [shape: f32[1,256], index: 6, kind: input, shape index: {}]   ;;  %s2848_s7 = inlined_call_operand.vmem [shape: bf16[256,512], index: 7, kind: input, shape index: {}]   ;;  %s2849_s8 = inlined_call_operand.vmem [shape: f32[1,512], index: 8, kind: input, shape index: {}]   ;;  %s2850_s9 = inlined_call_operand.vmem [shape: bf16[256,256], index: 9, kind: input, shape index: {}]   ;;  %s2851_s10 = inlined_call_operand.vmem [shape: f32[1,256], index: 10, kind: input, shape index: {}]   ;;  %s2852_s11 = inlined_call_operand.vmem [shape: bf16[2,8,256], index: 11, kind: output, shape index: {}]  }
   0x1   :  { %s2336_s19 = smov 0  }
   0x2 LB: > { %s33_s20 = sadd.s32 1, %s2264_s18  ;;  %p1837_p0 = scmp.ge.s32.totalorder %s2268_s19, 1  ;;  %s2268_s19 = sphi %s2336_s19, %s21_s19   ;;  %s2264_s18 = sphi %s2334_s18, %s2854_s18   ;;  %s2260_s17 = sphi %s2332_s17, %s2853_s17  }
   0x3   : > { %p35_p1 = scmp.ge.s32.totalorder %s33_s20, 2  ;;  %p375_p2 = scmp.lt.s32.totalorder %s2268_s19, 3 }
   0x5   : > { %s2856_s20 = smov (%p35_p1, %s33_s20), 0  ;;  %p376_p3 = pnand %p1837_p0, %p375_p2 }
   0x6   : > { %p431_p4 = scmp.lt.s32.totalorder (!%p376_p3), %s2260_s17, 1  ;;  %v2042_v4 = vld [vmem:[%s2848_s7 + $0x4] ss:$16 sps:$4 sm:$0xff] (!%p376_p3)   ;;  %v2044_v5 = vld [vmem:[%s2848_s7] ss:$16 sps:$4 sm:$0xff] (!%p376_p3)   ;;  %vm2271_vm0 = vmmov (!%p376_p3), 0  }
   0x7   : > { %379 = sbr.rel (%p376_p3) target bundleno = 1525 (0x5f5), region = 64  ;;  %v2045_v6 = vld [vmem:[%s2848_s7 + $0x24] ss:$16 sps:$4 sm:$0xff] (!%p376_p3)   ;;  %1169 = vmatprep.subr.bf16.mxu1 (!%p376_p3), %v2042_v4  ;;  %v2053_v8 = vld [vmem:[%s2846_s5] ss:$8 sps:$4 sm:$0xff] (!%p376_p3)   ;;  %vm1317_vm1 = vcmask (!%p376_p3), 1043456  }
   0x8   : > { %v2050_v7 = vld [vmem:[%s2846_s5 + $0x4] ss:$8 sps:$4 sm:$0xff] (!%p376_p3)   ;;  %1170 = vmatpush1.bf16.msra.mxu1 (!%p376_p3), %v2044_v5  ;;  %v2047_v9 = vld [vmem:[%s2848_s7 + $0x20] ss:$16 sps:$4 sm:$0xff] (!%p376_p3)   ;;  %v2056_v10 = vld [vmem:[%s2846_s5 + $0x14] ss:$8 sps:$4 sm:$0xff] (!%p376_p3)  }
   0x9   : > { %713 = vmatprep.subr.bf16.mxu0 (!%p376_p3), %v2050_v7  ;;  %1171 = vmatprep.subr.bf16.mxu1 (!%p376_p3), %v2045_v6  ;;  %v2048_v11 = vld [vmem:[%s2848_s7 + $0x44] ss:$16 sps:$4 sm:$0xff] (!%p376_p3)   ;;  %v2059_v12 = vld [vmem:[%s2846_s5 + $0x10] ss:$8 sps:$4 sm:$0xff] (!%p376_p3)   ;;  %v2065_v16 = vld [vmem:[%s2846_s5 + $0x20] ss:$8 sps:$4 sm:$0xff] (!%p376_p3)  }
   0xa   : > { %714 = vmatpush1.bf16.msra.mxu0 (!%p376_p3), %v2053_v8  ;;  %v2062_v13 = vld [vmem:[%s2846_s5 + $0x24] ss:$8 sps:$4 sm:$0xff] (!%p376_p3)   ;;  %v2052_v14 = vld [vmem:[%s2848_s7 + $0x40] ss:$16 sps:$4 sm:$0xff] (!%p376_p3)   ;;  %v2068_v17 = vld [vmem:[%s2846_s5 + $0x34] ss:$8 sps:$4 sm:$0xff] (!%p376_p3)  }
   0xb   : > { %715 = vmatprep.subr.bf16.mxu0 (!%p376_p3), %v2056_v10  ;;  %v2054_v15 = vld [vmem:[%s2848_s7 + $0x64] ss:$16 sps:$4 sm:$0xff] (!%p376_p3)   ;;  %v2058_v18 = vld [vmem:[%s2848_s7 + $0x60] ss:$16 sps:$4 sm:$0xff] (!%p376_p3)   ;;  %vm1300_vm2 = vcmask (!%p376_p3), 64512  }
   0xc   : > { %1172 = vmatpush1.bf16.msra.mxu1 (!%p376_p3), %v2047_v9  ;;  %v2060_v19 = vld [vmem:[%s2848_s7 + $0x84] ss:$16 sps:$4 sm:$0xff] (!%p376_p3)   ;;  %v2071_v20 = vld [vmem:[%s2846_s5 + $0x30] ss:$8 sps:$4 sm:$0xff] (!%p376_p3)   ;;  %v2077_v24 = vld [vmem:[%s2846_s5 + $0x40] ss:$8 sps:$4 sm:$0xff] (!%p376_p3)  }
   0xd   : > { %1173 = vmatprep.subr.bf16.mxu1 (!%p376_p3), %v2048_v11  ;;  %v2074_v21 = vld [vmem:[%s2846_s5 + $0x44] ss:$8 sps:$4 sm:$0xff] (!%p376_p3)   ;;  %v2064_v22 = vld [vmem:[%s2848_s7 + $0x80] ss:$16 sps:$4 sm:$0xff] (!%p376_p3)   ;;  %v2080_v25 = vld [vmem:[%s2846_s5 + $0x54] ss:$8 sps:$4 sm:$0xff] (!%p376_p3)  }
   0xe   : > { %s2858_s17 = smov (!%p431_p4, %s2260_s17), 1  ;;  %716 = vmatpush1.bf16.msra.mxu0 %v2059_v12  ;;  %v2066_v23 = vld [vmem:[%s2848_s7 + $0xa4] ss:$16 sps:$4 sm:$0xff]   ;;  %v2070_v26 = vld [vmem:[%s2848_s7 + $0xa0] ss:$16 sps:$4 sm:$0xff]  }
   0xf   : > { %s2353_s21 = sshll.u32 %s2858_s17, 3  ;;  %717 = vmatprep.subr.bf16.mxu0 %v2062_v13  ;;  %v2072_v27 = vld [vmem:[%s2848_s7 + $0xc4] ss:$16 sps:$4 sm:$0xff]   ;;  %v2083_v28 = vld [vmem:[%s2846_s5 + $0x50] ss:$8 sps:$4 sm:$0xff]   ;;  %s447_s15 = scalar_lea.vmem %s2843_s2, %s2858_s17 }
  0x10   : > { %s439_s24 = scalar_lea.vmem %s2841_s0, %s2353_s21  ;;  %1174 = vmatpush1.bf16.msra.mxu1 %v2052_v14  ;;  %v2086_v29 = vld [vmem:[%s2846_s5 + $0x64] ss:$8 sps:$4 sm:$0xff]   ;;  %v2076_v30 = vld [vmem:[%s2848_s7 + $0xc0] ss:$16 sps:$4 sm:$0xff]   ;;  %v2092_v33 = vld [vmem:[%s2846_s5 + $0x74] ss:$8 sps:$4 sm:$0xff]   ;;  %s444_s23 = scalar_lea.vmem %s2842_s1, %s2353_s21 }
  0x11   : > { %v458_v0 = vld [vmem:[%s439_s24] sm:$0xff]  ;;  %1175 = vmatprep.subr.bf16.mxu1 %v2054_v15  ;;  %v2095_v36 = vld [vmem:[%s2846_s5 + $0x70] ss:$8 sps:$4 sm:$0xff]   ;;  %v2104_v41 = vld [vmem:[%s2846_s5 + $0x94] ss:$8 sps:$4 sm:$0xff]   ;;  %s456_s28 = scalar_lea.vmem %s2852_s11, %s2353_s21 }
  0x12   : > { %v2359_v1 = vunpack.c.l.bf16 %v458_v0  ;;  %v2361_v2 = vunpack.c.h.bf16 %v458_v0  ;;  %718 = vmatpush1.bf16.msra.mxu0 %v2065_v16  ;;  %v2078_v31 = vld [vmem:[%s2848_s7 + $0xe4] ss:$16 sps:$4 sm:$0xff]   ;;  %v2089_v32 = vld [vmem:[%s2846_s5 + $0x60] ss:$8 sps:$4 sm:$0xff]   ;;  %v2107_v44 = vld [vmem:[%s2846_s5 + $0x90] ss:$8 sps:$4 sm:$0xff]  }
  0x13   : > { %719 = vmatprep.subr.bf16.mxu0 %v2068_v17  ;;  %v2082_v34 = vld [vmem:[%s2848_s7 + $0xe0] ss:$16 sps:$4 sm:$0xff]   ;;  %v2084_v35 = vld [vmem:[%s2848_s7 + $0x104] ss:$16 sps:$4 sm:$0xff]   ;;  %v2142_v16 = vld [vmem:[%s2848_s7 + $0xc] ss:$16 sps:$4 sm:$0xff]  }
  0x14   : > { %v463_v3 = vadd.f32 %v2361_v2, %v2359_v1  ;;  %1176 = vmatpush1.bf16.msra.mxu1 %v2058_v18  ;;  %v2098_v37 = vld [vmem:[%s2846_s5 + $0x84] ss:$8 sps:$4 sm:$0xff]   ;;  %v2088_v38 = vld [vmem:[%s2848_s7 + $0x100] ss:$16 sps:$4 sm:$0xff]   ;;  %v2116_v60 = vld [vmem:[%s2846_s5 + $0xb4] ss:$8 sps:$4 sm:$0xff]  }
  0x15   : > { %1177 = vmatprep.subr.bf16.mxu1 %v2060_v19  ;;  %v2090_v39 = vld [vmem:[%s2848_s7 + $0x124] ss:$16 sps:$4 sm:$0xff]   ;;  %v2101_v40 = vld [vmem:[%s2846_s5 + $0x80] ss:$8 sps:$4 sm:$0xff]   ;;  %v2119_v62 = vld [vmem:[%s2846_s5 + $0xb0] ss:$8 sps:$4 sm:$0xff]  }
  0x16   : > { %464 = vadd.xlane.f32.xlu0 %v463_v3  ;;  %720 = vmatpush1.bf16.msra.mxu0 %v2071_v20  ;;  %v2094_v42 = vld [vmem:[%s2848_s7 + $0x120] ss:$16 sps:$4 sm:$0xff]   ;;  %v2096_v43 = vld [vmem:[%s2848_s7 + $0x144] ss:$16 sps:$4 sm:$0xff]   ;;  %v2270_v17 = vmov 0.0   ;;  %v481_v20 = vlaneseq }
  0x17   : > { %721 = vmatprep.subr.bf16.mxu0 %v2074_v21  ;;  %v2100_v45 = vld [vmem:[%s2848_s7 + $0x140] ss:$16 sps:$4 sm:$0xff]   ;;  %v2102_v46 = vld [vmem:[%s2848_s7 + $0x164] ss:$16 sps:$4 sm:$0xff]  }
  0x18   : > { %1178 = vmatpush1.bf16.msra.mxu1 %v2064_v22  ;;  %v2106_v47 = vld [vmem:[%s2848_s7 + $0x160] ss:$16 sps:$4 sm:$0xff]   ;;  %v2108_v48 = vld [vmem:[%s2848_s7 + $0x184] ss:$16 sps:$4 sm:$0xff]   ;;  %v2578_v22 = vshrl.u32 %v481_v20, 7 }
  0x19   : > { %1179 = vmatprep.subr.bf16.mxu1 %v2066_v23  ;;  %v2110_v56 = vld [vmem:[%s2846_s5 + $0xa4] ss:$8 sps:$4 sm:$0xff]   ;;  %v2112_v57 = vld [vmem:[%s2848_s7 + $0x180] ss:$16 sps:$4 sm:$0xff]   ;;  %v2128_v6 = vld [vmem:[%s2846_s5 + $0xd4] ss:$8 sps:$4 sm:$0xff]  }
  0x1a   : > { %722 = vmatpush1.bf16.msra.mxu0 %v2077_v24  ;;  %v2113_v58 = vld [vmem:[%s2846_s5 + $0xa0] ss:$8 sps:$4 sm:$0xff]   ;;  %v2114_v59 = vld [vmem:[%s2848_s7 + $0x1a4] ss:$16 sps:$4 sm:$0xff]   ;;  %v2131_v10 = vld [vmem:[%s2846_s5 + $0xd0] ss:$8 sps:$4 sm:$0xff]  }
  0x1b   : > { %723 = vmatprep.subr.bf16.mxu0 %v2080_v25  ;;  %v2118_v61 = vld [vmem:[%s2848_s7 + $0x1a0] ss:$16 sps:$4 sm:$0xff]   ;;  %v2120_v63 = vld [vmem:[%s2848_s7 + $0x1c4] ss:$16 sps:$4 sm:$0xff]   ;;  %v2581_v23 = vsub.s32 0, %v2578_v22  ;;  %v2584_v24 = vsub.s32 1, %v2578_v22 }
  0x1c   : > { %1180 = vmatpush1.bf16.msra.mxu1 %v2070_v26  ;;  %v2122_v0 = vld [vmem:[%s2846_s5 + $0xc4] ss:$8 sps:$4 sm:$0xff]   ;;  %v2124_v3 = vld [vmem:[%s2848_s7 + $0x1c0] ss:$16 sps:$4 sm:$0xff]   ;;  %v2137_v14 = vld [vmem:[%s2846_s5 + $0xf4] ss:$8 sps:$4 sm:$0xff]  }
  0x1d   : > { %1181 = vmatprep.subr.bf16.mxu1 %v2072_v27  ;;  %v2125_v4 = vld [vmem:[%s2846_s5 + $0xc0] ss:$8 sps:$4 sm:$0xff]   ;;  %v2126_v5 = vld [vmem:[%s2848_s7 + $0x1e4] ss:$16 sps:$4 sm:$0xff]   ;;  %v2139_v15 = vld [vmem:[%s2846_s5 + $0xf0] ss:$8 sps:$4 sm:$0xff]  }
  0x1e   : > { %724 = vmatpush1.bf16.msra.mxu0 %v2083_v28  ;;  %v506_v7 = vld [vmem:[%s444_s23] sm:$0xff] }
  0x1f   : > { %725 = vmatprep.subr.bf16.mxu0 %v2086_v29  ;;  %v1877_v8 = vcombine.high %v506_v7, %v506_v7  ;;  %v2130_v9 = vld [vmem:[%s2848_s7 + $0x1e0] ss:$16 sps:$4 sm:$0xff]   ;;  %v2134_v11 = vld [vmem:[%s2846_s5 + $0xe4] ss:$8 sps:$4 sm:$0xff]   ;;  %v2562_v12 = vcombine.low %v506_v7, %v506_v7 }
  0x20   : > { %1182 = vmatpush1.bf16.msra.mxu1 %v2076_v30  ;;  %v2136_v13 = vld [vmem:[%s2846_s5 + $0xe0] ss:$8 sps:$4 sm:$0xff]   ;;  %v2187_v7 = vld [vmem:[%s2848_s7 + $0x1ec] ss:$16 sps:$4 sm:$0xff]  }
  0x21   : > { %1183 = vmatprep.subr.bf16.mxu1 %v2078_v31  ;;  %1201 = vmatprep.mubr.bf16.mxu1 %v1877_v8  ;;  %v461_v25 = vld [vmem:[%s2844_s3] sm:$0x3] }
  0x22   : > { %726 = vmatpush1.bf16.msra.mxu0 %v2089_v32  ;;  %v462_v26 = vld [vmem:[%s2845_s4] sm:$0x3]  ;;  %v484_v27 = vrot.slane %v461_v25, %v2581_v23  ;;  %v488_v28 = vrot.slane %v461_v25, %v2584_v24 }
  0x23   : > { %727 = vmatprep.subr.bf16.mxu0 %v2092_v33  ;;  %v497_v31 = vrot.slane %v462_v26, %v2581_v23  ;;  %v501_v32 = vrot.slane %v462_v26, %v2584_v24 }
  0x24   : > { %1184 = vmatpush1.bf16.msra.mxu1 %v2082_v34 }
  0x25   : > { %1185 = vmatprep.subr.bf16.mxu1 %v2084_v35 }
  0x26   : > { %728 = vmatpush1.bf16.msra.mxu0 %v2095_v36 }
  0x27   : > { %729 = vmatprep.subr.bf16.mxu0 %v2098_v37 }
  0x28   : > { %1186 = vmatpush1.bf16.msra.mxu1 %v2088_v38 }
  0x29   : > { %1187 = vmatprep.subr.bf16.mxu1 %v2090_v39 }
  0x2a   : > { %730 = vmatpush1.bf16.msra.mxu0 %v2101_v40  ;;  %v2140_v40 = vld [vmem:[%s2848_s7 + $0x8] ss:$16 sps:$4 sm:$0xff]  }
  0x2b   : > { %731 = vmatprep.subr.bf16.mxu0 %v2104_v41  ;;  %v2145_v41 = vld [vmem:[%s2848_s7 + $0x2c] ss:$16 sps:$4 sm:$0xff]  }
  0x2c   : > { %1188 = vmatpush1.bf16.msra.mxu1 %v2094_v42  ;;  %v2143_v42 = vld [vmem:[%s2848_s7 + $0x28] ss:$16 sps:$4 sm:$0xff]  }
  0x2d   : > { %1189 = vmatprep.subr.bf16.mxu1 %v2096_v43  ;;  %v2148_v43 = vld [vmem:[%s2848_s7 + $0x4c] ss:$16 sps:$4 sm:$0xff]  }
  0x2e   : > { %732 = vmatpush1.bf16.msra.mxu0 %v2107_v44  ;;  %v2146_v44 = vld [vmem:[%s2848_s7 + $0x48] ss:$16 sps:$4 sm:$0xff]  }
  0x2f   : > { %733 = vmatprep.subr.bf16.mxu0 %v2110_v56  ;;  %v2164_v56 = vld [vmem:[%s2848_s7 + $0x108] ss:$16 sps:$4 sm:$0xff]  }
  0x30   : > { %1190 = vmatpush1.bf16.msra.mxu1 %v2100_v45  ;;  %v2151_v45 = vld [vmem:[%s2848_s7 + $0x6c] ss:$16 sps:$4 sm:$0xff]  }
  0x31   : > { %1191 = vmatprep.subr.bf16.mxu1 %v2102_v46  ;;  %v2149_v46 = vld [vmem:[%s2848_s7 + $0x68] ss:$16 sps:$4 sm:$0xff]  }
  0x32   : > { %734 = vmatpush1.bf16.msra.mxu0 %v2113_v58  ;;  %v2167_v58 = vld [vmem:[%s2848_s7 + $0x128] ss:$16 sps:$4 sm:$0xff]  }
  0x33   : > { %735 = vmatprep.subr.bf16.mxu0 %v2116_v60  ;;  %v2170_v60 = vld [vmem:[%s2848_s7 + $0x148] ss:$16 sps:$4 sm:$0xff]  }
  0x34   : > { %1192 = vmatpush1.bf16.msra.mxu1 %v2106_v47  ;;  %v2154_v47 = vld [vmem:[%s2848_s7 + $0x8c] ss:$16 sps:$4 sm:$0xff]  }
  0x35   : > { %1193 = vmatprep.subr.bf16.mxu1 %v2108_v48  ;;  %v2152_v48 = vld [vmem:[%s2848_s7 + $0x88] ss:$16 sps:$4 sm:$0xff]  }
  0x36   : > { %736 = vmatpush1.bf16.msra.mxu0 %v2119_v62  ;;  %v2173_v62 = vld [vmem:[%s2848_s7 + $0x168] ss:$16 sps:$4 sm:$0xff]  }
  0x37   : > { %737 = vmatprep.subr.bf16.mxu0 %v2122_v0  ;;  %v2176_v0 = vld [vmem:[%s2848_s7 + $0x188] ss:$16 sps:$4 sm:$0xff]  }
  0x38   : > { %1194 = vmatpush1.bf16.msra.mxu1 %v2112_v57  ;;  %v2169_v57 = vld [vmem:[%s2848_s7 + $0x12c] ss:$16 sps:$4 sm:$0xff]  }
  0x39   : > { %1195 = vmatprep.subr.bf16.mxu1 %v2114_v59  ;;  %v2172_v59 = vld [vmem:[%s2848_s7 + $0x14c] ss:$16 sps:$4 sm:$0xff]  }
  0x3a   : > { %738 = vmatpush1.bf16.msra.mxu0 %v2125_v4  ;;  %v2179_v4 = vld [vmem:[%s2848_s7 + $0x1a8] ss:$16 sps:$4 sm:$0xff]  }
  0x3b   : > { %739 = vmatprep.subr.bf16.mxu0 %v2128_v6  ;;  %v2182_v6 = vld [vmem:[%s2848_s7 + $0x1c8] ss:$16 sps:$4 sm:$0xff]  }
  0x3c   : > { %1196 = vmatpush1.bf16.msra.mxu1 %v2118_v61  ;;  %v2175_v61 = vld [vmem:[%s2848_s7 + $0x16c] ss:$16 sps:$4 sm:$0xff]  }
  0x3d   : > { %1197 = vmatprep.subr.bf16.mxu1 %v2120_v63  ;;  %v2178_v63 = vld [vmem:[%s2848_s7 + $0x18c] ss:$16 sps:$4 sm:$0xff]  }
  0x3e   : > { %740 = vmatpush1.bf16.msra.mxu0 %v2131_v10 }
  0x3f   : > { %741 = vmatprep.subr.bf16.mxu0 %v2134_v11 }
  0x40   : > { %1198 = vmatpush1.bf16.msra.mxu1 %v2124_v3  ;;  %v2181_v3 = vld [vmem:[%s2848_s7 + $0x1ac] ss:$16 sps:$4 sm:$0xff]  }
  0x41   : > { %1199 = vmatprep.subr.bf16.mxu1 %v2126_v5  ;;  %v2184_v5 = vld [vmem:[%s2848_s7 + $0x1cc] ss:$16 sps:$4 sm:$0xff]  }
  0x42   : > { %742 = vmatpush1.bf16.msra.mxu0 %v2136_v13 }
  0x43   : > { %743 = vmatprep.subr.bf16.mxu0 %v2137_v14 }
  0x44   : > { %1200 = vmatpush1.bf16.msra.mxu1 %v2130_v9  ;;  %v820_v9 = vld [vmem:[%s2849_s8] sm:$0xf] }
  0x45   : > { %2004 = vmatprep.subr.bf16.mxu1 %v2270_v17  ;;  %v825_v10 = vrot.slane %v820_v9, %v2581_v23  ;;  %v829_v11 = vrot.slane %v820_v9, %v2584_v24 }
  0x46   : > { %744 = vmatpush1.bf16.msra.mxu0 %v2139_v15 }
  0x47   : > { %1202 = vmatmul.mubr.bf16.vlgmr.msra.gmra.mrb[0].mxu1 %v2562_v12  ;;  %1210 = vmatprep.subr.bf16.mxu0 %v2142_v16 }
  0x48   : > { %2006 = vmatprep.mubr.msk.bf16.mxu1 %vm2271_vm0, %v2270_v17 }
  0xa3   : > { %v465_v49 = vpop.xlane.xlu0 %464 }
  0xa4   : > { %v467_v50 = vmul.f32 0.00390625, %v465_v49  ;;  %v2157_v49 = vld [vmem:[%s2848_s7 + $0xac] ss:$16 sps:$4 sm:$0xff]  }
  0xa6   : > { %v2501_v51 = vsub.f32 %v2359_v1, %v467_v50  ;;  %v2504_v52 = vsub.f32 %v2361_v2, %v467_v50  ;;  %v2155_v50 = vld [vmem:[%s2848_s7 + $0xa8] ss:$16 sps:$4 sm:$0xff]  }
  0xa8   : > { %v470_v53 = vmul.f32 %v2501_v51, %v2501_v51  ;;  %v471_v54 = vmul.f32 %v2504_v52, %v2504_v52 }
  0xaa   : > { %v472_v55 = vadd.f32 %v471_v54, %v470_v53  ;;  %v2163_v53 = vld [vmem:[%s2848_s7 + $0xec] ss:$16 sps:$4 sm:$0xff]   ;;  %v2161_v54 = vld [vmem:[%s2848_s7 + $0xe8] ss:$16 sps:$4 sm:$0xff]  }
  0xac   : > { %473 = vadd.xlane.f32.xlu0 %v472_v55  ;;  %v2166_v55 = vld [vmem:[%s2848_s7 + $0x10c] ss:$16 sps:$4 sm:$0xff]  }
 0x11a   : > { %v1203_v13 = vpop.f32.mrb[0].mxu1 }
 0x11b   : > { %v1204_v14 = vadd.f32 %v1203_v13, %v825_v10  ;;  %v1205_v15 = vpop.f32.mrb[1].mxu1  ;;  %v2190_v10 = vld [vmem:[%s2850_s9 + $0x4] ss:$8 sps:$4 sm:$0xff]  }
 0x11c   : > { %v1206_v16 = vadd.f32 %v1205_v15, %v829_v11 }
 0x139   : > { %v474_v18 = vpop.xlane.xlu0 %473 }
 0x13a   : > { %v475_v19 = vmul.f32 0.00390625, %v474_v18  ;;  %v1207_v18 = vpop.f32.mrb[2].mxu1 }
 0x13b   : > { %v1208_v20 = vpop.f32.mrb[3].mxu1 }
 0x13c   : > { %v476_v21 = vadd.f32 1e-05, %v475_v19  ;;  %v1253_v19 = vpack.c.bf16 %v1204_v14, %v1204_v14 }
 0x13e   : > { %2236 = vrsqrt.f32 %v476_v21  ;;  %v1362_v21 = vpack.c.bf16 %v1206_v16, %v1206_v16  ;;  %v2188_v16 = vld [vmem:[%s2850_s9] ss:$8 sps:$4 sm:$0xff]  }
 0x140   : > { %2005 = vmatpush3.bf16.xpose.msra.mxu1 %v1362_v21 }
 0x141   : > { %2010 = vmatprep.subr.bf16.mxu1 %v2270_v17 }
 0x148   : > { %v2237_v29 = vpop.eup %2236 }
 0x149   : > { %v479_v30 = vmul.f32 %v2237_v29, %v2504_v52  ;;  %v478_v33 = vmul.f32 %v2237_v29, %v2501_v51  ;;  %v2160_v51 = vld [vmem:[%s2848_s7 + $0xcc] ss:$16 sps:$4 sm:$0xff]   ;;  %v2158_v52 = vld [vmem:[%s2848_s7 + $0xc8] ss:$16 sps:$4 sm:$0xff]  }
 0x14b   : > { %v492_v34 = vmul.f32 %v488_v28, %v479_v30  ;;  %v491_v35 = vmul.f32 %v484_v27, %v478_v33 }
 0x14d   : > { %v505_v36 = vadd.f32 %v501_v32, %v492_v34  ;;  %v504_v37 = vadd.f32 %v497_v31, %v491_v35 }
 0x14f   : > { %v508_v38 = vpack.c.bf16 %v505_v36, %v505_v36  ;;  %v507_v39 = vpack.c.bf16 %v504_v37, %v504_v37  ;;  %v832_v37 = vsub.s32 2, %v2578_v22 }
 0x151   : > { %745 = vmatprep.mubr.bf16.mxu0 %v508_v38  ;;  %v836_v38 = vsub.s32 3, %v2578_v22 }
 0x152   : > { %746 = vmatmul.mubr.bf16.vlgmr.msra.gmra.mrb[0].mxu0 %v507_v39  ;;  %v833_v39 = vrot.slane %v820_v9, %v832_v37  ;;  %v2209_v37 = vld [vmem:[%s2850_s9 + $0x70] ss:$8 sps:$4 sm:$0xff]  }
 0x153   : > { %1211 = vmatpush1.bf16.msra.mxu0 %v2140_v40  ;;  %1242 = vmatprep.mubr.bf16.mxu0 %v1877_v8  ;;  %v2185_v8 = vld [vmem:[%s2848_s7 + $0x1e8] ss:$16 sps:$4 sm:$0xff]   ;;  %v837_v40 = vrot.slane %v820_v9, %v836_v38  ;;  %v2214_v38 = vld [vmem:[%s2850_s9 + $0x84] ss:$8 sps:$4 sm:$0xff]  }
 0x154   : > { %1212 = vmatprep.subr.bf16.mxu0 %v2145_v41 }
 0x157   : > { %1213 = vmatpush1.bf16.msra.mxu0 %v2143_v42 }
 0x158   : > { %1214 = vmatprep.subr.bf16.mxu0 %v2148_v43 }
 0x15b   : > { %1215 = vmatpush1.bf16.msra.mxu0 %v2146_v44 }
 0x15c   : > { %1216 = vmatprep.subr.bf16.mxu0 %v2151_v45 }
 0x15f   : > { %1217 = vmatpush1.bf16.msra.mxu0 %v2149_v46 }
 0x160   : > { %1218 = vmatprep.subr.bf16.mxu0 %v2154_v47 }
 0x163   : > { %1219 = vmatpush1.bf16.msra.mxu0 %v2152_v48 }
 0x164   : > { %1220 = vmatprep.subr.bf16.mxu0 %v2157_v49 }
 0x167   : > { %1221 = vmatpush1.bf16.msra.mxu0 %v2155_v50 }
 0x168   : > { %1222 = vmatprep.subr.bf16.mxu0 %v2160_v51 }
 0x16b   : > { %1223 = vmatpush1.bf16.msra.mxu0 %v2158_v52 }
 0x16c   : > { %1224 = vmatprep.subr.bf16.mxu0 %v2163_v53 }
 0x16f   : > { %1225 = vmatpush1.bf16.msra.mxu0 %v2161_v54 }
 0x170   : > { %1226 = vmatprep.subr.bf16.mxu0 %v2166_v55 }
 0x173   : > { %1227 = vmatpush1.bf16.msra.mxu0 %v2164_v56 }
 0x174   : > { %1228 = vmatprep.subr.bf16.mxu0 %v2169_v57 }
 0x177   : > { %1229 = vmatpush1.bf16.msra.mxu0 %v2167_v58 }
 0x178   : > { %1230 = vmatprep.subr.bf16.mxu0 %v2172_v59 }
 0x17b   : > { %1231 = vmatpush1.bf16.msra.mxu0 %v2170_v60 }
 0x17c   : > { %1232 = vmatprep.subr.bf16.mxu0 %v2175_v61 }
 0x17f   : > { %1233 = vmatpush1.bf16.msra.mxu0 %v2173_v62 }
 0x180   : > { %1234 = vmatprep.subr.bf16.mxu0 %v2178_v63 }
 0x183   : > { %1235 = vmatpush1.bf16.msra.mxu0 %v2176_v0 }
 0x184   : > { %1236 = vmatprep.subr.bf16.mxu0 %v2181_v3 }
 0x187   : > { %1237 = vmatpush1.bf16.msra.mxu0 %v2179_v4 }
 0x188   : > { %1238 = vmatprep.subr.bf16.mxu0 %v2184_v5 }
 0x18b   : > { %1239 = vmatpush1.bf16.msra.mxu0 %v2182_v6 }
 0x18c   : > { %1240 = vmatprep.subr.bf16.mxu0 %v2187_v7 }
 0x18f   : > { %1241 = vmatpush1.bf16.msra.mxu0 %v2185_v8 }
 0x190   : > { %1992 = vmatprep.subr.bf16.mxu0 %v2270_v17 }
 0x192   : > { %1243 = vmatmul.mubr.bf16.vlgmr.msra.gmra.mrb[4].mxu0 %v2562_v12  ;;  %v541_v12 = vld [vmem:[%s2847_s6] sm:$0x3] }
 0x193   : > { %1994 = vmatprep.mubr.msk.bf16.mxu0 %vm2271_vm0, %v2270_v17  ;;  %v546_v25 = vrot.slane %v541_v12, %v2581_v23  ;;  %v550_v26 = vrot.slane %v541_v12, %v2584_v24  ;;  %v2191_v12 = vld [vmem:[%s2850_s9 + $0x10] ss:$8 sps:$4 sm:$0xff]  }
 0x198   : > { %1993 = vmatpush3.bf16.xpose.msra.mxu0 %v1253_v19  ;;  %v2193_v19 = vld [vmem:[%s2850_s9 + $0x14] ss:$8 sps:$4 sm:$0xff]  }
 0x199   : > { %1998 = vmatprep.subr.bf16.mxu0 %v2270_v17 }
 0x225   : > { %v747_v27 = vpop.f32.mrb[0].mxu0 }
 0x226   : > { %v748_v28 = vadd.f32 %v747_v27, %v546_v25  ;;  %v749_v29 = vpop.f32.mrb[1].mxu0  ;;  %v2194_v27 = vld [vmem:[%s2850_s9 + $0x20] ss:$8 sps:$4 sm:$0xff]  }
 0x227   : > { %v750_v30 = vadd.f32 %v749_v29, %v550_v26  ;;  %v751_v31 = vpop.f32.mrb[2].mxu0  ;;  %v2196_v26 = vld [vmem:[%s2850_s9 + $0x24] ss:$8 sps:$4 sm:$0xff]   ;;  %v2197_v29 = vld [vmem:[%s2850_s9 + $0x30] ss:$8 sps:$4 sm:$0xff]  }
 0x228   : > { %v754_v32 = vmul.f32 0.088388346, %v748_v28  ;;  %v752_v33 = vpop.f32.mrb[3].mxu0  ;;  %v2199_v28 = vld [vmem:[%s2850_s9 + $0x34] ss:$8 sps:$4 sm:$0xff]  }
 0x229   : > { %v755_v34 = vmul.f32 0.088388346, %v750_v30  ;;  %v2202_v30 = vld [vmem:[%s2850_s9 + $0x44] ss:$8 sps:$4 sm:$0xff]   ;;  %v2200_v31 = vld [vmem:[%s2850_s9 + $0x40] ss:$8 sps:$4 sm:$0xff]  }
 0x22a   : > { %v1252_v35 = vpack.c.bf16 %v754_v32, %v754_v32  ;;  %v2205_v32 = vld [vmem:[%s2850_s9 + $0x54] ss:$8 sps:$4 sm:$0xff]   ;;  %v2203_v33 = vld [vmem:[%s2850_s9 + $0x50] ss:$8 sps:$4 sm:$0xff]  }
 0x22b   : > { %v1361_v36 = vpack.c.bf16 %v755_v34, %v755_v34  ;;  %v2208_v34 = vld [vmem:[%s2850_s9 + $0x64] ss:$8 sps:$4 sm:$0xff]  }
 0x22c   : > { %1995 = vmatmul.mubr.bf16.vlgmr.msra.gmra.mrb[8].mxu0 %v1252_v35  ;;  %v2206_v35 = vld [vmem:[%s2850_s9 + $0x60] ss:$8 sps:$4 sm:$0xff]  }
 0x22d   : > { %2007 = vmatmul.mubr.bf16.vlgmr.msra.gmra.mrb[4].mxu1 %v1361_v36  ;;  %2000 = vmatprep.mubr.msk.bf16.mxu0 %vm2271_vm0, %v2270_v17  ;;  %v2211_v36 = vld [vmem:[%s2850_s9 + $0x74] ss:$8 sps:$4 sm:$0xff]  }
 0x22e   : > { %2012 = vmatprep.mubr.msk.bf16.mxu1 %vm2271_vm0, %v2270_v17  ;;  %v1942_v17 = vld [vmem:[%s447_s15] ss:$0 sm:$0xff] }
 0x265   : > { %v1244_v41 = vpop.f32.mrb[4].mxu0 }
 0x266   : > { %v1245_v42 = vadd.f32 %v1244_v41, %v833_v39  ;;  %v1246_v43 = vpop.f32.mrb[5].mxu0  ;;  %v2212_v39 = vld [vmem:[%s2850_s9 + $0x80] ss:$8 sps:$4 sm:$0xff]   ;;  %v2215_v41 = vld [vmem:[%s2850_s9 + $0x90] ss:$8 sps:$4 sm:$0xff]  }
 0x267   : > { %v1247_v44 = vadd.f32 %v1246_v43, %v837_v40  ;;  %v1248_v45 = vpop.f32.mrb[6].mxu0  ;;  %v2217_v40 = vld [vmem:[%s2850_s9 + $0x94] ss:$8 sps:$4 sm:$0xff]   ;;  %v2218_v43 = vld [vmem:[%s2850_s9 + $0xa0] ss:$8 sps:$4 sm:$0xff]  }
 0x268   : > { %v1313_v46 = vpack.c.bf16 %v1245_v42, %v1245_v42  ;;  %v1249_v47 = vpop.f32.mrb[7].mxu0  ;;  %v2220_v42 = vld [vmem:[%s2850_s9 + $0xa4] ss:$8 sps:$4 sm:$0xff]   ;;  %v2221_v45 = vld [vmem:[%s2850_s9 + $0xb0] ss:$8 sps:$4 sm:$0xff]  }
 0x269   : > { %v1415_v48 = vpack.c.bf16 %v1247_v44, %v1247_v44  ;;  %v2223_v44 = vld [vmem:[%s2850_s9 + $0xb4] ss:$8 sps:$4 sm:$0xff]   ;;  %v2224_v47 = vld [vmem:[%s2850_s9 + $0xc0] ss:$8 sps:$4 sm:$0xff]  }
 0x26a   : > { %v1319_v49 = vsel %vm1317_vm1, %v1313_v46, 0  ;;  %v2226_v46 = vld [vmem:[%s2850_s9 + $0xc4] ss:$8 sps:$4 sm:$0xff]  }
 0x26b   : > { %v1420_v50 = vsel %vm1317_vm1, %v1415_v48, 0  ;;  %1999 = vmatpush3.bf16.msra.mxu0 %v1319_v49  ;;  %v2229_v48 = vld [vmem:[%s2850_s9 + $0xd4] ss:$8 sps:$4 sm:$0xff]   ;;  %v2227_v49 = vld [vmem:[%s2850_s9 + $0xd0] ss:$8 sps:$4 sm:$0xff]  }
 0x26c   : > { %2011 = vmatpush3.bf16.msra.mxu1 %v1420_v50  ;;  %v2232_v50 = vld [vmem:[%s2850_s9 + $0xe4] ss:$8 sps:$4 sm:$0xff]  }
 0x26d   : > { %1668 = vmatprep.subr.bf16.mxu1 %v2190_v10 }
 0x2ff   : > { %v1294_v22 = vpop.f32.mrb[8].mxu0 }
 0x300   : > { %v1996_v51 = vpop.f32.mrb[9].mxu0  ;;  %v1397_v52 = vpop.f32.mrb[4].mxu1  ;;  %v1295_v58 = vadd.f32 %v1942_v17, %v1294_v22  ;;  %v2235_v22 = vld [vmem:[%s2850_s9 + $0xf4] ss:$8 sps:$4 sm:$0xff]  }
 0x301   : > { %v1398_v53 = vadd.f32 %v1942_v17, %v1397_v52  ;;  %v1297_v54 = vpop.f32.mrb[10].mxu0  ;;  %v2008_v55 = vpop.f32.mrb[5].mxu1  ;;  %v2230_v17 = vld [vmem:[%s2850_s9 + $0xe0] ss:$8 sps:$4 sm:$0xff]   ;;  %v2233_v51 = vld [vmem:[%s2850_s9 + $0xf0] ss:$8 sps:$4 sm:$0xff]  }
 0x302   : > { %v1997_v56 = vpop.f32.mrb[11].mxu0  ;;  %v1400_v57 = vpop.f32.mrb[6].mxu1  ;;  %v1301_v61 = vsel %vm1300_vm2, %v1295_v58, -inf }
 0x303   : > { %v2009_v59 = vpop.f32.mrb[7].mxu1  ;;  %v1403_v60 = vsel %vm1300_vm2, %v1398_v53, -inf }
 0x304   : > { %1404 = vmax.xlane.f32.xlu1 %v1403_v60 }
 0x308   : > { %1302 = vmax.xlane.f32.xlu1 %v1301_v61 }
 0x391   : > { %v1405_v62 = vpop.xlane.xlu1 %1404 }
 0x392   : > { %v1406_v63 = vsub.f32 %v1398_v53, %v1405_v62  ;;  %v1496_v62 = vld [vmem:[%s2851_s10] sm:$0x3] }
 0x394   : > { %v1407_v0 = vmul.f32 1.442695, %v1406_v63  ;;  %v1501_v63 = vrot.slane %v1496_v62, %v2581_v23 }
 0x395   : > { %v1303_v3 = vpop.xlane.xlu1 %1302 }
 0x396   : > { %2238 = vpow2.f32 %v1407_v0  ;;  %v1304_v4 = vsub.f32 %v1295_v58, %v1303_v3  ;;  %v1505_v0 = vrot.slane %v1496_v62, %v2584_v24 }
 0x398   : > { %v1305_v5 = vmul.f32 1.442695, %v1304_v4 }
 0x39a   : > { %2240 = vpow2.f32 %v1305_v5 }
 0x3a0   : > { %v2239_v6 = vpop.eup %2238 }
 0x3a1   : > { %v1409_v7 = vsel %vm1300_vm2, %v2239_v6, 0.0 }
 0x3a2   : > { %1410 = vadd.xlane.f32.xlu0 %v1409_v7 }
 0x3a4   : > { %v2241_v8 = vpop.eup %2240 }
 0x3a5   : > { %v1307_v9 = vsel %vm1300_vm2, %v2241_v8, 0.0 }
 0x3a6   : > { %1308 = vadd.xlane.f32.xlu1 %v1307_v9 }
 0x42f   : > { %v1411_v11 = vpop.xlane.xlu0 %1410 }
 0x430   : > { %2242 = vrcp.f32 %v1411_v11 }
 0x433   : > { %v1309_v13 = vpop.xlane.xlu1 %1308 }
 0x434   : > { %2244 = vrcp.f32 %v1309_v13 }
 0x43a   : > { %v2243_v14 = vpop.eup %2242 }
 0x43b   : > { %v1413_v15 = vmul.f32 %v2243_v14, %v2239_v6 }
 0x43d   : > { %v1414_v18 = vpack.c.bf16 %v1413_v15, %v1413_v15 }
 0x43e   : > { %v2245_v20 = vpop.eup %2244 }
 0x43f   : > { %v1311_v21 = vmul.f32 %v2245_v20, %v2241_v8  ;;  %2013 = vmatmul.mubr.msk.bf16.vlgmr.msra.gmra.mrb[8].mxu1 %vm1300_vm2, %v1414_v18 }
 0x440   : > { %1669 = vmatpush1.bf16.msra.mxu1 %v2188_v16 }
 0x441   : > { %v1312_v25 = vpack.c.bf16 %v1311_v21, %v1311_v21  ;;  %1670 = vmatprep.subr.bf16.mxu1 %v2193_v19 }
 0x443   : > { %2001 = vmatmul.mubr.msk.bf16.vlgmr.msra.gmra.mrb[12].mxu0 %vm1300_vm2, %v1312_v25 }
 0x444   : > { %1671 = vmatpush1.bf16.msra.mxu1 %v2191_v12 }
 0x445   : > { %1672 = vmatprep.subr.bf16.mxu1 %v2196_v26 }
 0x448   : > { %1673 = vmatpush1.bf16.msra.mxu1 %v2194_v27 }
 0x449   : > { %1674 = vmatprep.subr.bf16.mxu1 %v2199_v28 }
 0x44c   : > { %1675 = vmatpush1.bf16.msra.mxu1 %v2197_v29 }
 0x44d   : > { %1676 = vmatprep.subr.bf16.mxu1 %v2202_v30 }
 0x450   : > { %1677 = vmatpush1.bf16.msra.mxu1 %v2200_v31 }
 0x451   : > { %1678 = vmatprep.subr.bf16.mxu1 %v2205_v32 }
 0x454   : > { %1679 = vmatpush1.bf16.msra.mxu1 %v2203_v33 }
 0x455   : > { %1680 = vmatprep.subr.bf16.mxu1 %v2208_v34 }
 0x458   : > { %1681 = vmatpush1.bf16.msra.mxu1 %v2206_v35 }
 0x459   : > { %1682 = vmatprep.subr.bf16.mxu1 %v2211_v36 }
 0x45c   : > { %1683 = vmatpush1.bf16.msra.mxu1 %v2209_v37 }
 0x45d   : > { %1684 = vmatprep.subr.bf16.mxu1 %v2214_v38 }
 0x460   : > { %1685 = vmatpush1.bf16.msra.mxu1 %v2212_v39 }
 0x461   : > { %1686 = vmatprep.subr.bf16.mxu1 %v2217_v40 }
 0x464   : > { %1687 = vmatpush1.bf16.msra.mxu1 %v2215_v41 }
 0x465   : > { %1688 = vmatprep.subr.bf16.mxu1 %v2220_v42 }
 0x468   : > { %1689 = vmatpush1.bf16.msra.mxu1 %v2218_v43 }
 0x469   : > { %1690 = vmatprep.subr.bf16.mxu1 %v2223_v44 }
 0x46c   : > { %1691 = vmatpush1.bf16.msra.mxu1 %v2221_v45 }
 0x46d   : > { %1692 = vmatprep.subr.bf16.mxu1 %v2226_v46 }
 0x470   : > { %1693 = vmatpush1.bf16.msra.mxu1 %v2224_v47 }
 0x471   : > { %1694 = vmatprep.subr.bf16.mxu1 %v2229_v48 }
 0x474   : > { %1695 = vmatpush1.bf16.msra.mxu1 %v2227_v49 }
 0x475   : > { %1696 = vmatprep.subr.bf16.mxu1 %v2232_v50 }
 0x478   : > { %1697 = vmatpush1.bf16.msra.mxu1 %v2230_v17 }
 0x479   : > { %1698 = vmatprep.subr.bf16.mxu1 %v2235_v22 }
 0x47c   : > { %1699 = vmatpush1.bf16.msra.mxu1 %v2233_v51 }
 0x512   : > { %v1456_v52 = vpop.f32.mrb[8].mxu1 }
 0x513   : > { %v1463_v53 = vpack.c.bf16 %v1456_v52, %v1456_v52  ;;  %v2014_v54 = vpop.f32.mrb[9].mxu1 }
 0x514   : > { %v1459_v55 = vpop.f32.mrb[10].mxu1 }
 0x515   : > { %v2015_v56 = vpop.f32.mrb[11].mxu1  ;;  %1700 = vmatprep.mubr.bf16.mxu1 %v1463_v53 }
 0x516   : > { %v1355_v57 = vpop.f32.mrb[12].mxu0 }
 0x517   : > { %v1462_v58 = vpack.c.bf16 %v1355_v57, %v1355_v57  ;;  %v2002_v59 = vpop.f32.mrb[13].mxu0 }
 0x518   : > { %v1358_v60 = vpop.f32.mrb[14].mxu0 }
 0x519   : > { %v2003_v61 = vpop.f32.mrb[15].mxu0  ;;  %1701 = vmatmul.mubr.bf16.vlgmr.msra.gmra.mrb[12].mxu1 %v1462_v58 }
 0x5ec   : > { %v1702_v3 = vpop.f32.mrb[12].mxu1 }
 0x5ed   : > { %v1703_v4 = vadd.f32 %v1702_v3, %v1501_v63  ;;  %v1704_v5 = vpop.f32.mrb[13].mxu1 }
 0x5ee   : > { %v1705_v6 = vadd.f32 %v1704_v5, %v1505_v0  ;;  %v1706_v7 = vpop.f32.mrb[14].mxu1 }
 0x5ef   : > { %v1709_v8 = vadd.f32 %v1703_v4, %v2359_v1  ;;  %v1707_v9 = vpop.f32.mrb[15].mxu1 }
 0x5f0   : > { %v1710_v10 = vadd.f32 %v1705_v6, %v2361_v2 }
 0x5f2   : > { %v1983_v11 = vpack.c.bf16 %v1710_v10, %v1709_v8 }
 0x5f4   : > { %1719 = vst [vmem:[%s456_s28] sm:$0xff] %v1983_v11 }
 0x5f5 PF: > { %s21_s19 = sadd.s32 1, %s2268_s19   ;;  %s2853_s17 = smov %s2264_s18 }
 0x5f6   : > { %p18_p5 = scmp.ge.s32.totalorder %s21_s19, 4   ;;  %s2854_s18 = smov %s2856_s20 }
 0x5f8   :  { %20 = sbr.rel (!%p18_p5) target bundleno = 2 (0x2), region = 100 }

// kernel: mbart_forward.11
= control target key start
LH: loop header
LB: loop body
LE: loop exit
PB: predicated region body
PF: predicated region fallthrough
CT: control target
= control target key end

     0   :  { %v527_v3 = vmov 0   ;;  %s709_s0 = inlined_call_operand.vmem [shape: bf16[16,256], index: 0, kind: input, shape index: {}]   ;;  %s710_s1 = inlined_call_operand.vmem [shape: s32[16,1], index: 1, kind: input, shape index: {}]   ;;  %s711_s2 = inlined_call_operand.vmem [shape: bf16[256,256], index: 2, kind: input, shape index: {}]   ;;  %s712_s3 = inlined_call_operand.vmem [shape: f32[1,256], index: 3, kind: input, shape index: {}]   ;;  %s713_s4 = inlined_call_operand.hbm [shape: bf16[16,256], index: 4, kind: output, shape index: {0}]   ;;  %s714_s5 = inlined_call_operand.vmem [shape: f32[16,1], index: 5, kind: output, shape index: {1}]  }
   0x1   :  { %v440_v0 = vld [vmem:[%s711_s2 + $0x4] ss:$8 sps:$4 sm:$0xff]   ;;  %v442_v1 = vld [vmem:[%s711_s2] ss:$8 sps:$4 sm:$0xff]   ;;  %v443_v2 = vld [vmem:[%s711_s2 + $0x14] ss:$8 sps:$4 sm:$0xff]   ;;  %438 = vset.pattern.permute.xlu1 %v527_v3  ;;  %439 = vset.pattern.permute.xlu0 %v527_v3 }
   0x2   :  { %236 = vmatprep.subr.bf16.mxu0 %v440_v0  ;;  %v445_v4 = vld [vmem:[%s711_s2 + $0x10] ss:$8 sps:$4 sm:$0xff]   ;;  %v446_v5 = vld [vmem:[%s711_s2 + $0x24] ss:$8 sps:$4 sm:$0xff]   ;;  %v448_v6 = vld [vmem:[%s711_s2 + $0x20] ss:$8 sps:$4 sm:$0xff]  }
   0x3   :  { %237 = vmatpush1.bf16.xpose.msra.mxu0 %v442_v1  ;;  %v449_v7 = vld [vmem:[%s711_s2 + $0x34] ss:$8 sps:$4 sm:$0xff]   ;;  %v490_v8 = vld [vmem:[%s709_s0 + $0x4] ss:$8 sps:$4 sm:$0xff]   ;;  %v451_v10 = vld [vmem:[%s711_s2 + $0x30] ss:$8 sps:$4 sm:$0xff]  }
   0x4   :  { %238 = vmatprep.subr.bf16.mxu0 %v443_v2  ;;  %v589_v9 = vld [vmem:[%s710_s1] sm:$0xff] }
   0x5   :  { %329 = vperm.xlu1 %438, %v589_v9  }
   0xb   :  { %239 = vmatpush1.bf16.xpose.msra.mxu0 %v445_v4 }
   0xc   :  { %240 = vmatprep.subr.bf16.mxu0 %v446_v5 }
  0x13   :  { %241 = vmatpush1.bf16.xpose.msra.mxu0 %v448_v6 }
  0x14   :  { %242 = vmatprep.subr.bf16.mxu0 %v449_v7 }
  0x15   :  { %11 = vsyncpa [#allocation3], 0  ;;  %v452_v11 = vld [vmem:[%s711_s2 + $0x44] ss:$8 sps:$4 sm:$0xff]   ;;  %268 = vmatprep.mubr.bf16.mxu0 %v490_v8  ;;  %v454_v13 = vld [vmem:[%s711_s2 + $0x40] ss:$8 sps:$4 sm:$0xff]   ;;  %v56_v37 = vlaneseq }
  0x16   :  { %v601_v12 = vld [vmem:[%s710_s1 + $0x8] sm:$0xff]  ;;  %v455_v14 = vld [vmem:[%s711_s2 + $0x54] ss:$8 sps:$4 sm:$0xff]   ;;  %v457_v15 = vld [vmem:[%s711_s2 + $0x50] ss:$8 sps:$4 sm:$0xff]   ;;  %v528_v6 = vmov 0.0  }
  0x17   :  { %332 = vperm.xlu1 %438, %v601_v12   ;;  %v458_v16 = vld [vmem:[%s711_s2 + $0x64] ss:$8 sps:$4 sm:$0xff]   ;;  %v460_v17 = vld [vmem:[%s711_s2 + $0x60] ss:$8 sps:$4 sm:$0xff]   ;;  %v461_v18 = vld [vmem:[%s711_s2 + $0x74] ss:$8 sps:$4 sm:$0xff]  }
  0x18   :  { %v463_v19 = vld [vmem:[%s711_s2 + $0x70] ss:$8 sps:$4 sm:$0xff]   ;;  %v464_v20 = vld [vmem:[%s711_s2 + $0x84] ss:$8 sps:$4 sm:$0xff]   ;;  %v466_v21 = vld [vmem:[%s711_s2 + $0x80] ss:$8 sps:$4 sm:$0xff]  }
  0x19   :  { %v467_v22 = vld [vmem:[%s711_s2 + $0x94] ss:$8 sps:$4 sm:$0xff]   ;;  %v469_v23 = vld [vmem:[%s711_s2 + $0x90] ss:$8 sps:$4 sm:$0xff]   ;;  %v470_v24 = vld [vmem:[%s711_s2 + $0xa4] ss:$8 sps:$4 sm:$0xff]  }
  0x1a   :  { %v472_v25 = vld [vmem:[%s711_s2 + $0xa0] ss:$8 sps:$4 sm:$0xff]   ;;  %v473_v26 = vld [vmem:[%s711_s2 + $0xb4] ss:$8 sps:$4 sm:$0xff]   ;;  %v475_v27 = vld [vmem:[%s711_s2 + $0xb0] ss:$8 sps:$4 sm:$0xff]  }
  0x1b   :  { %243 = vmatpush1.bf16.xpose.msra.mxu0 %v451_v10  ;;  %v476_v28 = vld [vmem:[%s711_s2 + $0xc4] ss:$8 sps:$4 sm:$0xff]   ;;  %v478_v29 = vld [vmem:[%s711_s2 + $0xc0] ss:$8 sps:$4 sm:$0xff]   ;;  %v479_v30 = vld [vmem:[%s711_s2 + $0xd4] ss:$8 sps:$4 sm:$0xff]  }
  0x1c   :  { %244 = vmatprep.subr.bf16.mxu0 %v452_v11  ;;  %v481_v31 = vld [vmem:[%s711_s2 + $0xd0] ss:$8 sps:$4 sm:$0xff]   ;;  %v482_v32 = vld [vmem:[%s711_s2 + $0xe4] ss:$8 sps:$4 sm:$0xff]   ;;  %v484_v33 = vld [vmem:[%s711_s2 + $0xe0] ss:$8 sps:$4 sm:$0xff]  }
  0x1d   :  { %v485_v34 = vld [vmem:[%s711_s2 + $0xf4] ss:$8 sps:$4 sm:$0xff]   ;;  %v487_v35 = vld [vmem:[%s711_s2 + $0xf0] ss:$8 sps:$4 sm:$0xff]   ;;  %v488_v36 = vld [vmem:[%s709_s0] ss:$8 sps:$4 sm:$0xff]  }
  0x1e   :  { %v57_v38 = vshrl.u32 %v56_v37, 7  ;;  %v54_v40 = vld [vmem:[%s712_s3] sm:$0x3]  ;;  %v326_v59 = vand.u32 127, %v56_v37  ;;  %s529_s0 = smov [#allocation2]  }
  0x1f   :  { %s374_s2 = sshll.u32 %s529_s0, 4  ;;  %s375_s2 = int_to_ptr.vmem [resolvable:$true] %s374_s2 }
  0x20   :  { %v58_v39 = vsub.s32 0, %v57_v38  ;;  %v62_v41 = vsub.s32 1, %v57_v38  ;;  %v327_v2 = vadd.s32 128, %v326_v59  ;;  %s503_s3 = scalar_lea.vmem %s375_s2, 256  ;;  %p508_p1 = scmp.lt.s32.totalorder %s375_s2, %s375_s2 }
  0x21   :  { %p504_p0 = scmp.ne.s32.totalorder %s375_s2, %s503_s3  ;;  %p509_p2 = scmp.lt.s32.totalorder %s503_s3, %s503_s3 }
  0x22   :  { %v59_v42 = vrot.slane %v54_v40, %v58_v39  ;;  %v63_v43 = vrot.slane %v54_v40, %v62_v41 }
  0x23   :  { %245 = vmatpush1.bf16.xpose.msra.mxu0 %v454_v13  ;;  %p510_p3 = por %p509_p2, %p508_p1 }
  0x24   :  { %246 = vmatprep.subr.bf16.mxu0 %v455_v14 }
  0x25   :  { %p511_p4 = pnand %p510_p3, %p504_p0 }
  0x2b   :  { %247 = vmatpush1.bf16.xpose.msra.mxu0 %v457_v15 }
  0x2c   :  { %248 = vmatprep.subr.bf16.mxu0 %v458_v16 }
  0x33   :  { %249 = vmatpush1.bf16.xpose.msra.mxu0 %v460_v17 }
  0x34   :  { %250 = vmatprep.subr.bf16.mxu0 %v461_v18 }
  0x3b   :  { %251 = vmatpush1.bf16.xpose.msra.mxu0 %v463_v19 }
  0x3c   :  { %252 = vmatprep.subr.bf16.mxu0 %v464_v20 }
  0x43   :  { %253 = vmatpush1.bf16.xpose.msra.mxu0 %v466_v21 }
  0x44   :  { %254 = vmatprep.subr.bf16.mxu0 %v467_v22 }
  0x4b   :  { %255 = vmatpush1.bf16.xpose.msra.mxu0 %v469_v23 }
  0x4c   :  { %256 = vmatprep.subr.bf16.mxu0 %v470_v24 }
  0x53   :  { %257 = vmatpush1.bf16.xpose.msra.mxu0 %v472_v25 }
  0x54   :  { %258 = vmatprep.subr.bf16.mxu0 %v473_v26 }
  0x5b   :  { %259 = vmatpush1.bf16.xpose.msra.mxu0 %v475_v27 }
  0x5c   :  { %260 = vmatprep.subr.bf16.mxu0 %v476_v28 }
  0x63   :  { %261 = vmatpush1.bf16.xpose.msra.mxu0 %v478_v29 }
  0x64   :  { %262 = vmatprep.subr.bf16.mxu0 %v479_v30 }
  0x6b   :  { %263 = vmatpush1.bf16.xpose.msra.mxu0 %v481_v31 }
  0x6c   :  { %264 = vmatprep.subr.bf16.mxu0 %v482_v32 }
  0x73   :  { %265 = vmatpush1.bf16.xpose.msra.mxu0 %v484_v33 }
  0x74   :  { %266 = vmatprep.subr.bf16.mxu0 %v485_v34 }
  0x7b   :  { %267 = vmatpush1.bf16.xpose.msra.mxu0 %v487_v35 }
  0x82   :  { %269 = vmatmul.mubr.bf16.vlgmr.msra.gmra.mrb[0].mxu0 %v488_v36 }
  0x84   :  { %v330_v1 = vpop.permute.xlu1 %329 }
  0x85   :  { %vm334_vm0 = vcmp.eq.s32.totalorder %v326_v59, %v330_v1  ;;  %vm335_vm1 = vcmp.eq.s32.totalorder %v327_v2, %v330_v1 }
  0x86   :  { %v425_v7 = vsel %vm334_vm0, 1.0, %v528_v6  ;;  %v426_v8 = vsel %vm335_vm1, 1.0, %v528_v6 }
  0x96   :  { %v333_v5 = vpop.permute.xlu1 %332 }
  0x97   :  { %vm336_vm2 = vcmp.eq.s32.totalorder %v326_v59, %v333_v5  ;;  %vm337_vm3 = vcmp.eq.s32.totalorder %v327_v2, %v333_v5 }
  0x98   :  { %v427_v16 = vsel %vm336_vm2, 1.0, %v528_v6  ;;  %v428_v17 = vsel %vm337_vm3, 1.0, %v528_v6 }
 0x155   :  { %v270_v44 = vpop.f32.mrb[0].mxu0 }
 0x156   :  { %v271_v45 = vadd.f32 %v270_v44, %v59_v42  ;;  %v272_v46 = vpop.f32.mrb[1].mxu0 }
 0x157   :  { %v273_v47 = vadd.f32 %v272_v46, %v63_v43  ;;  %v274_v48 = vpop.f32.mrb[2].mxu0 }
 0x158   :  { %v275_v49 = vadd.f32 %v274_v48, %v59_v42  ;;  %v276_v50 = vpop.f32.mrb[3].mxu0  ;;  %v352_v14 = vmul.f32 %v425_v7, %v271_v45 }
 0x159   :  { %v431_v51 = vpack.c.bf16 %v273_v47, %v271_v45  ;;  %v277_v52 = vadd.f32 %v276_v50, %v63_v43  ;;  %v293_v53 = vmax.f32 %v271_v45, %v273_v47  ;;  %v353_v15 = vmul.f32 %v426_v8, %v273_v47 }
 0x15a   :  { %v354_v22 = vmul.f32 %v427_v16, %v275_v49 }
 0x15b   :  { %291 = vst [vmem:[#allocation2] sm:$0xff] %v431_v51  ;;  %v432_v54 = vpack.c.bf16 %v277_v52, %v275_v49  ;;  %294 = vmax.xlane.f32.xlu0 %v293_v53  ;;  %v296_v55 = vmax.f32 %v275_v49, %v277_v52  ;;  %v356_v20 = vadd.f32 %v353_v15, %v352_v14 }
 0x15c   :  { %v355_v23 = vmul.f32 %v428_v17, %v277_v52 }
 0x15d   :  { %292 = vst [vmem:[#allocation2 + $0x8] sm:$0xff] %v432_v54 }
 0x15e   :  { %v359_v24 = vadd.f32 %v355_v23, %v354_v22 }
 0x15f   :  { %297 = vmax.xlane.f32.xlu0 %v296_v55 }
 0x1e8   :  { %v679_v56 = vpop.xlane.xlu0 %294 }
 0x1e9   :  { %v299_v57 = vsub.f32 %v271_v45, %v679_v56  ;;  %v300_v58 = vsub.f32 %v273_v47, %v679_v56 }
 0x1eb   :  { %v303_v60 = vmul.f32 1.442695, %v299_v57  ;;  %v305_v61 = vmul.f32 1.442695, %v300_v58 }
 0x1ec   :  { %v683_v62 = vpop.xlane.xlu0 %297 }
 0x1ed   :  { %491 = vpow2.f32 %v303_v60  ;;  %v301_v63 = vsub.f32 %v275_v49, %v683_v62  ;;  %v302_v0 = vsub.f32 %v277_v52, %v683_v62 }
 0x1ee   :  { %493 = vpow2.f32 %v305_v61 }
 0x1ef   :  { %v307_v3 = vmul.f32 1.442695, %v301_v63  ;;  %v309_v4 = vmul.f32 1.442695, %v302_v0 }
 0x1f1   :  { %495 = vpow2.f32 %v307_v3 }
 0x1f2   :  { %497 = vpow2.f32 %v309_v4 }
 0x1f7   :  { %v492_v10 = vpop.eup %491 }
 0x1f8   :  { %v494_v11 = vpop.eup %493 }
 0x1f9   :  { %v311_v13 = vadd.f32 %v494_v11, %v492_v10 }
 0x1fb   :  { %v496_v18 = vpop.eup %495  ;;  %312 = vadd.xlane.f32.xlu0 %v311_v13 }
 0x1fc   :  { %v498_v19 = vpop.eup %497 }
 0x1fd   :  { %v314_v21 = vadd.f32 %v498_v19, %v496_v18 }
 0x1ff   :  { %357 = vadd.xlane.f32.xlu0 %v356_v20  ;;  %315 = vadd.xlane.f32.xlu1 %v314_v21 }
 0x203   :  { %360 = vadd.xlane.f32.xlu0 %v359_v24 }
 0x204   :  { %514 = shalt.err (!%p511_p4)
}
 0x205   :  { %s515_s17 = scalar_lea.hbm %s713_s4, 256 }
 0x206   :  { %p516_p5 = scmp.ne.s32.totalorder %s713_s4, %s515_s17  ;;  %p519_p6 = scmp.lt.u32.totalorder %s515_s17, %s713_s4 }
 0x208   :  { %p521_p7 = pnand %p519_p6, %p516_p5 }
 0x20a   :  { %524 = shalt.err (!%p521_p7)
}
 0x20b   :  { %s530_s22 = smov 128   ;;  %s531_s1 = smov 8   ;;  %vm346_vm4 = vcmp.ge.s32.totalorder %v589_v9, 0  ;;  %vm347_vm5 = vcmp.ge.s32.totalorder %v601_v12, 0  ;;  %vm366_vm6 = vcmask 7168  }
 0x20c   :  { %380 = dma.vmem_to_hbm [thread:$0]  %s375_s2, 256, %s713_s4, [#allocation3], %s530_s22, %s530_s22, %s531_s1   ;;  %v429_v32 = vsel %vm346_vm4, 1.0, %v528_v6  ;;  %v430_v37 = vsel %vm347_vm5, 1.0, %v528_v6 }
 0x288   :  { %v313_v25 = vpop.xlane.xlu0 %312 }
 0x289   :  { %499 = vlog2.f32 %v313_v25 }
 0x28c   :  { %v316_v26 = vpop.xlane.xlu1 %315  ;;  %v358_v29 = vpop.xlane.xlu0 %357 }
 0x28d   :  { %501 = vlog2.f32 %v316_v26 }
 0x290   :  { %v361_v38 = vpop.xlane.xlu0 %360 }
 0x293   :  { %v500_v27 = vpop.eup %499 }
 0x294   :  { %v318_v28 = vmul.f32 0.6931472, %v500_v27 }
 0x296   :  { %v321_v30 = vadd.f32 %v318_v28, %v679_v56 }
 0x297   :  { %v502_v31 = vpop.eup %501 }
 0x298   :  { %v320_v33 = vmul.f32 0.6931472, %v502_v31  ;;  %v362_v34 = vsub.f32 %v321_v30, %v358_v29 }
 0x29a   :  { %v364_v35 = vmul.f32 %v429_v32, %v362_v34  ;;  %v322_v36 = vadd.f32 %v320_v33, %v683_v62 }
 0x29c   :  { %367 = vst.msk [vmem:[%s714_s5] sm:$0xff] %vm366_vm6, %v364_v35  ;;  %v363_v9 = vsub.f32 %v322_v36, %v361_v38 }
 0x29e   :  { %v365_v39 = vmul.f32 %v430_v37, %v363_v9 }
 0x2a0   :  { %368 = vst.msk [vmem:[%s714_s5 + $0x8] sm:$0xff] %vm366_vm6, %v365_v39 }
 0x2a1   :  { %525 = dma.done.wait [#allocation3], 256  }
 0x2a2   :  { %526 = vsyncadd [#allocation3], 4294967040 }
 0x2a3   :  { %388 = vsyncpa [#allocation3], 1 }

</bundles_post_ra>
